<compile_context>
chip_gen: v5e
topology: v5e:2x2
jax: 0.10.0
libtpu: 0.0.40
codegen_flags: <defaults>
</compile_context>

<pallas_src>
import math

import jax
import jax.numpy as jnp
from jax import lax
from jax.experimental import pallas as pl
from jax.experimental.pallas import tpu as pltpu


# ----------------------------------------------------------------------------
# helpers
# ----------------------------------------------------------------------------
def _diag_mask(n):
    row = lax.broadcasted_iota(jnp.int32, (n, n), 0)
    col = lax.broadcasted_iota(jnp.int32, (n, n), 1)
    return row == col


def _graphs_per_step(hr_dim, batch):
    """G graphs per grid step so packed stores are (G*hr_dim) >= 128 lanes wide."""
    if hr_dim >= 128 or 128 % hr_dim != 0:
        return 1
    return max(1, math.gcd(128 // hr_dim, batch))


# ----------------------------------------------------------------------------
# Pallas kernels (two fused kernels around the eigh split point)
# ----------------------------------------------------------------------------
def encode_kernel(lr_ref, lrt_ref, w0_ref, a_ref, gc_ref):
    """normalize_adj_torch + gc0 (relu) for G graphs, fused.

    Per graph:  A[i,j] = r_i * lr[j,i] * r_j, r = rsqrt(rowsum(lr)), isinf -> 0
                gcnew  = relu(A @ W0)   (gc0's input is eye(lr_dim) so X @ W0 == W0)
    gcnew for the G graphs is packed along lanes -> one (lr_dim, G*hr_dim) store.
    """
    w0 = w0_ref[...]
    n_graphs = lr_ref.shape[0]
    gc_parts = []
    for g in range(n_graphs):
        lr = lr_ref[g]            # (N, N)
        lrt = lrt_ref[g]          # (N, N) == lr.T, pre-transposed in the wrapper
        # r as a column (from lr) and a row (from lr^T): same values, no in-kernel
        # transpose.  rsqrt(0) = inf -> 0 matches torch's isinf-only guard
        # (negative rowsums would NaN in torch too; lr is assumed non-negative).
        r_col = lax.rsqrt(jnp.sum(lr, axis=1, keepdims=True))           # (N, 1)
        r_col = jnp.where(jnp.isinf(r_col), 0.0, r_col)
        r_row = lax.rsqrt(jnp.sum(lrt, axis=0, keepdims=True))          # (1, N)
        r_row = jnp.where(jnp.isinf(r_row), 0.0, r_row)
        a = r_col * lrt * r_row                                         # D^-1/2 lr^T D^-1/2
        a_ref[g] = a
        gc_parts.append(jnp.maximum(
            jnp.dot(a, w0, preferred_element_type=jnp.float32), 0.0))
    gc_ref[0] = jnp.concatenate(gc_parts, axis=1)                       # lane-dense store


def gsr_decoder_kernel(aw_ref, ut_ref, x_ref, w1_ref, w2_ref, z_ref):
    """GSRLayer + gc1 (relu) + gc2 (tanh) + symmetrize + zero-diag for G graphs, fused.

    Runs after the batched eigh; all U-independent work (Wg @ s_d folding, U^T)
    was hoisted into the wrapper.  Results for the G graphs are packed along the
    lane axis -> one (hr_dim, G*hr_dim) store.
    """
    f32 = jnp.float32
    aw = aw_ref[...]                  # (hr, lr) == Wg @ s_d, folded in the wrapper
    w1 = w1_ref[...]
    w2 = w2_ref[...]
    hr_dim = aw.shape[0]
    n_graphs = ut_ref.shape[0]
    x_all = x_ref[0]                  # (lr, G*hr) packed gcnew
    diag = _diag_mask(hr_dim)
    dn_bt = (((1,), (1,)), ((), ()))  # contract last dims: M @ N^T, no transpose op
    outs = []
    for g in range(n_graphs):
        x_g = x_all[:, g * hr_dim:(g + 1) * hr_dim]                     # (lr, hr)
        b = jnp.dot(aw, ut_ref[g], preferred_element_type=f32)          # a @ U^T  (hr, lr)
        f_d = jnp.abs(jnp.dot(b, x_g, preferred_element_type=f32))      # (hr, hr)
        adj = jnp.where(diag, 1.0, f_d)                                 # fill_diagonal_(1)

        # Xo = adj @ adj^T is exactly symmetric -> (Xo + Xo^T)/2 is a no-op, skipped.
        xo = lax.dot_general(adj, adj, dn_bt, preferred_element_type=f32)
        z0 = jnp.abs(jnp.where(diag, 1.0, xo))

        # decoder: gc1 (relu) -> gc2 (tanh) -> symmetrize -> zero diagonal
        h = jnp.dot(z0, w1, preferred_element_type=f32)
        h = jnp.maximum(jnp.dot(adj, h, preferred_element_type=f32), 0.0)
        out = jnp.dot(h, w2, preferred_element_type=f32)
        out = jnp.tanh(jnp.dot(adj, out, preferred_element_type=f32))
        out = (out + out.T) * 0.5
        outs.append(jnp.where(diag, 0.0, out))
    z_ref[0] = jnp.concatenate(outs, axis=1)                            # lane-dense store


# ----------------------------------------------------------------------------
# parameter initialization (deterministic, mirrors the module __init__ shapes)
# ----------------------------------------------------------------------------
def glorot_uniform(key, shape):
    fan_in, fan_out = shape
    bound = math.sqrt(6.0 / (fan_in + fan_out))
    return jax.random.uniform(key, shape, jnp.float32, -bound, bound)


def init_params(key, lr_dim, hr_dim, hidden_dim):
    k0, kg, k1, k2 = jax.random.split(key, 4)
    return {
        "gc0_w": glorot_uniform(k0, (lr_dim, hr_dim)),      # GraphConvolution gc0
        "gsr_w": glorot_uniform(kg, (hr_dim, hr_dim)),       # GSRLayer weights
        "gc1_w": glorot_uniform(k1, (hr_dim, hidden_dim)),   # gc1
        "gc2_w": glorot_uniform(k2, (hidden_dim, hr_dim)),   # gc2
    }


# ----------------------------------------------------------------------------
# forward pass (fully jitted: 2 batched pallas_calls + batched eigh)
# ----------------------------------------------------------------------------
@jax.jit
def super_blt_graph_forward(lr_batch, params):
    f32 = jnp.float32
    lr_batch = lr_batch.astype(f32)
    batch, lr_dim, _ = lr_batch.shape
    hr_dim = params["gc0_w"].shape[1]
    hidden_dim = params["gc1_w"].shape[1]
    # GSRLayer's s_d = [I; I] stack requires hr_dim == 2 * lr_dim (static check).
    assert hr_dim == 2 * lr_dim, "GSRLayer requires hr_dim == 2 * lr_dim"

    n_g = _graphs_per_step(hr_dim, batch)     # graphs packed per grid step
    steps = batch // n_g
    par = pltpu.CompilerParams(dimension_semantics=("parallel",))

    # lr^T produced by XLA so the kernel never does an in-kernel transpose.
    lr_t = jnp.swapaxes(lr_batch, -1, -2)

    # kernel 1: A = normalize_adj(lr) ; gcnew = relu(A @ W0)   (batched, lane-packed)
    A, gc_packed = pl.pallas_call(
        encode_kernel,
        grid=(steps,),
        out_shape=(jax.ShapeDtypeStruct((batch, lr_dim, lr_dim), f32),
                   jax.ShapeDtypeStruct((steps, lr_dim, n_g * hr_dim), f32)),
        in_specs=[pl.BlockSpec((n_g, lr_dim, lr_dim), lambda s: (s, 0, 0)),
                  pl.BlockSpec((n_g, lr_dim, lr_dim), lambda s: (s, 0, 0)),
                  pl.BlockSpec((lr_dim, hr_dim), lambda s: (0, 0))],
        out_specs=(pl.BlockSpec((n_g, lr_dim, lr_dim), lambda s: (s, 0, 0)),
                   pl.BlockSpec((1, lr_dim, n_g * hr_dim), lambda s: (s, 0, 0))),
        compiler_params=par,
    )(lr_batch, lr_t, params["gc0_w"])

    # U-independent weight folding (Wg @ [I; I] == Wg[:, :lr] + Wg[:, lr:]),
    # hoisted off the serial post-eigh critical path.
    a_w = params["gsr_w"][:, :lr_dim] + params["gsr_w"][:, lr_dim:]

    # TODO(synk): torch.linalg.eigh has no Pallas equivalent; computed with the
    # batched jnp.linalg.eigh inside the same jitted program.
    _, U = jnp.linalg.eigh(A, UPLO="U")
    U_t = jnp.swapaxes(U, -1, -2).astype(f32)   # feed U^T so the kernel never transposes

    # kernel 2: GSRLayer + gc1 + gc2 + symmetrize + zero-diag   (batched, lane-packed)
    z_packed = pl.pallas_call(
        gsr_decoder_kernel,
        grid=(steps,),
        out_shape=jax.ShapeDtypeStruct((steps, hr_dim, n_g * hr_dim), f32),
        in_specs=[pl.BlockSpec((hr_dim, lr_dim), lambda s: (0, 0)),
                  pl.BlockSpec((n_g, lr_dim, lr_dim), lambda s: (s, 0, 0)),
                  pl.BlockSpec((1, lr_dim, n_g * hr_dim), lambda s: (s, 0, 0)),
                  pl.BlockSpec((hr_dim, hidden_dim), lambda s: (0, 0)),
                  pl.BlockSpec((hidden_dim, hr_dim), lambda s: (0, 0))],
        out_specs=pl.BlockSpec((1, hr_dim, n_g * hr_dim), lambda s: (s, 0, 0)),
        compiler_params=par,
    )(a_w, U_t, gc_packed, params["gc1_w"], params["gc2_w"])

    # unpack lane-packed (steps, hr, G*hr) -> (B, hr, hr) in XLA (cheap at this size)
    z = z_packed.reshape(steps, hr_dim, n_g, hr_dim)
    z = z.transpose(0, 2, 1, 3).reshape(batch, hr_dim, hr_dim)
    return z


# ----------------------------------------------------------------------------
# main
# ----------------------------------------------------------------------------
if __name__ == "__main__":
    LR_DIM = 16
    HR_DIM = 32          # GSRLayer requires hr_dim == 2 * lr_dim
    HIDDEN_DIM = 16
    BATCH = 8            # -> 4 graphs per grid step, 128-lane packed stores

    key = jax.random.PRNGKey(0)
    k_lr, k_par = jax.random.split(key)

    # symmetric, non-negative "connectome" adjacencies (batch of lr inputs)
    raw = jax.random.uniform(k_lr, (BATCH, LR_DIM, LR_DIM), jnp.float32)
    lr = (raw + jnp.swapaxes(raw, -1, -2)) * 0.5

    params = init_params(k_par, LR_DIM, HR_DIM, HIDDEN_DIM)

    z = super_blt_graph_forward(lr, params)
    z = jax.block_until_ready(z)

    assert z.shape == (BATCH, HR_DIM, HR_DIM)
    assert bool(jnp.all(jnp.isfinite(z)))
    # every output must be symmetric with zero diagonal
    assert bool(jnp.allclose(z, jnp.swapaxes(z, -1, -2), atol=1e-5))
    assert bool(jnp.allclose(jnp.diagonal(z, axis1=-2, axis2=-1), 0.0))

    print("KERNEL_OK")
</pallas_src>

<mosaic_0001>
module attributes {stable_mosaic.version = 11 : i64} {
  func.func @encode_kernel(%arg0: i32, %arg1: memref<4x16x16xf32, #tpu.memory_space<vmem>>, %arg2: memref<4x16x16xf32, #tpu.memory_space<vmem>>, %arg3: memref<16x32xf32, #tpu.memory_space<vmem>>, %arg4: memref<4x16x16xf32, #tpu.memory_space<vmem>>, %arg5: memref<1x16x128xf32, #tpu.memory_space<vmem>>) attributes {dimension_semantics = [#tpu.dimension_semantics<parallel>], iteration_bounds = array<i64: 2>, scalar_prefetch = 0 : i64, scratch_operands = 0 : i64, tpu.core_type = #tpu.core_type<tc>, window_params = [{transform_indices = @transform_0, window_bounds = array<i64: 4, 16, 16>}, {transform_indices = @transform_1, window_bounds = array<i64: 4, 16, 16>}, {pipeline_mode = #tpu.pipeline_mode<synchronous>, transform_indices = @transform_2, window_bounds = array<i64: 16, 32>}, {transform_indices = @transform_3, window_bounds = array<i64: 4, 16, 16>}, {transform_indices = @transform_4, window_bounds = array<i64: 1, 16, 128>}]} {
    %c0 = arith.constant 0 : index
    %c0_0 = arith.constant 0 : index
    %0 = vector.load %arg3[%c0, %c0_0] : memref<16x32xf32, #tpu.memory_space<vmem>>, vector<16x32xf32>
    %c0_1 = arith.constant 0 : index
    %c0_2 = arith.constant 0 : index
    %c0_3 = arith.constant 0 : index
    %1 = vector.load %arg1[%c0_1, %c0_2, %c0_3] : memref<4x16x16xf32, #tpu.memory_space<vmem>>, vector<1x16x16xf32>
    %2 = vector.shape_cast %1 : vector<1x16x16xf32> to vector<16x16xf32>
    %c0_4 = arith.constant 0 : index
    %c0_5 = arith.constant 0 : index
    %c0_6 = arith.constant 0 : index
    %3 = vector.load %arg2[%c0_4, %c0_5, %c0_6] : memref<4x16x16xf32, #tpu.memory_space<vmem>>, vector<1x16x16xf32>
    %4 = vector.shape_cast %3 : vector<1x16x16xf32> to vector<16x16xf32>
    %cst = arith.constant dense<0.000000e+00> : vector<16xf32>
    %5 = vector.multi_reduction <add>, %2, %cst [1] : vector<16x16xf32> to vector<16xf32>
    %6 = vector.shape_cast %5 : vector<16xf32> to vector<16x1xf32>
    %7 = math.rsqrt %6 : vector<16x1xf32>
    %8 = math.absf %7 : vector<16x1xf32>
    %cst_7 = arith.constant 0x7F800000 : f32
    %9 = vector.broadcast %cst_7 : f32 to vector<16x1xf32>
    %10 = arith.cmpf oeq, %8, %9 : vector<16x1xf32>
    %cst_8 = arith.constant 0.000000e+00 : f32
    %11 = vector.broadcast %cst_8 : f32 to vector<16x1xf32>
    %12 = arith.select %10, %11, %7 : vector<16x1xi1>, vector<16x1xf32>
    %cst_9 = arith.constant dense<0.000000e+00> : vector<16xf32>
    %13 = vector.multi_reduction <add>, %4, %cst_9 [0] : vector<16x16xf32> to vector<16xf32>
    %14 = vector.shape_cast %13 : vector<16xf32> to vector<1x16xf32>
    %15 = math.rsqrt %14 : vector<1x16xf32>
    %16 = math.absf %15 : vector<1x16xf32>
    %cst_10 = arith.constant 0x7F800000 : f32
    %17 = vector.broadcast %cst_10 : f32 to vector<1x16xf32>
    %18 = arith.cmpf oeq, %16, %17 : vector<1x16xf32>
    %cst_11 = arith.constant 0.000000e+00 : f32
    %19 = vector.broadcast %cst_11 : f32 to vector<1x16xf32>
    %20 = arith.select %18, %19, %15 : vector<1x16xi1>, vector<1x16xf32>
    %21 = vector.broadcast %12 : vector<16x1xf32> to vector<16x16xf32>
    %22 = arith.mulf %21, %4 : vector<16x16xf32>
    %23 = vector.broadcast %20 : vector<1x16xf32> to vector<16x16xf32>
    %24 = arith.mulf %22, %23 : vector<16x16xf32>
    %c0_12 = arith.constant 0 : index
    %c0_13 = arith.constant 0 : index
    %c0_14 = arith.constant 0 : index
    %25 = vector.load %arg4[%c0_12, %c0_13, %c0_14] : memref<4x16x16xf32, #tpu.memory_space<vmem>>, vector<1x16x16xf32>
    %26 = vector.shape_cast %25 : vector<1x16x16xf32> to vector<16x16xf32>
    %27 = vector.shape_cast %24 : vector<16x16xf32> to vector<1x16x16xf32>
    tpu.vector_store %arg4[%c0_12, %c0_13, %c0_14], %27 {strides = array<i32>} : memref<4x16x16xf32, #tpu.memory_space<vmem>>, vector<1x16x16xf32>,
    %cst_15 = arith.constant dense<0.000000e+00> : vector<16x32xf32>
    %28 = tpu.matmul %24, %0, %cst_15 {dimension_numbers = #tpu.dot_dimension_numbers<[1], [0], [0], [1], [0, 0, 1, 1], [], []>} : vector<16x16xf32>, vector<16x32xf32>, vector<16x32xf32> -> vector<16x32xf32>
    %cst_16 = arith.constant 0.000000e+00 : f32
    %29 = vector.broadcast %cst_16 : f32 to vector<16x32xf32>
    %30 = arith.maximumf %28, %29 : vector<16x32xf32>
    %c1 = arith.constant 1 : index
    %c0_17 = arith.constant 0 : index
    %c0_18 = arith.constant 0 : index
    %31 = vector.load %arg1[%c1, %c0_17, %c0_18] : memref<4x16x16xf32, #tpu.memory_space<vmem>>, vector<1x16x16xf32>
    %32 = vector.shape_cast %31 : vector<1x16x16xf32> to vector<16x16xf32>
    %c1_19 = arith.constant 1 : index
    %c0_20 = arith.constant 0 : index
    %c0_21 = arith.constant 0 : index
    %33 = vector.load %arg2[%c1_19, %c0_20, %c0_21] : memref<4x16x16xf32, #tpu.memory_space<vmem>>, vector<1x16x16xf32>
    %34 = vector.shape_cast %33 : vector<1x16x16xf32> to vector<16x16xf32>
    %cst_22 = arith.constant dense<0.000000e+00> : vector<16xf32>
    %35 = vector.multi_reduction <add>, %32, %cst_22 [1] : vector<16x16xf32> to vector<16xf32>
    %36 = vector.shape_cast %35 : vector<16xf32> to vector<16x1xf32>
    %37 = math.rsqrt %36 : vector<16x1xf32>
    %38 = math.absf %37 : vector<16x1xf32>
    %cst_23 = arith.constant 0x7F800000 : f32
    %39 = vector.broadcast %cst_23 : f32 to vector<16x1xf32>
    %40 = arith.cmpf oeq, %38, %39 : vector<16x1xf32>
    %cst_24 = arith.constant 0.000000e+00 : f32
    %41 = vector.broadcast %cst_24 : f32 to vector<16x1xf32>
    %42 = arith.select %40, %41, %37 : vector<16x1xi1>, vector<16x1xf32>
    %cst_25 = arith.constant dense<0.000000e+00> : vector<16xf32>
    %43 = vector.multi_reduction <add>, %34, %cst_25 [0] : vector<16x16xf32> to vector<16xf32>
    %44 = vector.shape_cast %43 : vector<16xf32> to vector<1x16xf32>
    %45 = math.rsqrt %44 : vector<1x16xf32>
    %46 = math.absf %45 : vector<1x16xf32>
    %cst_26 = arith.constant 0x7F800000 : f32
    %47 = vector.broadcast %cst_26 : f32 to vector<1x16xf32>
    %48 = arith.cmpf oeq, %46, %47 : vector<1x16xf32>
    %cst_27 = arith.constant 0.000000e+00 : f32
    %49 = vector.broadcast %cst_27 : f32 to vector<1x16xf32>
    %50 = arith.select %48, %49, %45 : vector<1x16xi1>, vector<1x16xf32>
    %51 = vector.broadcast %42 : vector<16x1xf32> to vector<16x16xf32>
    %52 = arith.mulf %51, %34 : vector<16x16xf32>
    %53 = vector.broadcast %50 : vector<1x16xf32> to vector<16x16xf32>
    %54 = arith.mulf %52, %53 : vector<16x16xf32>
    %c1_28 = arith.constant 1 : index
    %c0_29 = arith.constant 0 : index
    %c0_30 = arith.constant 0 : index
    %55 = vector.load %arg4[%c1_28, %c0_29, %c0_30] : memref<4x16x16xf32, #tpu.memory_space<vmem>>, vector<1x16x16xf32>
    %56 = vector.shape_cast %55 : vector<1x16x16xf32> to vector<16x16xf32>
    %57 = vector.shape_cast %54 : vector<16x16xf32> to vector<1x16x16xf32>
    tpu.vector_store %arg4[%c1_28, %c0_29, %c0_30], %57 {strides = array<i32>} : memref<4x16x16xf32, #tpu.memory_space<vmem>>, vector<1x16x16xf32>,
    %cst_31 = arith.constant dense<0.000000e+00> : vector<16x32xf32>
    %58 = tpu.matmul %54, %0, %cst_31 {dimension_numbers = #tpu.dot_dimension_numbers<[1], [0], [0], [1], [0, 0, 1, 1], [], []>} : vector<16x16xf32>, vector<16x32xf32>, vector<16x32xf32> -> vector<16x32xf32>
    %cst_32 = arith.constant 0.000000e+00 : f32
    %59 = vector.broadcast %cst_32 : f32 to vector<16x32xf32>
    %60 = arith.maximumf %58, %59 : vector<16x32xf32>
    %c2 = arith.constant 2 : index
    %c0_33 = arith.constant 0 : index
    %c0_34 = arith.constant 0 : index
    %61 = vector.load %arg1[%c2, %c0_33, %c0_34] : memref<4x16x16xf32, #tpu.memory_space<vmem>>, vector<1x16x16xf32>
    %62 = vector.shape_cast %61 : vector<1x16x16xf32> to vector<16x16xf32>
    %c2_35 = arith.constant 2 : index
    %c0_36 = arith.constant 0 : index
    %c0_37 = arith.constant 0 : index
    %63 = vector.load %arg2[%c2_35, %c0_36, %c0_37] : memref<4x16x16xf32, #tpu.memory_space<vmem>>, vector<1x16x16xf32>
    %64 = vector.shape_cast %63 : vector<1x16x16xf32> to vector<16x16xf32>
    %cst_38 = arith.constant dense<0.000000e+00> : vector<16xf32>
    %65 = vector.multi_reduction <add>, %62, %cst_38 [1] : vector<16x16xf32> to vector<16xf32>
    %66 = vector.shape_cast %65 : vector<16xf32> to vector<16x1xf32>
    %67 = math.rsqrt %66 : vector<16x1xf32>
    %68 = math.absf %67 : vector<16x1xf32>
    %cst_39 = arith.constant 0x7F800000 : f32
    %69 = vector.broadcast %cst_39 : f32 to vector<16x1xf32>
    %70 = arith.cmpf oeq, %68, %69 : vector<16x1xf32>
    %cst_40 = arith.constant 0.000000e+00 : f32
    %71 = vector.broadcast %cst_40 : f32 to vector<16x1xf32>
    %72 = arith.select %70, %71, %67 : vector<16x1xi1>, vector<16x1xf32>
    %cst_41 = arith.constant dense<0.000000e+00> : vector<16xf32>
    %73 = vector.multi_reduction <add>, %64, %cst_41 [0] : vector<16x16xf32> to vector<16xf32>
    %74 = vector.shape_cast %73 : vector<16xf32> to vector<1x16xf32>
    %75 = math.rsqrt %74 : vector<1x16xf32>
    %76 = math.absf %75 : vector<1x16xf32>
    %cst_42 = arith.constant 0x7F800000 : f32
    %77 = vector.broadcast %cst_42 : f32 to vector<1x16xf32>
    %78 = arith.cmpf oeq, %76, %77 : vector<1x16xf32>
    %cst_43 = arith.constant 0.000000e+00 : f32
    %79 = vector.broadcast %cst_43 : f32 to vector<1x16xf32>
    %80 = arith.select %78, %79, %75 : vector<1x16xi1>, vector<1x16xf32>
    %81 = vector.broadcast %72 : vector<16x1xf32> to vector<16x16xf32>
    %82 = arith.mulf %81, %64 : vector<16x16xf32>
    %83 = vector.broadcast %80 : vector<1x16xf32> to vector<16x16xf32>
    %84 = arith.mulf %82, %83 : vector<16x16xf32>
    %c2_44 = arith.constant 2 : index
    %c0_45 = arith.constant 0 : index
    %c0_46 = arith.constant 0 : index
    %85 = vector.load %arg4[%c2_44, %c0_45, %c0_46] : memref<4x16x16xf32, #tpu.memory_space<vmem>>, vector<1x16x16xf32>
    %86 = vector.shape_cast %85 : vector<1x16x16xf32> to vector<16x16xf32>
    %87 = vector.shape_cast %84 : vector<16x16xf32> to vector<1x16x16xf32>
    tpu.vector_store %arg4[%c2_44, %c0_45, %c0_46], %87 {strides = array<i32>} : memref<4x16x16xf32, #tpu.memory_space<vmem>>, vector<1x16x16xf32>,
    %cst_47 = arith.constant dense<0.000000e+00> : vector<16x32xf32>
    %88 = tpu.matmul %84, %0, %cst_47 {dimension_numbers = #tpu.dot_dimension_numbers<[1], [0], [0], [1], [0, 0, 1, 1], [], []>} : vector<16x16xf32>, vector<16x32xf32>, vector<16x32xf32> -> vector<16x32xf32>
    %cst_48 = arith.constant 0.000000e+00 : f32
    %89 = vector.broadcast %cst_48 : f32 to vector<16x32xf32>
    %90 = arith.maximumf %88, %89 : vector<16x32xf32>
    %c3 = arith.constant 3 : index
    %c0_49 = arith.constant 0 : index
    %c0_50 = arith.constant 0 : index
    %91 = vector.load %arg1[%c3, %c0_49, %c0_50] : memref<4x16x16xf32, #tpu.memory_space<vmem>>, vector<1x16x16xf32>
    %92 = vector.shape_cast %91 : vector<1x16x16xf32> to vector<16x16xf32>
    %c3_51 = arith.constant 3 : index
    %c0_52 = arith.constant 0 : index
    %c0_53 = arith.constant 0 : index
    %93 = vector.load %arg2[%c3_51, %c0_52, %c0_53] : memref<4x16x16xf32, #tpu.memory_space<vmem>>, vector<1x16x16xf32>
    %94 = vector.shape_cast %93 : vector<1x16x16xf32> to vector<16x16xf32>
    %cst_54 = arith.constant dense<0.000000e+00> : vector<16xf32>
    %95 = vector.multi_reduction <add>, %92, %cst_54 [1] : vector<16x16xf32> to vector<16xf32>
    %96 = vector.shape_cast %95 : vector<16xf32> to vector<16x1xf32>
    %97 = math.rsqrt %96 : vector<16x1xf32>
    %98 = math.absf %97 : vector<16x1xf32>
    %cst_55 = arith.constant 0x7F800000 : f32
    %99 = vector.broadcast %cst_55 : f32 to vector<16x1xf32>
    %100 = arith.cmpf oeq, %98, %99 : vector<16x1xf32>
    %cst_56 = arith.constant 0.000000e+00 : f32
    %101 = vector.broadcast %cst_56 : f32 to vector<16x1xf32>
    %102 = arith.select %100, %101, %97 : vector<16x1xi1>, vector<16x1xf32>
    %cst_57 = arith.constant dense<0.000000e+00> : vector<16xf32>
    %103 = vector.multi_reduction <add>, %94, %cst_57 [0] : vector<16x16xf32> to vector<16xf32>
    %104 = vector.shape_cast %103 : vector<16xf32> to vector<1x16xf32>
    %105 = math.rsqrt %104 : vector<1x16xf32>
    %106 = math.absf %105 : vector<1x16xf32>
    %cst_58 = arith.constant 0x7F800000 : f32
    %107 = vector.broadcast %cst_58 : f32 to vector<1x16xf32>
    %108 = arith.cmpf oeq, %106, %107 : vector<1x16xf32>
    %cst_59 = arith.constant 0.000000e+00 : f32
    %109 = vector.broadcast %cst_59 : f32 to vector<1x16xf32>
    %110 = arith.select %108, %109, %105 : vector<1x16xi1>, vector<1x16xf32>
    %111 = vector.broadcast %102 : vector<16x1xf32> to vector<16x16xf32>
    %112 = arith.mulf %111, %94 : vector<16x16xf32>
    %113 = vector.broadcast %110 : vector<1x16xf32> to vector<16x16xf32>
    %114 = arith.mulf %112, %113 : vector<16x16xf32>
    %c3_60 = arith.constant 3 : index
    %c0_61 = arith.constant 0 : index
    %c0_62 = arith.constant 0 : index
    %115 = vector.load %arg4[%c3_60, %c0_61, %c0_62] : memref<4x16x16xf32, #tpu.memory_space<vmem>>, vector<1x16x16xf32>
    %116 = vector.shape_cast %115 : vector<1x16x16xf32> to vector<16x16xf32>
    %117 = vector.shape_cast %114 : vector<16x16xf32> to vector<1x16x16xf32>
    tpu.vector_store %arg4[%c3_60, %c0_61, %c0_62], %117 {strides = array<i32>} : memref<4x16x16xf32, #tpu.memory_space<vmem>>, vector<1x16x16xf32>,
    %cst_63 = arith.constant dense<0.000000e+00> : vector<16x32xf32>
    %118 = tpu.matmul %114, %0, %cst_63 {dimension_numbers = #tpu.dot_dimension_numbers<[1], [0], [0], [1], [0, 0, 1, 1], [], []>} : vector<16x16xf32>, vector<16x32xf32>, vector<16x32xf32> -> vector<16x32xf32>
    %cst_64 = arith.constant 0.000000e+00 : f32
    %119 = vector.broadcast %cst_64 : f32 to vector<16x32xf32>
    %120 = arith.maximumf %118, %119 : vector<16x32xf32>
    %121 = tpu.concatenate %30, %60, %90, %120 in 1 : vector<16x32xf32>, vector<16x32xf32>, vector<16x32xf32>, vector<16x32xf32> -> vector<16x128xf32>
    %c0_65 = arith.constant 0 : index
    %c0_66 = arith.constant 0 : index
    %c0_67 = arith.constant 0 : index
    %122 = vector.load %arg5[%c0_65, %c0_66, %c0_67] : memref<1x16x128xf32, #tpu.memory_space<vmem>>, vector<1x16x128xf32>
    %123 = vector.shape_cast %122 : vector<1x16x128xf32> to vector<16x128xf32>
    %124 = vector.shape_cast %121 : vector<16x128xf32> to vector<1x16x128xf32>
    tpu.vector_store %arg5[%c0_65, %c0_66, %c0_67], %124 {strides = array<i32>} : memref<1x16x128xf32, #tpu.memory_space<vmem>>, vector<1x16x128xf32>,
    return
  }
  func.func @transform_0(%arg0: i32) -> (i32, i32, i32) {
    %c0_i32 = arith.constant 0 : i32
    %c0_i32_0 = arith.constant 0 : i32
    %c0_i32_1 = arith.constant 0 : i32
    return %arg0, %c0_i32, %c0_i32_0 : i32, i32, i32
  }
  func.func @transform_1(%arg0: i32) -> (i32, i32, i32) {
    %c0_i32 = arith.constant 0 : i32
    %c0_i32_0 = arith.constant 0 : i32
    %c0_i32_1 = arith.constant 0 : i32
    return %arg0, %c0_i32, %c0_i32_0 : i32, i32, i32
  }
  func.func @transform_2(%arg0: i32) -> (i32, i32) {
    %c0_i32 = arith.constant 0 : i32
    %c0_i32_0 = arith.constant 0 : i32
    %c0_i32_1 = arith.constant 0 : i32
    return %c0_i32, %c0_i32_0 : i32, i32
  }
  func.func @transform_3(%arg0: i32) -> (i32, i32, i32) {
    %c0_i32 = arith.constant 0 : i32
    %c0_i32_0 = arith.constant 0 : i32
    %c0_i32_1 = arith.constant 0 : i32
    return %arg0, %c0_i32, %c0_i32_0 : i32, i32, i32
  }
  func.func @transform_4(%arg0: i32) -> (i32, i32, i32) {
    %c0_i32 = arith.constant 0 : i32
    %c0_i32_0 = arith.constant 0 : i32
    %c0_i32_1 = arith.constant 0 : i32
    return %arg0, %c0_i32, %c0_i32_0 : i32, i32, i32
  }
}

module attributes {stable_mosaic.version = 11 : i64} {
  func.func @gsr_decoder_kernel(%arg0: i32, %arg1: memref<32x16xf32, #tpu.memory_space<vmem>>, %arg2: memref<4x16x16xf32, #tpu.memory_space<vmem>>, %arg3: memref<1x16x128xf32, #tpu.memory_space<vmem>>, %arg4: memref<32x16xf32, #tpu.memory_space<vmem>>, %arg5: memref<16x32xf32, #tpu.memory_space<vmem>>, %arg6: memref<1x32x128xf32, #tpu.memory_space<vmem>>) attributes {dimension_semantics = [#tpu.dimension_semantics<parallel>], iteration_bounds = array<i64: 2>, scalar_prefetch = 0 : i64, scratch_operands = 0 : i64, tpu.core_type = #tpu.core_type<tc>, window_params = [{pipeline_mode = #tpu.pipeline_mode<synchronous>, transform_indices = @transform_0, window_bounds = array<i64: 32, 16>}, {transform_indices = @transform_1, window_bounds = array<i64: 4, 16, 16>}, {transform_indices = @transform_2, window_bounds = array<i64: 1, 16, 128>}, {pipeline_mode = #tpu.pipeline_mode<synchronous>, transform_indices = @transform_3, window_bounds = array<i64: 32, 16>}, {pipeline_mode = #tpu.pipeline_mode<synchronous>, transform_indices = @transform_4, window_bounds = array<i64: 16, 32>}, {transform_indices = @transform_5, window_bounds = array<i64: 1, 32, 128>}]} {
    %c0 = arith.constant 0 : index
    %c0_0 = arith.constant 0 : index
    %0 = vector.load %arg1[%c0, %c0_0] : memref<32x16xf32, #tpu.memory_space<vmem>>, vector<32x16xf32>
    %c0_1 = arith.constant 0 : index
    %c0_2 = arith.constant 0 : index
    %1 = vector.load %arg4[%c0_1, %c0_2] : memref<32x16xf32, #tpu.memory_space<vmem>>, vector<32x16xf32>
    %c0_3 = arith.constant 0 : index
    %c0_4 = arith.constant 0 : index
    %2 = vector.load %arg5[%c0_3, %c0_4] : memref<16x32xf32, #tpu.memory_space<vmem>>, vector<16x32xf32>
    %c0_5 = arith.constant 0 : index
    %c0_6 = arith.constant 0 : index
    %c0_7 = arith.constant 0 : index
    %3 = vector.load %arg3[%c0_5, %c0_6, %c0_7] : memref<1x16x128xf32, #tpu.memory_space<vmem>>, vector<1x16x128xf32>
    %4 = vector.shape_cast %3 : vector<1x16x128xf32> to vector<16x128xf32>
    %5 = tpu.iota {dimensions = array<i32: 0>} : vector<32x32xi32>
    %6 = tpu.iota {dimensions = array<i32: 1>} : vector<32x32xi32>
    %7 = arith.cmpi eq, %5, %6 : vector<32x32xi32>
    %8 = vector.extract_strided_slice %4 {offsets = [0, 0], sizes = [16, 32], strides = [1, 1]} : vector<16x128xf32> to vector<16x32xf32>
    %c0_8 = arith.constant 0 : index
    %c0_9 = arith.constant 0 : index
    %c0_10 = arith.constant 0 : index
    %9 = vector.load %arg2[%c0_8, %c0_9, %c0_10] : memref<4x16x16xf32, #tpu.memory_space<vmem>>, vector<1x16x16xf32>
    %10 = vector.shape_cast %9 : vector<1x16x16xf32> to vector<16x16xf32>
    %cst = arith.constant dense<0.000000e+00> : vector<32x16xf32>
    %11 = tpu.matmul %0, %10, %cst {dimension_numbers = #tpu.dot_dimension_numbers<[1], [0], [0], [1], [0, 0, 1, 1], [], []>} : vector<32x16xf32>, vector<16x16xf32>, vector<32x16xf32> -> vector<32x16xf32>
    %cst_11 = arith.constant dense<0.000000e+00> : vector<32x32xf32>
    %12 = tpu.matmul %11, %8, %cst_11 {dimension_numbers = #tpu.dot_dimension_numbers<[1], [0], [0], [1], [0, 0, 1, 1], [], []>} : vector<32x16xf32>, vector<16x32xf32>, vector<32x32xf32> -> vector<32x32xf32>
    %13 = math.absf %12 : vector<32x32xf32>
    %cst_12 = arith.constant 1.000000e+00 : f32
    %14 = vector.broadcast %cst_12 : f32 to vector<32x32xf32>
    %15 = arith.select %7, %14, %13 : vector<32x32xi1>, vector<32x32xf32>
    %cst_13 = arith.constant dense<0.000000e+00> : vector<32x32xf32>
    %16 = tpu.matmul %15, %15, %cst_13 {dimension_numbers = #tpu.dot_dimension_numbers<[1], [1], [0], [0], [0, 0, 1, 0], [], []>} : vector<32x32xf32>, vector<32x32xf32>, vector<32x32xf32> -> vector<32x32xf32>
    %cst_14 = arith.constant 1.000000e+00 : f32
    %17 = vector.broadcast %cst_14 : f32 to vector<32x32xf32>
    %18 = arith.select %7, %17, %16 : vector<32x32xi1>, vector<32x32xf32>
    %19 = math.absf %18 : vector<32x32xf32>
    %cst_15 = arith.constant dense<0.000000e+00> : vector<32x16xf32>
    %20 = tpu.matmul %19, %1, %cst_15 {dimension_numbers = #tpu.dot_dimension_numbers<[1], [0], [0], [1], [0, 0, 1, 1], [], []>} : vector<32x32xf32>, vector<32x16xf32>, vector<32x16xf32> -> vector<32x16xf32>
    %cst_16 = arith.constant dense<0.000000e+00> : vector<32x16xf32>
    %21 = tpu.matmul %15, %20, %cst_16 {dimension_numbers = #tpu.dot_dimension_numbers<[1], [0], [0], [1], [0, 0, 1, 1], [], []>} : vector<32x32xf32>, vector<32x16xf32>, vector<32x16xf32> -> vector<32x16xf32>
    %cst_17 = arith.constant 0.000000e+00 : f32
    %22 = vector.broadcast %cst_17 : f32 to vector<32x16xf32>
    %23 = arith.maximumf %21, %22 : vector<32x16xf32>
    %cst_18 = arith.constant dense<0.000000e+00> : vector<32x32xf32>
    %24 = tpu.matmul %23, %2, %cst_18 {dimension_numbers = #tpu.dot_dimension_numbers<[1], [0], [0], [1], [0, 0, 1, 1], [], []>} : vector<32x16xf32>, vector<16x32xf32>, vector<32x32xf32> -> vector<32x32xf32>
    %cst_19 = arith.constant dense<0.000000e+00> : vector<32x32xf32>
    %25 = tpu.matmul %15, %24, %cst_19 {dimension_numbers = #tpu.dot_dimension_numbers<[1], [0], [0], [1], [0, 0, 1, 1], [], []>} : vector<32x32xf32>, vector<32x32xf32>, vector<32x32xf32> -> vector<32x32xf32>
    %26 = math.tanh %25 : vector<32x32xf32>
    %27 = tpu.transpose %26, [1, 0] : vector<32x32xf32> -> vector<32x32xf32>
    %28 = arith.addf %26, %27 : vector<32x32xf32>
    %cst_20 = arith.constant 5.000000e-01 : f32
    %29 = vector.broadcast %cst_20 : f32 to vector<32x32xf32>
    %30 = arith.mulf %28, %29 : vector<32x32xf32>
    %cst_21 = arith.constant 0.000000e+00 : f32
    %31 = vector.broadcast %cst_21 : f32 to vector<32x32xf32>
    %32 = arith.select %7, %31, %30 : vector<32x32xi1>, vector<32x32xf32>
    %33 = vector.extract_strided_slice %4 {offsets = [0, 32], sizes = [16, 32], strides = [1, 1]} : vector<16x128xf32> to vector<16x32xf32>
    %c1 = arith.constant 1 : index
    %c0_22 = arith.constant 0 : index
    %c0_23 = arith.constant 0 : index
    %34 = vector.load %arg2[%c1, %c0_22, %c0_23] : memref<4x16x16xf32, #tpu.memory_space<vmem>>, vector<1x16x16xf32>
    %35 = vector.shape_cast %34 : vector<1x16x16xf32> to vector<16x16xf32>
    %cst_24 = arith.constant dense<0.000000e+00> : vector<32x16xf32>
    %36 = tpu.matmul %0, %35, %cst_24 {dimension_numbers = #tpu.dot_dimension_numbers<[1], [0], [0], [1], [0, 0, 1, 1], [], []>} : vector<32x16xf32>, vector<16x16xf32>, vector<32x16xf32> -> vector<32x16xf32>
    %cst_25 = arith.constant dense<0.000000e+00> : vector<32x32xf32>
    %37 = tpu.matmul %36, %33, %cst_25 {dimension_numbers = #tpu.dot_dimension_numbers<[1], [0], [0], [1], [0, 0, 1, 1], [], []>} : vector<32x16xf32>, vector<16x32xf32>, vector<32x32xf32> -> vector<32x32xf32>
    %38 = math.absf %37 : vector<32x32xf32>
    %cst_26 = arith.constant 1.000000e+00 : f32
    %39 = vector.broadcast %cst_26 : f32 to vector<32x32xf32>
    %40 = arith.select %7, %39, %38 : vector<32x32xi1>, vector<32x32xf32>
    %cst_27 = arith.constant dense<0.000000e+00> : vector<32x32xf32>
    %41 = tpu.matmul %40, %40, %cst_27 {dimension_numbers = #tpu.dot_dimension_numbers<[1], [1], [0], [0], [0, 0, 1, 0], [], []>} : vector<32x32xf32>, vector<32x32xf32>, vector<32x32xf32> -> vector<32x32xf32>
    %cst_28 = arith.constant 1.000000e+00 : f32
    %42 = vector.broadcast %cst_28 : f32 to vector<32x32xf32>
    %43 = arith.select %7, %42, %41 : vector<32x32xi1>, vector<32x32xf32>
    %44 = math.absf %43 : vector<32x32xf32>
    %cst_29 = arith.constant dense<0.000000e+00> : vector<32x16xf32>
    %45 = tpu.matmul %44, %1, %cst_29 {dimension_numbers = #tpu.dot_dimension_numbers<[1], [0], [0], [1], [0, 0, 1, 1], [], []>} : vector<32x32xf32>, vector<32x16xf32>, vector<32x16xf32> -> vector<32x16xf32>
    %cst_30 = arith.constant dense<0.000000e+00> : vector<32x16xf32>
    %46 = tpu.matmul %40, %45, %cst_30 {dimension_numbers = #tpu.dot_dimension_numbers<[1], [0], [0], [1], [0, 0, 1, 1], [], []>} : vector<32x32xf32>, vector<32x16xf32>, vector<32x16xf32> -> vector<32x16xf32>
    %cst_31 = arith.constant 0.000000e+00 : f32
    %47 = vector.broadcast %cst_31 : f32 to vector<32x16xf32>
    %48 = arith.maximumf %46, %47 : vector<32x16xf32>
    %cst_32 = arith.constant dense<0.000000e+00> : vector<32x32xf32>
    %49 = tpu.matmul %48, %2, %cst_32 {dimension_numbers = #tpu.dot_dimension_numbers<[1], [0], [0], [1], [0, 0, 1, 1], [], []>} : vector<32x16xf32>, vector<16x32xf32>, vector<32x32xf32> -> vector<32x32xf32>
    %cst_33 = arith.constant dense<0.000000e+00> : vector<32x32xf32>
    %50 = tpu.matmul %40, %49, %cst_33 {dimension_numbers = #tpu.dot_dimension_numbers<[1], [0], [0], [1], [0, 0, 1, 1], [], []>} : vector<32x32xf32>, vector<32x32xf32>, vector<32x32xf32> -> vector<32x32xf32>
    %51 = math.tanh %50 : vector<32x32xf32>
    %52 = tpu.transpose %51, [1, 0] : vector<32x32xf32> -> vector<32x32xf32>
    %53 = arith.addf %51, %52 : vector<32x32xf32>
    %cst_34 = arith.constant 5.000000e-01 : f32
    %54 = vector.broadcast %cst_34 : f32 to vector<32x32xf32>
    %55 = arith.mulf %53, %54 : vector<32x32xf32>
    %cst_35 = arith.constant 0.000000e+00 : f32
    %56 = vector.broadcast %cst_35 : f32 to vector<32x32xf32>
    %57 = arith.select %7, %56, %55 : vector<32x32xi1>, vector<32x32xf32>
    %58 = vector.extract_strided_slice %4 {offsets = [0, 64], sizes = [16, 32], strides = [1, 1]} : vector<16x128xf32> to vector<16x32xf32>
    %c2 = arith.constant 2 : index
    %c0_36 = arith.constant 0 : index
    %c0_37 = arith.constant 0 : index
    %59 = vector.load %arg2[%c2, %c0_36, %c0_37] : memref<4x16x16xf32, #tpu.memory_space<vmem>>, vector<1x16x16xf32>
    %60 = vector.shape_cast %59 : vector<1x16x16xf32> to vector<16x16xf32>
    %cst_38 = arith.constant dense<0.000000e+00> : vector<32x16xf32>
    %61 = tpu.matmul %0, %60, %cst_38 {dimension_numbers = #tpu.dot_dimension_numbers<[1], [0], [0], [1], [0, 0, 1, 1], [], []>} : vector<32x16xf32>, vector<16x16xf32>, vector<32x16xf32> -> vector<32x16xf32>
    %cst_39 = arith.constant dense<0.000000e+00> : vector<32x32xf32>
    %62 = tpu.matmul %61, %58, %cst_39 {dimension_numbers = #tpu.dot_dimension_numbers<[1], [0], [0], [1], [0, 0, 1, 1], [], []>} : vector<32x16xf32>, vector<16x32xf32>, vector<32x32xf32> -> vector<32x32xf32>
    %63 = math.absf %62 : vector<32x32xf32>
    %cst_40 = arith.constant 1.000000e+00 : f32
    %64 = vector.broadcast %cst_40 : f32 to vector<32x32xf32>
    %65 = arith.select %7, %64, %63 : vector<32x32xi1>, vector<32x32xf32>
    %cst_41 = arith.constant dense<0.000000e+00> : vector<32x32xf32>
    %66 = tpu.matmul %65, %65, %cst_41 {dimension_numbers = #tpu.dot_dimension_numbers<[1], [1], [0], [0], [0, 0, 1, 0], [], []>} : vector<32x32xf32>, vector<32x32xf32>, vector<32x32xf32> -> vector<32x32xf32>
    %cst_42 = arith.constant 1.000000e+00 : f32
    %67 = vector.broadcast %cst_42 : f32 to vector<32x32xf32>
    %68 = arith.select %7, %67, %66 : vector<32x32xi1>, vector<32x32xf32>
    %69 = math.absf %68 : vector<32x32xf32>
    %cst_43 = arith.constant dense<0.000000e+00> : vector<32x16xf32>
    %70 = tpu.matmul %69, %1, %cst_43 {dimension_numbers = #tpu.dot_dimension_numbers<[1], [0], [0], [1], [0, 0, 1, 1], [], []>} : vector<32x32xf32>, vector<32x16xf32>, vector<32x16xf32> -> vector<32x16xf32>
    %cst_44 = arith.constant dense<0.000000e+00> : vector<32x16xf32>
    %71 = tpu.matmul %65, %70, %cst_44 {dimension_numbers = #tpu.dot_dimension_numbers<[1], [0], [0], [1], [0, 0, 1, 1], [], []>} : vector<32x32xf32>, vector<32x16xf32>, vector<32x16xf32> -> vector<32x16xf32>
    %cst_45 = arith.constant 0.000000e+00 : f32
    %72 = vector.broadcast %cst_45 : f32 to vector<32x16xf32>
    %73 = arith.maximumf %71, %72 : vector<32x16xf32>
    %cst_46 = arith.constant dense<0.000000e+00> : vector<32x32xf32>
    %74 = tpu.matmul %73, %2, %cst_46 {dimension_numbers = #tpu.dot_dimension_numbers<[1], [0], [0], [1], [0, 0, 1, 1], [], []>} : vector<32x16xf32>, vector<16x32xf32>, vector<32x32xf32> -> vector<32x32xf32>
    %cst_47 = arith.constant dense<0.000000e+00> : vector<32x32xf32>
    %75 = tpu.matmul %65, %74, %cst_47 {dimension_numbers = #tpu.dot_dimension_numbers<[1], [0], [0], [1], [0, 0, 1, 1], [], []>} : vector<32x32xf32>, vector<32x32xf32>, vector<32x32xf32> -> vector<32x32xf32>
    %76 = math.tanh %75 : vector<32x32xf32>
    %77 = tpu.transpose %76, [1, 0] : vector<32x32xf32> -> vector<32x32xf32>
    %78 = arith.addf %76, %77 : vector<32x32xf32>
    %cst_48 = arith.constant 5.000000e-01 : f32
    %79 = vector.broadcast %cst_48 : f32 to vector<32x32xf32>
    %80 = arith.mulf %78, %79 : vector<32x32xf32>
    %cst_49 = arith.constant 0.000000e+00 : f32
    %81 = vector.broadcast %cst_49 : f32 to vector<32x32xf32>
    %82 = arith.select %7, %81, %80 : vector<32x32xi1>, vector<32x32xf32>
    %83 = vector.extract_strided_slice %4 {offsets = [0, 96], sizes = [16, 32], strides = [1, 1]} : vector<16x128xf32> to vector<16x32xf32>
    %c3 = arith.constant 3 : index
    %c0_50 = arith.constant 0 : index
    %c0_51 = arith.constant 0 : index
    %84 = vector.load %arg2[%c3, %c0_50, %c0_51] : memref<4x16x16xf32, #tpu.memory_space<vmem>>, vector<1x16x16xf32>
    %85 = vector.shape_cast %84 : vector<1x16x16xf32> to vector<16x16xf32>
    %cst_52 = arith.constant dense<0.000000e+00> : vector<32x16xf32>
    %86 = tpu.matmul %0, %85, %cst_52 {dimension_numbers = #tpu.dot_dimension_numbers<[1], [0], [0], [1], [0, 0, 1, 1], [], []>} : vector<32x16xf32>, vector<16x16xf32>, vector<32x16xf32> -> vector<32x16xf32>
    %cst_53 = arith.constant dense<0.000000e+00> : vector<32x32xf32>
    %87 = tpu.matmul %86, %83, %cst_53 {dimension_numbers = #tpu.dot_dimension_numbers<[1], [0], [0], [1], [0, 0, 1, 1], [], []>} : vector<32x16xf32>, vector<16x32xf32>, vector<32x32xf32> -> vector<32x32xf32>
    %88 = math.absf %87 : vector<32x32xf32>
    %cst_54 = arith.constant 1.000000e+00 : f32
    %89 = vector.broadcast %cst_54 : f32 to vector<32x32xf32>
    %90 = arith.select %7, %89, %88 : vector<32x32xi1>, vector<32x32xf32>
    %cst_55 = arith.constant dense<0.000000e+00> : vector<32x32xf32>
    %91 = tpu.matmul %90, %90, %cst_55 {dimension_numbers = #tpu.dot_dimension_numbers<[1], [1], [0], [0], [0, 0, 1, 0], [], []>} : vector<32x32xf32>, vector<32x32xf32>, vector<32x32xf32> -> vector<32x32xf32>
    %cst_56 = arith.constant 1.000000e+00 : f32
    %92 = vector.broadcast %cst_56 : f32 to vector<32x32xf32>
    %93 = arith.select %7, %92, %91 : vector<32x32xi1>, vector<32x32xf32>
    %94 = math.absf %93 : vector<32x32xf32>
    %cst_57 = arith.constant dense<0.000000e+00> : vector<32x16xf32>
    %95 = tpu.matmul %94, %1, %cst_57 {dimension_numbers = #tpu.dot_dimension_numbers<[1], [0], [0], [1], [0, 0, 1, 1], [], []>} : vector<32x32xf32>, vector<32x16xf32>, vector<32x16xf32> -> vector<32x16xf32>
    %cst_58 = arith.constant dense<0.000000e+00> : vector<32x16xf32>
    %96 = tpu.matmul %90, %95, %cst_58 {dimension_numbers = #tpu.dot_dimension_numbers<[1], [0], [0], [1], [0, 0, 1, 1], [], []>} : vector<32x32xf32>, vector<32x16xf32>, vector<32x16xf32> -> vector<32x16xf32>
    %cst_59 = arith.constant 0.000000e+00 : f32
    %97 = vector.broadcast %cst_59 : f32 to vector<32x16xf32>
    %98 = arith.maximumf %96, %97 : vector<32x16xf32>
    %cst_60 = arith.constant dense<0.000000e+00> : vector<32x32xf32>
    %99 = tpu.matmul %98, %2, %cst_60 {dimension_numbers = #tpu.dot_dimension_numbers<[1], [0], [0], [1], [0, 0, 1, 1], [], []>} : vector<32x16xf32>, vector<16x32xf32>, vector<32x32xf32> -> vector<32x32xf32>
    %cst_61 = arith.constant dense<0.000000e+00> : vector<32x32xf32>
    %100 = tpu.matmul %90, %99, %cst_61 {dimension_numbers = #tpu.dot_dimension_numbers<[1], [0], [0], [1], [0, 0, 1, 1], [], []>} : vector<32x32xf32>, vector<32x32xf32>, vector<32x32xf32> -> vector<32x32xf32>
    %101 = math.tanh %100 : vector<32x32xf32>
    %102 = tpu.transpose %101, [1, 0] : vector<32x32xf32> -> vector<32x32xf32>
    %103 = arith.addf %101, %102 : vector<32x32xf32>
    %cst_62 = arith.constant 5.000000e-01 : f32
    %104 = vector.broadcast %cst_62 : f32 to vector<32x32xf32>
    %105 = arith.mulf %103, %104 : vector<32x32xf32>
    %cst_63 = arith.constant 0.000000e+00 : f32
    %106 = vector.broadcast %cst_63 : f32 to vector<32x32xf32>
    %107 = arith.select %7, %106, %105 : vector<32x32xi1>, vector<32x32xf32>
    %108 = tpu.concatenate %32, %57, %82, %107 in 1 : vector<32x32xf32>, vector<32x32xf32>, vector<32x32xf32>, vector<32x32xf32> -> vector<32x128xf32>
    %c0_64 = arith.constant 0 : index
    %c0_65 = arith.constant 0 : index
    %c0_66 = arith.constant 0 : index
    %109 = vector.load %arg6[%c0_64, %c0_65, %c0_66] : memref<1x32x128xf32, #tpu.memory_space<vmem>>, vector<1x32x128xf32>
    %110 = vector.shape_cast %109 : vector<1x32x128xf32> to vector<32x128xf32>
    %111 = vector.shape_cast %108 : vector<32x128xf32> to vector<1x32x128xf32>
    tpu.vector_store %arg6[%c0_64, %c0_65, %c0_66], %111 {strides = array<i32>} : memref<1x32x128xf32, #tpu.memory_space<vmem>>, vector<1x32x128xf32>,
    return
  }
  func.func @transform_0(%arg0: i32) -> (i32, i32) {
    %c0_i32 = arith.constant 0 : i32
    %c0_i32_0 = arith.constant 0 : i32
    %c0_i32_1 = arith.constant 0 : i32
    return %c0_i32, %c0_i32_0 : i32, i32
  }
  func.func @transform_1(%arg0: i32) -> (i32, i32, i32) {
    %c0_i32 = arith.constant 0 : i32
    %c0_i32_0 = arith.constant 0 : i32
    %c0_i32_1 = arith.constant 0 : i32
    return %arg0, %c0_i32, %c0_i32_0 : i32, i32, i32
  }
  func.func @transform_2(%arg0: i32) -> (i32, i32, i32) {
    %c0_i32 = arith.constant 0 : i32
    %c0_i32_0 = arith.constant 0 : i32
    %c0_i32_1 = arith.constant 0 : i32
    return %arg0, %c0_i32, %c0_i32_0 : i32, i32, i32
  }
  func.func @transform_3(%arg0: i32) -> (i32, i32) {
    %c0_i32 = arith.constant 0 : i32
    %c0_i32_0 = arith.constant 0 : i32
    %c0_i32_1 = arith.constant 0 : i32
    return %c0_i32, %c0_i32_0 : i32, i32
  }
  func.func @transform_4(%arg0: i32) -> (i32, i32) {
    %c0_i32 = arith.constant 0 : i32
    %c0_i32_0 = arith.constant 0 : i32
    %c0_i32_1 = arith.constant 0 : i32
    return %c0_i32, %c0_i32_0 : i32, i32
  }
  func.func @transform_5(%arg0: i32) -> (i32, i32, i32) {
    %c0_i32 = arith.constant 0 : i32
    %c0_i32_0 = arith.constant 0 : i32
    %c0_i32_1 = arith.constant 0 : i32
    return %arg0, %c0_i32, %c0_i32_0 : i32, i32, i32
  }
}

</mosaic_0001>

<bundles_post_ra>
// kernel: custom-call.2
= control target key start
LH: loop header
LB: loop body
LE: loop exit
PB: predicated region body
PF: predicated region fallthrough
CT: control target
= control target key end

     0   :  { %s1712_s30 = smov 0   ;;  %s1714_s10 = smov 0   ;;  %s2042_s0 = inlined_call_operand.vmem [shape: f32[8,8,8], index: 0, kind: input, shape index: {}]   ;;  %s2043_s1 = inlined_call_operand.vmem [shape: f32[8,8,8], index: 1, kind: input, shape index: {}]   ;;  %s2044_s2 = inlined_call_operand.vmem [shape: f32[8,8,8], index: 2, kind: input, shape index: {}]   ;;  %s2045_s3 = inlined_call_operand.vmem [shape: f32[8,8,8], index: 3, kind: input, shape index: {}]   ;;  %s2046_s4 = inlined_call_operand.vmem [shape: f32[8,8], index: 4, kind: output, shape index: {0}]   ;;  %s2047_s5 = inlined_call_operand.vmem [shape: f32[8,8], index: 5, kind: output, shape index: {1}]   ;;  %s2048_s6 = inlined_call_operand.vmem [shape: f32[8,8,8], index: 6, kind: output, shape index: {2}]   ;;  %s2049_s7 = inlined_call_operand.vmem [shape: f32[8,8,8], index: 7, kind: output, shape index: {3}]   ;;  %s2050_s8 = inlined_call_operand.vmem [shape: f32[8,8,8], index: 8, kind: output, shape index: {4}]   ;;  %s2051_s9 = inlined_call_operand.vmem [shape: f32[8,8,8], index: 9, kind: output, shape index: {5}]  }
   0x1   :  { %s1716_s11 = smov 0  }
   0x2 LB: > { %s1728_s12 = sadd.s32 4294967295, %s1649_s11   ;;  %s1731_s13 = sadd.s32 1, %s1649_s11   ;;  %s1649_s11 = sphi %s1716_s11, %s2058_s11   ;;  %s1645_s10 = sphi %s1714_s10, %s2057_s10   ;;  %s1641_s30 = sphi %s1712_s30, %s2056_s30  }
   0x3   : > { %s20_s14 = sshrl.u32 %s1649_s11, 3  ;;  %s21_s15 = sshrl.u32 %s1731_s13, 3 }
   0x4   : > { %s22_s16 = ssub.s32 %s20_s14, %s21_s15  ;;  %s25_s17 = sadd.s32 1, %s1645_s10 }
   0x5   : > { %p23_p0 = scmp.eq.s32.totalorder %s22_s16, 0  ;;  %p35_p1 = scmp.ne.s32.totalorder %s1645_s10, %s1641_s30 }
   0x6   : > { %p36_p2 = scmp.eq.s32.totalorder %s1728_s12, 7  ;;  %p1510_p4 = scmp.ge.s32.totalorder %s1649_s11, 8 }
   0x7   : > { %s1740_s18 = scalar_select %p23_p0, %s1645_s10, %s25_s17  }
   0x8   : > { %p1742_p3 = por %p36_p2, %p35_p1  ;;  %86 = sbr.rel (%p1510_p4) target bundleno = 18 (0x12), region = 16 }
   0x9   : > { %2052 = sst [smem:[#allocation23_spill]] %s1740_s18  ;;  %s88_s20 = sand.u32 (!%p1510_p4), 1, %s1649_s11  }
   0xa   : > { %s1512_s21 = sshll.u32 (!%p1510_p4), %s1649_s11, 3  ;;  %s1511_s22 = sshll.u32 (!%p1510_p4), %s88_s20, 3 }
   0xb   : > { %s92_s25 = scalar_lea.vmem (!%p1510_p4), %s2042_s0, %s1512_s21  ;;  %s90_s26 = scalar_lea.vmem (!%p1510_p4), [#allocation0], %s1511_s22 }
   0xc   : > { %s131_s29 = scalar_lea.vmem (!%p1510_p4), %s2043_s1, %s1512_s21  ;;  %s170_s16 = scalar_lea.vmem (!%p1510_p4), %s2044_s2, %s1512_s21 }
   0xd   : > { %v121_v0 = vld [vmem:[%s92_s25] sm:$0xff]  ;;  %s129_s17 = scalar_lea.vmem [#allocation1], %s1511_s22  ;;  %s209_s23 = scalar_lea.vmem %s2045_s3, %s1512_s21 }
   0xe   : > { %122 = vst [vmem:[%s90_s26] sm:$0xff] %v121_v0  ;;  %v160_v1 = vld [vmem:[%s131_s29] sm:$0xff]  ;;  %s168_s24 = scalar_lea.vmem [#allocation2], %s1511_s22  ;;  %s207_s25 = scalar_lea.vmem [#allocation3], %s1511_s22 }
   0xf   : > { %161 = vst [vmem:[%s129_s17] sm:$0xff] %v160_v1  ;;  %v199_v2 = vld [vmem:[%s170_s16] sm:$0xff] }
  0x10   : > { %200 = vst [vmem:[%s168_s24] sm:$0xff] %v199_v2  ;;  %v238_v3 = vld [vmem:[%s209_s23] sm:$0xff] }
  0x11   : > { %239 = vst [vmem:[%s207_s25] sm:$0xff] %v238_v3 }
  0x12 PF: > { %p1519_p5 = scmp.ge.s32.totalorder %s1649_s11, 1  ;;  %p244_p6 = scmp.lt.s32.totalorder %s1649_s11, 9 }
  0x14   : > { %p245_p7 = pnand %p1519_p5, %p244_p6 }
  0x16   : > { %248 = sbr.rel (%p245_p7) target bundleno = 938 (0x3aa), region = 156 }
  0x1b   : > { %s251_s26 = sand.u32 1, %s1728_s12   ;;  %s285_s27 = sand.u32 1, %s1641_s30   ;;  %v329_v4 = vlaneseq  ;;  %v1659_v9 = vmov 0.0  }
  0x1c   : > { %s1765_s28 = sshll.u32 %s251_s26, 3  ;;  %s1767_s18 = sshll.u32 %s285_s27, 3 }
  0x1d   : > { %v1769_v5 = vand.u32 127, %v329_v4  ;;  %v1771_v6 = vshrl.u32 %v329_v4, 7  ;;  %s253_s11 = scalar_lea.vmem [#allocation0], %s1765_s28  ;;  %s257_s21 = scalar_lea.vmem [#allocation1], %s1765_s28 }
  0x1e   : > { %v313_v7 = vld [vmem:[%s253_s11] sm:$0xff]  ;;  %v316_v8 = vld [vmem:[%s257_s21] sm:$0xff]  ;;  %s1776_s30 = scalar_lea.vmem [#allocation6], %s1765_s28  ;;  %s312_s22 = smov [#allocation10] }
  0x1f   : > { %324 = vst [vmem:[%s1776_s30] sm:$0xff] %v1659_v9  ;;  %s315_s29 = smov [#allocation11]  ;;  %s261_s14 = scalar_lea.vmem [#allocation2], %s1765_s28  ;;  %v331_v5 = vmov %v1769_v5  ;;  %v334_v6 = vmov %v1771_v6  ;;  %vm1399_vm2 = vcmp.lt.s32.totalorder %v1769_v5, 8 }
  0x20   : > { %v319_v10 = vld [vmem:[%s261_s14] sm:$0xff]  ;;  %s1781_s15 = scalar_lea.vmem [#allocation7], %s1765_s28  ;;  %314 = vst [vmem:[%s312_s22] sm:$0xff] %v313_v7  ;;  %s318_s16 = smov [#allocation12]  ;;  %vm338_vm0 = vcmp.eq.s32.totalorder %v334_v6, %v331_v5  ;;  %v344_v5 = vmov %v1769_v5  ;;  %v347_v6 = vmov %v1771_v6 }
  0x21   : > { %325 = vst [vmem:[%s1781_s15] sm:$0xff] %v1659_v9  ;;  %s321_s17 = smov [#allocation13]  ;;  %s265_s20 = scalar_lea.vmem [#allocation3], %s1765_s28  ;;  %vm351_vm1 = vcmp.eq.s32.totalorder %v347_v6, %v344_v5  ;;  %v1391_v5 = vmov %v1769_v5  ;;  %v1394_v6 = vmov %v1771_v6 }
  0x22   : > { %v322_v11 = vld [vmem:[%s265_s20] sm:$0xff]  ;;  %317 = vst [vmem:[%s315_s29] sm:$0xff] %v316_v8  ;;  %s328_s30 = smov %s1776_s30  ;;  %s1789_s23 = scalar_lea.vmem [#allocation8], %s1765_s28  ;;  %v1408_v5 = vmov %v1769_v5  ;;  %v1411_v6 = vmov %v1771_v6  ;;  %vm1404_vm3 = vcmp.eq.s32.totalorder %v1394_v6, %v1391_v5 }
  0x23   : > { %320 = vst [vmem:[%s318_s16] sm:$0xff] %v319_v10  ;;  %s1793_s24 = scalar_lea.vmem [#allocation9], %s1765_s28  ;;  %s287_s25 = scalar_lea.vmem [#allocation4], %s1767_s18  ;;  %v1425_v5 = vmov %v1769_v5  ;;  %v1428_v6 = vmov %v1771_v6 }
  0x24   : > { %323 = vst [vmem:[%s321_s17] sm:$0xff] %v322_v11  ;;  %s293_s26 = scalar_lea.vmem [#allocation5], %s1767_s18  ;;  %s1395_s27 = smov [#allocation10]  ;;  %v1442_v5 = vmov %v1769_v5  ;;  %v1445_v6 = vmov %v1771_v6 }
  0x25   : > { %326 = vst [vmem:[%s1789_s23] sm:$0xff] %v1659_v9  ;;  %s1412_s28 = smov [#allocation11]  ;;  %s1429_s11 = smov [#allocation12]  ;;  %vm1455_vm4 = vcmp.eq.s32.totalorder %v1445_v6, %v1442_v5 }
  0x26   : > { %327 = vst [vmem:[%s1793_s24] sm:$0xff] %v1659_v9  ;;  %v335_v12 = vld [vmem:[%s328_s30] sm:$0xff]  ;;  %s341_s24 = smov %s1793_s24  ;;  %s1446_s21 = smov [#allocation13] }
  0x27   : > { %v339_v13 = vsel %vm338_vm0, 1.0, %v335_v12  ;;  %v1401_v16 = vld [vmem:[%s1395_s27] sm:$0xff] }
  0x28   : > { %340 = vst [vmem:[%s328_s30] sm:$0xff] %v339_v13  ;;  %v1402_v18 = vsel %vm1399_vm2, %v1401_v16, 0.0 }
  0x29   : > { %v1418_v17 = vld [vmem:[%s1412_s28] sm:$0xff]  ;;  %v1403_v22 = vmul.f32 %v1402_v18, %v1402_v18 }
  0x2a   : > { %v1419_v19 = vsel %vm1399_vm2, %v1418_v17, 0.0  ;;  %v1435_v20 = vld [vmem:[%s1429_s11] sm:$0xff] }
  0x2b   : > { %v1452_v21 = vld [vmem:[%s1446_s21] sm:$0xff]  ;;  %v1420_v23 = vmul.f32 %v1419_v19, %v1419_v19  ;;  %v1436_v24 = vsel %vm1399_vm2, %v1435_v20, 0.0  ;;  %v1405_v29 = vsel %vm1404_vm3, 0.0, %v1403_v22 }
  0x2c   : > { %v1453_v25 = vsel %vm1399_vm2, %v1452_v21, 0.0  ;;  %v1437_v26 = vmul.f32 %v1436_v24, %v1436_v24 }
  0x2d   : > { %v348_v14 = vld [vmem:[%s341_s24] sm:$0xff]  ;;  %v1422_v27 = vadd.f32 %v1420_v23, %v1403_v22  ;;  %v1454_v28 = vmul.f32 %v1453_v25, %v1453_v25  ;;  %v1421_v31 = vadd.f32 %v1420_v23, %v1405_v29 }
  0x2e   : > { %v352_v15 = vsel %vm351_vm1, 1.0, %v348_v14 }
  0x2f   : > { %353 = vst [vmem:[%s341_s24] sm:$0xff] %v352_v15  ;;  %v1439_v30 = vadd.f32 %v1437_v26, %v1422_v27  ;;  %v1438_v33 = vadd.f32 %v1437_v26, %v1421_v31  ;;  %v1456_v34 = vsel %vm1455_vm4, 0.0, %v1454_v28 }
  0x31   : > { %v1458_v32 = vadd.f32 %v1454_v28, %v1439_v30  ;;  %v1457_v35 = vadd.f32 %v1456_v34, %v1438_v33 }
  0x33   : > { %1459 = vadd.xlane.f32.xlu0 %v1458_v32 }
  0x3b   : > { %1467 = vadd.xlane.f32.xlu0 %v1457_v35 }
  0xa6   : > { %v1460_v36 = vpop.xlane.xlu0 %1459 }
  0xa7   : > { %v1461_v37 = vrot.slane %v1460_v36, 4 }
  0xa9   : > { %v1462_v38 = vadd.f32 %v1461_v37, %v1460_v36 }
  0xab   : > { %v1463_v39 = vrot.slane %v1462_v38, 2 }
  0xad   : > { %v1464_v43 = vadd.f32 %v1463_v39, %v1462_v38 }
  0xae   : > { %v1468_v40 = vpop.xlane.xlu0 %1467 }
  0xaf   : > { %v1469_v41 = vrot.slane %v1468_v40, 4  ;;  %v1465_v46 = vrot.slane %v1464_v43, 1 }
  0xb1   : > { %v1470_v42 = vadd.f32 %v1469_v41, %v1468_v40  ;;  %v1466_v49 = vadd.f32 %v1465_v46, %v1464_v43 }
  0xb3   : > { %v1471_v44 = vrot.slane %v1470_v42, 2 }
  0xb5   : > { %v1472_v45 = vadd.f32 %v1471_v44, %v1470_v42 }
  0xb7   : > { %v1473_v47 = vrot.slane %v1472_v45, 1 }
  0xb9   : > { %v1474_v48 = vadd.f32 %v1473_v47, %v1472_v45 }
  0xbb   : > { %1560 = vpush %v1474_v48 }
  0xbc   : > { %1562 = vpush %v1466_v49 }
  0xec   : > { %s1561_s22 = spop %1560 }
  0xed   : > { %s1563_s29 = spop %1562 }
  0xee   : > { %s1477_s14 = smul.f32 1e-10, %s1563_s29 }
  0xf0   : > { %p1478_p8 = scmp.le.f32.partialorder %s1561_s22, %s1477_s14 }
  0xf1   : > { %s1818_s16 = smov (!%p1478_p8), 0  }
  0xf2   : > { %1481 = sbr.rel (%p1478_p8) target bundleno = 900 (0x384), region = 507 }
  0xf7 LB: >> { %s1823_s17 = smov 0   ;;  %s1653_s16 = sphi %s1818_s16, %s2054_s16  }
  0xf8 LB: >>> { %s458_s20 = smov [#allocation10]  ;;  %v462_v5 = vmov %v1769_v5  ;;  %v465_v6 = vmov %v1771_v6  ;;  %s478_s27 = smov [#allocation11]  ;;  %s1657_s17 = sphi %s1823_s17, %s457_s17  }
  0xf9   : >>> { %v482_v5 = vmov %v1769_v5  ;;  %v485_v6 = vmov %v1771_v6  ;;  %v466_v50 = vld [vmem:[%s458_s20] sm:$0xff]  ;;  %vm469_vm5 = vcmp.eq.s32.totalorder %v465_v6, %v462_v5  ;;  %s498_s28 = smov [#allocation13]  ;;  %s459_s11 = smov [#allocation14] }
  0xfa   : >>> { %vm489_vm6 = vcmp.eq.s32.totalorder %v485_v6, %v482_v5  ;;  %v502_v5 = vmov %v1769_v5  ;;  %v505_v6 = vmov %v1771_v6  ;;  %v470_v51 = vsel %vm469_vm5, %v466_v50, 0.0  ;;  %v486_v52 = vld [vmem:[%s478_s27] sm:$0xff]  ;;  %s479_s21 = smov [#allocation15]  ;;  %s499_s22 = smov [#allocation16] }
  0xfb   : >>> { %vm509_vm7 = vcmp.eq.s32.totalorder %v505_v6, %v502_v5  ;;  %v471_v53 = vrot.slane %v470_v51, 4  ;;  %v490_v54 = vsel %vm489_vm6, %v486_v52, 0.0  ;;  %v506_v55 = vld [vmem:[%s498_s28] sm:$0xff]  ;;  %s522_s29 = smov [#allocation15]  ;;  %s520_s14 = smov [#allocation14]  ;;  %v611_v5 = vmov %v1769_v5 }
  0xfc   : >>> { %v491_v56 = vrot.slane %v490_v54, 4  ;;  %v510_v57 = vsel %vm509_vm7, %v506_v55, 0.0  ;;  %s524_s20 = smov [#allocation16]  ;;  %s599_s27 = smov [#allocation17]  ;;  %v614_v6 = vmov %v1771_v6 }
  0xfd   : >>> { %v472_v58 = vadd.f32 %v471_v53, %v470_v51  ;;  %v511_v59 = vrot.slane %v510_v57, 4  ;;  %s601_s28 = smov [#allocation18]  ;;  %s1850_s30 = smov %s1776_s30 }
  0xfe   : >>> { %v492_v60 = vadd.f32 %v491_v56, %v490_v54  ;;  %s1853_s15 = smov %s1781_s15  ;;  %s1858_s23 = smov %s1789_s23 }
  0xff   : >>> { %v473_v61 = vrot.slane %v472_v58, 2  ;;  %v512_v62 = vadd.f32 %v511_v59, %v510_v57  ;;  %s1863_s24 = smov %s1793_s24  ;;  %s457_s17 = sadd.s32 1, %s1657_s17  }
 0x100   : >>> { %v493_v63 = vrot.slane %v492_v60, 2  ;;  %p454_p9 = scmp.ge.s32.totalorder %s457_s17, 15  }
 0x101   : >>> { %v474_v0 = vadd.f32 %v473_v61, %v472_v58  ;;  %v513_v1 = vrot.slane %v512_v62, 2 }
 0x102   : >>> { %v494_v2 = vadd.f32 %v493_v63, %v492_v60 }
 0x103   : >>> { %v475_v3 = vrot.slane %v474_v0, 1  ;;  %v514_v4 = vadd.f32 %v513_v1, %v512_v62 }
 0x104   : >>> { %v495_v7 = vrot.slane %v494_v2, 1 }
 0x105   : >>> { %v476_v8 = vadd.f32 %v475_v3, %v474_v0  ;;  %v515_v9 = vrot.slane %v514_v4, 1 }
 0x106   : >>> { %v496_v10 = vadd.f32 %v495_v7, %v494_v2 }
 0x107   : >>> { %477 = vst [vmem:[%s459_s11] sm:$0x1] %v476_v8  ;;  %v516_v11 = vadd.f32 %v515_v9, %v514_v4  ;;  %s518_s11 = smov [#allocation19] }
 0x108   : >>> { %497 = vst [vmem:[%s479_s21] sm:$0x1] %v496_v10  ;;  %s519_s21 = smov [#allocation20]  ;;  %s603_s11 = smov %s518_s11 }
 0x109   : >>> { %517 = vst [vmem:[%s499_s22] sm:$0x1] %v516_v11  ;;  %s605_s21 = smov %s519_s21  ;;  %s607_s22 = smov [#allocation19] }
 0x10e   : >>> { %v521_v19 = vld [vmem:[%s520_s14] sm:$0xff]  ;;  %s620_s14 = smov [#allocation21] }
 0x10f   : >>> { %v1834_v12 = vld [vmem:[%s522_s29] sm:$0xff]  ;;  %v575_v43 = vand.u32 2147483647, %v521_v19  ;;  %s622_s29 = smov [#allocation20] }
 0x110   : >>> { %v527_v13 = vmul.f32 2.0, %v1834_v12  ;;  %v525_v20 = vld [vmem:[%s524_s20] sm:$0xff]  ;;  %v576_v51 = vand.u32 2147483647, %v1834_v12  ;;  %s635_s20 = smov [#allocation22] }
 0x111   : >>> { %v526_v23 = vsub.f32 %v525_v20, %v521_v19  ;;  %v577_v44 = vand.u32 2147483647, %v525_v20 }
 0x112   : >>> { %1611 = vrcp.f32 %v527_v13  ;;  %v539_v16 = vand.u32 2147483648, %v527_v13  ;;  %vm533_vm8 = vweird.f32 %v527_v13  ;;  %v537_v18 = vand.u32 2147483647, %v527_v13 }
 0x113   : >>> { %v578_v46 = vmin.f32 %v575_v43, %v577_v44 }
 0x114   : >>> { %v540_v22 = vor.u32 1.1754944e-38, %v539_v16  ;;  %vm538_vm11 = vcmp.eq.f32.partialorder %v537_v18, 8.507059e+37 }
 0x115   : >>> { %v579_v52 = vmul.f32 1.1920929e-08, %v578_v46 }
 0x117   : >>> { %vm580_vm4 = vcmp.le.f32.partialorder %v576_v51, %v579_v52 }
 0x118   : >>> { %v1612_v14 = vpop.eup %1611 }
 0x119   : >>> { %v529_v15 = vmul.f32 %v1612_v14, %v527_v13  ;;  %vm534_vm9 = vweird.f32 %v1612_v14 }
 0x11a   : >>> { %vm535_vm10 = vmor %vm533_vm8, %vm534_vm9  ;;  %vm616_vm8 = vcmp.eq.s32.totalorder %v614_v6, %v611_v5  ;;  %v626_v5 = vmov %v1769_v5  ;;  %v629_v6 = vmov %v1771_v6 }
 0x11b   : >>> { %v530_v17 = vsub.f32 1.0, %v529_v15  ;;  %vm631_vm9 = vcmp.eq.s32.totalorder %v629_v6, %v626_v5  ;;  %v697_v5 = vmov %v1769_v5 }
 0x11c   : >>> { %v738_v5 = vmov %v1769_v5 }
 0x11d   : >>> { %v531_v21 = vmul.f32 %v1612_v14, %v530_v17  ;;  %v724_v5 = vmov %v1769_v5 }
 0x11f   : >>> { %v532_v24 = vadd.f32 %v1612_v14, %v531_v21 }
 0x121   : >>> { %v536_v25 = vsel %vm535_vm10, %v1612_v14, %v532_v24  ;;  %v871_v24 = vld [vmem:[%s1858_s23] sm:$0xff]  ;;  %vm821_vm10 = vcmp.eq.s32.totalorder %v1771_v6, 0 }
 0x122   : >>> { %v541_v26 = vsel %vm538_vm11, %v540_v22, %v536_v25  ;;  %vm833_vm11 = vcmp.eq.s32.totalorder %v1771_v6, 7  ;;  %v700_v6 = vmov %v1771_v6 }
 0x123   : >>> { %v542_v27 = vmul.f32 %v541_v26, %v526_v23  ;;  %v741_v6 = vmov %v1771_v6 }
 0x124   : >>> { %v727_v6 = vmov %v1771_v6 }
 0x125   : >>> { %v544_v28 = vmul.f32 %v542_v27, %v542_v27  ;;  %vm543_vm14 = vcmp.ge.f32.partialorder %v542_v27, 0.0 }
 0x127   : >>> { %v545_v29 = vadd.f32 1.0, %v544_v28 }
 0x129   : >>> { %1613 = vrsqrt.f32 %v545_v29  ;;  %vm553_vm12 = vcmp.eq.f32.partialorder %v545_v29, inf  ;;  %v556_v36 = vand.u32 2147483648, %v545_v29  ;;  %vm555_vm13 = vcmp.eq.f32.partialorder %v545_v29, 0.0 }
 0x12f   : >>> { %v1614_v30 = vpop.eup %1613 }
 0x130   : >>> { %v547_v31 = vmul.f32 %v1614_v30, %v545_v29 }
 0x132   : >>> { %v548_v32 = vmul.f32 %v1614_v30, %v547_v31 }
 0x134   : >>> { %v549_v33 = vmul.f32 0.5, %v548_v32 }
 0x136   : >>> { %v550_v34 = vsub.f32 1.5, %v549_v33 }
 0x138   : >>> { %v551_v35 = vmul.f32 %v1614_v30, %v550_v34 }
 0x13a   : >>> { %v552_v37 = vmul.f32 %v551_v35, %v545_v29 }
 0x13c   : >>> { %v554_v38 = vsel %vm553_vm12, %v545_v29, %v552_v37  ;;  %v872_v29 = vld [vmem:[%s1863_s24] sm:$0xff]  ;;  %vm705_vm12 = vcmp.eq.s32.totalorder %v700_v6, %v697_v5  ;;  %v711_v5 = vmov %v1769_v5  ;;  %v714_v6 = vmov %v1771_v6 }
 0x13d   : >>> { %v557_v39 = vsel %vm555_vm13, %v556_v36, %v554_v38  ;;  %vm746_vm13 = vcmp.eq.s32.totalorder %v741_v6, %v738_v5 }
 0x13e   : >>> { %v558_v40 = vxor.u32 2147483648, %v557_v39 }
 0x140   : >>> { %v559_v41 = vsel %vm543_vm14, %v557_v39, %v558_v40  ;;  %vm731_vm14 = vcmp.eq.s32.totalorder %v727_v6, %v724_v5 }
 0x141   : >>> { %v560_v42 = vadd.f32 %v559_v41, %v542_v27 }
 0x143   : >>> { %1615 = vrcp.f32 %v560_v42  ;;  %v572_v48 = vand.u32 2147483648, %v560_v42  ;;  %vm566_vm15 = vweird.f32 %v560_v42  ;;  %v570_v50 = vand.u32 2147483647, %v560_v42 }
 0x145   : >>> { %v573_v54 = vor.u32 1.1754944e-38, %v572_v48  ;;  %vm571_vm3 = vcmp.eq.f32.partialorder %v570_v50, 8.507059e+37 }
 0x149   : >>> { %v1616_v45 = vpop.eup %1615 }
 0x14a   : >>> { %v562_v47 = vmul.f32 %v1616_v45, %v560_v42  ;;  %vm567_vm0 = vweird.f32 %v1616_v45 }
 0x14b   : >>> { %vm568_vm1 = vmor %vm566_vm15, %vm567_vm0  ;;  %vm718_vm15 = vcmp.eq.s32.totalorder %v714_v6, %v711_v5  ;;  %vm777_vm0 = vcmp.eq.s32.totalorder %v1769_v5, 7  ;;  %v361_v6 = vmov (%p454_p9), %v1771_v6 }
 0x14c   : >>> { %v563_v49 = vsub.f32 1.0, %v562_v47 }
 0x14e   : >>> { %v564_v53 = vmul.f32 %v1616_v45, %v563_v49 }
 0x150   : >>> { %v565_v55 = vadd.f32 %v1616_v45, %v564_v53 }
 0x152   : >>> { %v569_v56 = vsel %vm568_vm1, %v1616_v45, %v565_v55  ;;  %vm760_vm1 = vcmp.eq.s32.totalorder %v1769_v5, 0 }
 0x153   : >>> { %v574_v57 = vsel %vm571_vm3, %v573_v54, %v569_v56  ;;  %vm764_vm3 = vcmp.eq.s32.totalorder %v1769_v5, 1  ;;  %v358_v5 = vmov (%p454_p9), %v1769_v5 }
 0x154   : >>> { %v581_v58 = vsel %vm580_vm4, 0.0, %v574_v57  ;;  %vm373_vm4 = vcmp.eq.s32.totalorder (%p454_p9), %v361_v6, %v358_v5  ;;  %v377_v5 = vmov (%p454_p9), %v1769_v5  ;;  %v380_v6 = vmov (%p454_p9), %v1771_v6 }
 0x155   : >>> { %v582_v59 = vmul.f32 %v581_v58, %v581_v58  ;;  %v595_v60 = vmul.f32 %v581_v58, %v1834_v12  ;;  %v394_v5 = vmov (%p454_p9), %v1769_v5  ;;  %v397_v6 = vmov (%p454_p9), %v1771_v6 }
 0x156   : >> { %v411_v5 = vmov (%p454_p9), %v1769_v5  ;;  %v414_v6 = vmov (%p454_p9), %v1771_v6 }
 0x157   : >>> { %v583_v61 = vadd.f32 1.0, %v582_v59  ;;  %v596_v62 = vsub.f32 %v521_v19, %v595_v60  ;;  %v598_v63 = vadd.f32 %v595_v60, %v525_v20  ;;  %v869_v19 = vld [vmem:[%s1850_s30] sm:$0xff] }
 0x158   : >>> { %v870_v20 = vld [vmem:[%s1853_s15] sm:$0xff] }
 0x159   : >>> { %1617 = vrsqrt.f32 %v583_v61  ;;  %600 = vst [vmem:[%s599_s27] sm:$0xff] %v596_v62  ;;  %vm590_vm5 = vweird.f32 %v583_v61  ;;  %s637_s27 = smov [#allocation21] }
 0x15a   : >>> { %602 = vst [vmem:[%s601_s28] sm:$0xff] %v598_v63  ;;  %s1843_s28 = smov [#allocation10] }
 0x15b   : >>> { %v645_v22 = vld [vmem:[%s1843_s28] sm:$0xff] }
 0x15f   : >>> { %v1618_v0 = vpop.eup %1617 }
 0x160   : >>> { %v585_v1 = vmul.f32 %v1618_v0, %v583_v61  ;;  %vm591_vm6 = vweird.f32 %v1618_v0 }
 0x161   : >>> { %vm592_vm7 = vmor %vm590_vm5, %vm591_vm6  ;;  %vm426_vm5 = vcmp.eq.s32.totalorder (%p454_p9), %v414_v6, %v411_v5 }
 0x162   : >>> { %v586_v2 = vmul.f32 %v1618_v0, %v585_v1 }
 0x164   : >>> { %v587_v3 = vmul.f32 0.5, %v586_v2 }
 0x166   : >>> { %v588_v4 = vsub.f32 1.5, %v587_v3 }
 0x168   : >>> { %v589_v7 = vmul.f32 %v1618_v0, %v588_v4 }
 0x16a   : >>> { %v593_v8 = vsel %vm592_vm7, %v1618_v0, %v589_v7 }
 0x16b   : >>> { %604 = vst [vmem:[%s603_s11] sm:$0xff] %v593_v8  ;;  %v594_v9 = vmul.f32 %v593_v8, %v581_v58  ;;  %s1845_s11 = smov [#allocation11] }
 0x16c   : >>> { %v646_v16 = vld [vmem:[%s1845_s11] sm:$0xff] }
 0x16d   : >>> { %606 = vst [vmem:[%s605_s21] sm:$0xff] %v594_v9  ;;  %s1847_s21 = smov [#allocation12] }
 0x16e   : >>> { %v647_v17 = vld [vmem:[%s1847_s21] sm:$0xff] }
 0x172   : >>> { %v608_v10 = vld [vmem:[%s607_s22] ss:$0 sm:$0xff]  ;;  %s861_s22 = smov [#allocation21] }
 0x173   : >>> { %v617_v11 = vsel %vm616_vm8, %v608_v10, 0.0 }
 0x174   : >>> { %618 = vadd.xlane.f32.xlu0 %v617_v11  ;;  %v623_v12 = vld [vmem:[%s622_s29] ss:$0 sm:$0xff]  ;;  %s1855_s29 = smov [#allocation13] }
 0x175   : >>> { %v632_v13 = vsel %vm631_vm9, %v623_v12, 0.0  ;;  %v648_v23 = vld [vmem:[%s1855_s29] sm:$0xff] }
 0x17c   : >>> { %633 = vadd.xlane.f32.xlu0 %v632_v13 }
 0x1e7   : >>> { %v619_v14 = vpop.xlane.xlu0 %618 }
 0x1e8   : >>> { %621 = vst [vmem:[%s620_s14] sm:$0xff] %v619_v14  ;;  %s639_s14 = smov [#allocation22] }
 0x1ef   : >>> { %v634_v15 = vpop.xlane.xlu0 %633  ;;  %v638_v18 = vld [vmem:[%s637_s27] sm:$0xff]  ;;  %s665_s27 = smov [#allocation19] }
 0x1f0   : >>> { %636 = vst [vmem:[%s635_s20] sm:$0xff] %v634_v15  ;;  %s863_s20 = smov [#allocation22]  ;;  %v862_v21 = vld [vmem:[%s861_s22] sm:$0xff]  ;;  %v652_v25 = vmul.f32 %v646_v16, %v638_v18  ;;  %v656_v26 = vmul.f32 %v647_v17, %v638_v18  ;;  %v649_v46 = vmul.f32 %v645_v22, %v638_v18  ;;  %v659_v48 = vmul.f32 %v648_v23, %v638_v18  ;;  %s667_s22 = smov [#allocation20] }
 0x1f1   : >>> { %v873_v30 = vmul.f32 %v869_v19, %v862_v21  ;;  %v876_v31 = vmul.f32 %v870_v20, %v862_v21  ;;  %v880_v38 = vmul.f32 %v871_v24, %v862_v21  ;;  %v883_v42 = vmul.f32 %v872_v29, %v862_v21  ;;  %v666_v52 = vld [vmem:[%s665_s27] ss:$0 sm:$0xff]  ;;  %s693_s27 = smov [#allocation10] }
 0x1f2   : >>> { %v668_v53 = vld [vmem:[%s667_s22] ss:$0 sm:$0xff]  ;;  %s734_s22 = smov [#allocation13] }
 0x1f7   : >>> { %v640_v27 = vld [vmem:[%s639_s14] sm:$0xff]  ;;  %s1877_s14 = smov [#allocation12] }
 0x1f8   : >>> { %v864_v28 = vld [vmem:[%s863_s20] sm:$0xff]  ;;  %v653_v32 = vmul.f32 %v648_v23, %v640_v27  ;;  %v655_v33 = vmul.f32 %v645_v22, %v640_v27  ;;  %v650_v39 = vmul.f32 %v647_v17, %v640_v27  ;;  %v658_v43 = vmul.f32 %v646_v16, %v640_v27  ;;  %s735_s20 = smov [#allocation18] }
 0x1f9   : >>> { %v874_v34 = vmul.f32 %v871_v24, %v864_v28  ;;  %v877_v35 = vmul.f32 %v872_v29, %v864_v28  ;;  %v879_v36 = vmul.f32 %v869_v19, %v864_v28  ;;  %v882_v37 = vmul.f32 %v870_v20, %v864_v28  ;;  %v742_v23 = vld [vmem:[%s735_s20] ss:$0 sm:$0xff]  ;;  %s1660_s20 = smov 1  }
 0x1fa   : >>> { %v654_v40 = vsub.f32 %v652_v25, %v653_v32  ;;  %v657_v41 = vadd.f32 %v656_v26, %v655_v33  ;;  %v651_v50 = vsub.f32 %v649_v46, %v650_v39  ;;  %v660_v51 = vadd.f32 %v659_v48, %v658_v43 }
 0x1fb   : >>> { %v875_v44 = vsub.f32 %v873_v30, %v874_v34  ;;  %v878_v45 = vsub.f32 %v876_v31, %v877_v35  ;;  %v881_v47 = vadd.f32 %v880_v38, %v879_v36  ;;  %v884_v49 = vadd.f32 %v883_v42, %v882_v37 }
 0x1fc   : >>> { %662 = vst [vmem:[%s1845_s11] sm:$0xff] %v654_v40  ;;  %s1879_s11 = smov [#allocation11] }
 0x1fd   : >>> { %663 = vst [vmem:[%s1847_s21] sm:$0xff] %v657_v41  ;;  %s1891_s21 = smov [#allocation10] }
 0x1fe   : >>> { %885 = vst [vmem:[%s1850_s30] sm:$0xff] %v875_v44  ;;  %s889_s30 = smov %s1776_s30 }
 0x1ff   : >>> { %886 = vst [vmem:[%s1853_s15] sm:$0xff] %v878_v45  ;;  %s1885_s15 = smov %s1781_s15 }
 0x200   : >>> { %887 = vst [vmem:[%s1858_s23] sm:$0xff] %v881_v47  ;;  %s890_s23 = smov %s1789_s23 }
 0x201   : >>> { %888 = vst [vmem:[%s1863_s24] sm:$0xff] %v884_v49  ;;  %s1895_s24 = smov %s1793_s24 }
 0x202   : >>> { %661 = vst [vmem:[%s1843_s28] sm:$0xff] %v651_v50  ;;  %s672_s28 = smov [#allocation13] }
 0x203   : >>> { %664 = vst [vmem:[%s1855_s29] sm:$0xff] %v660_v51  ;;  %v674_v55 = vld [vmem:[%s1879_s11] sm:$0xff]  ;;  %s694_s29 = smov [#allocation17] }
 0x204   : >>> { %v675_v54 = vld [vmem:[%s1877_s14] sm:$0xff]  ;;  %v678_v4 = vmul.f32 %v674_v55, %v668_v53  ;;  %v681_v12 = vmul.f32 %v674_v55, %v666_v52 }
 0x205   : >>> { %v891_v56 = vld [vmem:[%s889_s30] ss:$0 sm:$0xff]  ;;  %v1539_v58 = vld [vmem:[%s889_s30 + $0x7] ss:$0 sm:$0xff]  ;;  %v686_v9 = vmul.f32 %v675_v54, %v668_v53  ;;  %v683_v10 = vmul.f32 %v675_v54, %v666_v52 }
 0x206   : >>> { %v1538_v57 = vld [vmem:[%s889_s30 - $0x1] sm:$0xfe]  ;;  %v1543_v62 = vld [vmem:[%s1885_s15 + $0x7] ss:$0 sm:$0xff] }
 0x207   : >>> { %v898_v59 = vsel %vm821_vm10, %v891_v56, %v1538_v57  ;;  %v915_v60 = vld [vmem:[%s1885_s15] ss:$0 sm:$0xff]  ;;  %v1541_v0 = vld [vmem:[%s890_s23 + $0x1] sm:$0x7f] }
 0x208   : >>> { %v1542_v61 = vld [vmem:[%s1885_s15 - $0x1] sm:$0xfe]  ;;  %901 = vst [vmem:[%s889_s30] sm:$0xff] %v898_v59  ;;  %v910_v2 = vsel %vm833_vm11, %v1539_v58, %v1541_v0 }
 0x209   : >>> { %v902_v63 = vld [vmem:[%s890_s23] ss:$0 sm:$0xff]  ;;  %v922_v1 = vsel %vm821_vm10, %v915_v60, %v1542_v61  ;;  %v1545_v3 = vld [vmem:[%s1895_s24 + $0x1] sm:$0x7f] }
 0x20a   : >>> { %1540 = vst [vmem:[%s889_s30 + $0x1] sm:$0x1] %v902_v63  ;;  %v926_v7 = vld [vmem:[%s1895_s24] ss:$0 sm:$0xff]  ;;  %v934_v8 = vsel %vm833_vm11, %v1543_v62, %v1545_v3 }
 0x20b   : >>> { %912 = vst [vmem:[%s890_s23] sm:$0xff] %v910_v2  ;;  %v673_v11 = vld [vmem:[%s1891_s21] sm:$0xff] }
 0x20c   : >>> { %925 = vst [vmem:[%s1885_s15] sm:$0xff] %v922_v1  ;;  %v676_v13 = vld [vmem:[%s672_s28] sm:$0xff]  ;;  %v677_v14 = vmul.f32 %v673_v11, %v666_v52  ;;  %v680_v15 = vmul.f32 %v673_v11, %v668_v53 }
 0x20d   : >>> { %1544 = vst [vmem:[%s1885_s15 + $0x1] sm:$0x1] %v926_v7  ;;  %v684_v16 = vmul.f32 %v676_v13, %v668_v53  ;;  %v687_v17 = vmul.f32 %v676_v13, %v666_v52  ;;  %v701_v22 = vld [vmem:[%s694_s29] ss:$0 sm:$0xff]  ;;  %s1929_s29 = smov [#allocation12] }
 0x20e   : >>> { %936 = vst [vmem:[%s1895_s24] sm:$0xff] %v934_v8  ;;  %v679_v18 = vsub.f32 %v677_v14, %v678_v4  ;;  %v682_v21 = vadd.f32 %v681_v12, %v680_v15 }
 0x20f   : >>> { %v688_v19 = vadd.f32 %v687_v17, %v686_v9  ;;  %v685_v20 = vsub.f32 %v683_v10, %v684_v16 }
 0x210   : >>> { %689 = vst [vmem:[%s1891_s21] sm:$0xff] %v679_v18  ;;  %s708_s21 = smov [#allocation11] }
 0x211   : >>> { %692 = vst [vmem:[%s672_s28] sm:$0xff] %v688_v19  ;;  %s1927_s28 = smov [#allocation13] }
 0x212   : >>> { %691 = vst [vmem:[%s1877_s14] sm:$0xff] %v685_v20  ;;  %s721_s14 = smov [#allocation12] }
 0x213   : >>> { %690 = vst [vmem:[%s1879_s11] sm:$0xff] %v682_v21  ;;  %s1925_s11 = smov [#allocation10] }
 0x217   : >>> { %v702_v24 = vld [vmem:[%s693_s27] sm:$0xff] }
 0x218   : >>> { %v743_v25 = vld [vmem:[%s734_s22] sm:$0xff]  ;;  %v706_v26 = vsel %vm705_vm12, %v701_v22, %v702_v24 }
 0x219   : >>> { %v747_v27 = vsel %vm746_vm13, %v742_v23, %v743_v25  ;;  %v728_v28 = vld [vmem:[%s721_s14] sm:$0xff]  ;;  %707 = vst [vmem:[%s693_s27] sm:$0xff] %v706_v26  ;;  %s750_s27 = smov [#allocation11] }
 0x21a   : >>> { %748 = vst [vmem:[%s734_s22] sm:$0xff] %v747_v27  ;;  %v732_v29 = vsel %vm731_vm14, 0.0, %v728_v28  ;;  %v715_v30 = vld [vmem:[%s708_s21] sm:$0xff]  ;;  %s1661_s22 = smov 127  }
 0x21b   : >>> { %733 = vst [vmem:[%s721_s14] sm:$0xff] %v732_v29  ;;  %v719_v31 = vsel %vm718_vm15, 0.0, %v715_v30  ;;  %s1937_s14 = smov [#allocation11] }
 0x21c   : >>> { %720 = vst [vmem:[%s708_s21] sm:$0xff] %v719_v31  ;;  %s814_s21 = smov [#allocation12] }
 0x220   : >>> { %v755_v32 = vld [vmem:[%s1925_s11] sm:$0xff] }
 0x221   : >>> { %v783_v33 = vld [vmem:[%s1927_s28] sm:$0xff]  ;;  %756 = vrot.lane.b32.xlu1 %v755_v32, %s1660_s20 }
 0x222   : >>> { %784 = vrot.lane.b32.xlu0 %v783_v33, %s1660_s20  ;;  %v787_v34 = vld [vmem:[%s1929_s29] sm:$0xff] }
 0x223   : >>> { %788 = vrot.lane.b32.xlu2 %v787_v34, %s1660_s20  ;;  %v772_v35 = vld [vmem:[%s750_s27] sm:$0xff] }
 0x229   : >>> { %752 = vrot.lane.b32.xlu1 %v772_v35, %s1660_s20  ;;  %s813_s20 = smov [#allocation10] }
 0x22b   : >>> { %773 = vrot.lane.b32.xlu2 %v772_v35, %s1661_s22 }
 0x231   : >>> { %805 = vrot.lane.b32.xlu1 %v783_v33, %s1661_s22  ;;  %s398_s22 = smov (%p454_p9), [#allocation12] }
 0x27d   : >>> { %v789_v36 = vpop.permute.xlu2 %788 }
 0x27e   : >>> { %v793_v44 = vsel %vm760_vm1, %v787_v34, %v789_v36 }
 0x285   : >>> { %v774_v37 = vpop.permute.xlu2 %773 }
 0x286   : >>> { %v778_v38 = vsel %vm777_vm0, %v755_v32, %v774_v37 }
 0x287   : >>> { %780 = vst [vmem:[%s750_s27] sm:$0xff] %v778_v38  ;;  %s381_s27 = smov (%p454_p9), [#allocation11] }
 0x28e   : >>> { %v839_v39 = vld [vmem:[%s1937_s14] ss:$0 sm:$0xff]  ;;  %v1535_v41 = vld [vmem:[%s1937_s14 + $0x7] ss:$0 sm:$0xff] }
 0x28f   : >>> { %v1534_v40 = vld [vmem:[%s1937_s14 - $0x1] sm:$0xfe] }
 0x290   : >>> { %v846_v42 = vsel %vm821_vm10, %v839_v39, %v1534_v40 }
 0x291   : >>> { %849 = vst [vmem:[%s1937_s14] sm:$0xff] %v846_v42 }
 0x293   : >>> { %v757_v43 = vpop.permute.xlu1 %756 }
 0x294   : >>> { %v785_v45 = vpop.permute.xlu0 %784  ;;  %v761_v48 = vsel %vm760_vm1, %v755_v32, %v757_v43 }
 0x295   : >>> { %v797_v46 = vsel %vm764_vm3, %v785_v45, %v793_v44 }
 0x296   : >>> { %v803_v47 = vsel %vm1399_vm2, %v797_v46, 0.0 }
 0x297   : >>> { %811 = vst [vmem:[%s1929_s29] sm:$0xff] %v803_v47  ;;  %s362_s29 = smov (%p454_p9), [#allocation10] }
 0x29b   : >>> { %v753_v49 = vpop.permute.xlu1 %752 }
 0x29c   : >>> { %v765_v50 = vsel %vm764_vm3, %v753_v49, %v761_v48 }
 0x29d   : >>> { %v771_v51 = vsel %vm1399_vm2, %v765_v50, 0.0 }
 0x29e   : >>> { %779 = vst [vmem:[%s1925_s11] sm:$0xff] %v771_v51  ;;  %v1533_v53 = vld [vmem:[%s814_s21 + $0x1] sm:$0x7f]  ;;  %v826_v60 = vld [vmem:[%s814_s21] ss:$0 sm:$0xff]  ;;  %s838_s11 = smov [#allocation13] }
 0x2a3   : >>> { %v806_v52 = vpop.permute.xlu1 %805 }
 0x2a4   : >>> { %v810_v54 = vsel %vm777_vm0, %v787_v34, %v806_v52 }
 0x2a5   : >>> { %v815_v55 = vld [vmem:[%s813_s20] ss:$0 sm:$0xff]  ;;  %v1531_v57 = vld [vmem:[%s813_s20 + $0x7] ss:$0 sm:$0xff]  ;;  %812 = vst [vmem:[%s1927_s28] sm:$0xff] %v810_v54  ;;  %s937_s28 = sadd.s32 (%p454_p9), 1, %s1653_s16  }
 0x2a6   : >>> { %v1530_v56 = vld [vmem:[%s813_s20 - $0x1] sm:$0xfe]  ;;  %v834_v59 = vsel %vm833_vm11, %v1531_v57, %v1533_v53  ;;  %p450_p10 = scmp.ge.s32.totalorder (%p454_p9), %s937_s28, 15  ;;  %s2054_s16 = smov (%p454_p9), %s937_s28 }
 0x2a7   : >>> { %v822_v58 = vsel %vm821_vm10, %v815_v55, %v1530_v56  ;;  %836 = vst [vmem:[%s814_s21] sm:$0xff] %v834_v59 }
 0x2a8   : >>> { %825 = vst [vmem:[%s813_s20] sm:$0xff] %v822_v58 }
 0x2a9   : >>> { %1532 = vst [vmem:[%s813_s20 + $0x1] sm:$0x1] %v826_v60 }
 0x2ac   : >>> { %v850_v61 = vld [vmem:[%s838_s11] ss:$0 sm:$0xff]  ;;  %v1537_v62 = vld [vmem:[%s838_s11 + $0x1] sm:$0x7f] }
 0x2ad   : >>> { %1536 = vst [vmem:[%s1937_s14 + $0x1] sm:$0x1] %v850_v61  ;;  %v858_v63 = vsel %vm833_vm11, %v1535_v41, %v1537_v62  ;;  %456 = sbr.rel (!%p454_p9) target bundleno = 248 (0xf8), region = 502  ;;  %s415_s14 = smov (%p454_p9), [#allocation13] }
 0x2ae   : >>> { %860 = vst [vmem:[%s838_s11] sm:$0xff] %v858_v63  ;;  %v404_v4 = vld [vmem:[%s398_s22] sm:$0xff] (%p454_p9) }
 0x2af   : >> { %v405_v10 = vsel (%p454_p9), %vm1399_vm2, %v404_v4, 0.0 }
 0x2b0   : >> { %v368_v0 = vld [vmem:[%s362_s29] sm:$0xff] (%p454_p9)  ;;  %v406_v12 = vmul.f32 (%p454_p9), %v405_v10, %v405_v10 }
 0x2b1   : >> { %v369_v2 = vsel (%p454_p9), %vm1399_vm2, %v368_v0, 0.0 }
 0x2b2   : >> { %v370_v8 = vmul.f32 %v369_v2, %v369_v2 }
 0x2b4   : >> { %v387_v1 = vld [vmem:[%s381_s27] sm:$0xff]  ;;  %v374_v15 = vsel %vm373_vm4, 0.0, %v370_v8 }
 0x2b5   : >> { %v388_v3 = vsel %vm1399_vm2, %v387_v1, 0.0  ;;  %v421_v7 = vld [vmem:[%s415_s14] sm:$0xff] }
 0x2b6   : >> { %v389_v9 = vmul.f32 %v388_v3, %v388_v3  ;;  %v422_v11 = vsel %vm1399_vm2, %v421_v7, 0.0 }
 0x2b7   : >> { %v423_v14 = vmul.f32 %v422_v11, %v422_v11 }
 0x2b8   : >> { %v391_v13 = vadd.f32 %v389_v9, %v370_v8  ;;  %v390_v17 = vadd.f32 %v389_v9, %v374_v15 }
 0x2b9   : >> { %v427_v20 = vsel %vm426_vm5, 0.0, %v423_v14 }
 0x2ba   : >> { %v408_v16 = vadd.f32 %v406_v12, %v391_v13  ;;  %v407_v19 = vadd.f32 %v406_v12, %v390_v17 }
 0x2bc   : >> { %v429_v18 = vadd.f32 %v423_v14, %v408_v16  ;;  %v428_v21 = vadd.f32 %v427_v20, %v407_v19 }
 0x2be   : >> { %430 = vadd.xlane.f32.xlu0 %v429_v18 }
 0x2c6   : >> { %438 = vadd.xlane.f32.xlu0 %v428_v21 }
 0x331   : >> { %v431_v22 = vpop.xlane.xlu0 %430 }
 0x332   : >> { %v432_v23 = vrot.slane %v431_v22, 4 }
 0x334   : >> { %v433_v24 = vadd.f32 %v432_v23, %v431_v22 }
 0x336   : >> { %v434_v25 = vrot.slane %v433_v24, 2 }
 0x338   : >> { %v435_v29 = vadd.f32 %v434_v25, %v433_v24 }
 0x339   : >> { %v439_v26 = vpop.xlane.xlu0 %438 }
 0x33a   : >> { %v440_v27 = vrot.slane %v439_v26, 4  ;;  %v436_v32 = vrot.slane %v435_v29, 1 }
 0x33c   : >> { %v441_v28 = vadd.f32 %v440_v27, %v439_v26  ;;  %v437_v35 = vadd.f32 %v436_v32, %v435_v29 }
 0x33e   : >> { %v442_v30 = vrot.slane %v441_v28, 2 }
 0x340   : >> { %v443_v31 = vadd.f32 %v442_v30, %v441_v28 }
 0x342   : >> { %v444_v33 = vrot.slane %v443_v31, 1 }
 0x344   : >> { %v445_v34 = vadd.f32 %v444_v33, %v443_v31 }
 0x346   : >> { %1564 = vpush %v445_v34 }
 0x347   : >> { %1566 = vpush %v437_v35 }
 0x377   : >> { %s1565_s17 = spop %1564 }
 0x378   : >> { %s1567_s21 = spop %1566 }
 0x379   : >> { %s448_s20 = smul.f32 1e-10, %s1567_s21 }
 0x37b   : >> { %p449_p11 = scmp.le.f32.partialorder %s1565_s17, %s448_s20 }
 0x37d   : >> { %p451_p12 = por %p450_p10, %p449_p11 }
 0x37f   : > { %939 = sbr.rel (!%p451_p12) target bundleno = 247 (0xf7), region = 513 }
 0x384 PF: > { %s944_s11 = smov [#allocation10]  ;;  %v948_v5 = vmov %v1769_v5  ;;  %v951_v6 = vmov %v1771_v6  ;;  %s964_s16 = smov [#allocation13] }
 0x385   : > { %v968_v5 = vmov %v1769_v5  ;;  %v971_v6 = vmov %v1771_v6  ;;  %v952_v36 = vld [vmem:[%s944_s11] sm:$0xff]  ;;  %vm955_vm6 = vcmp.eq.s32.totalorder %v951_v6, %v948_v5  ;;  %s940_s28 = sand.u32 7, %s1728_s12   ;;  %s1011_s22 = sshrl.u32 (%p1742_p3), %s1728_s12, 3 }
 0x386   : > { %vm975_vm7 = vcmp.eq.s32.totalorder %v971_v6, %v968_v5  ;;  %v956_v37 = vsel %vm955_vm6, %v952_v36, 0.0  ;;  %v972_v39 = vld [vmem:[%s964_s16] sm:$0xff]  ;;  %s941_s29 = scalar_lea.vmem %s287_s25, %s940_s28 [#allocation4]  ;;  %s943_s27 = scalar_lea.vmem %s293_s26, %s940_s28 [#allocation5] }
 0x387   : > { %v957_v38 = vrot.slane %v956_v37, 4  ;;  %v976_v40 = vsel %vm975_vm7, %v972_v39, 0.0  ;;  %s945_s29 = smov %s941_s29  ;;  %s965_s27 = smov %s943_s27 }
 0x388   : > { %v977_v42 = vrot.slane %v976_v40, 4  ;;  %s1552_s14 = sshll.u32 (%p1742_p3), %s1011_s22, 3 }
 0x389   : > { %v958_v41 = vadd.f32 %v957_v38, %v956_v37  ;;  %s1013_s20 = scalar_lea.vmem (%p1742_p3), %s2046_s4, %s1552_s14 }
 0x38a   : > { %v978_v44 = vadd.f32 %v977_v42, %v976_v40 }
 0x38b   : > { %v959_v43 = vrot.slane %v958_v41, 2 }
 0x38c   : > { %v979_v46 = vrot.slane %v978_v44, 2 }
 0x38d   : > { %v960_v45 = vadd.f32 %v959_v43, %v958_v41 }
 0x38e   : > { %v980_v48 = vadd.f32 %v979_v46, %v978_v44 }
 0x38f   : > { %v961_v47 = vrot.slane %v960_v45, 1 }
 0x390   : > { %v981_v6 = vrot.slane %v980_v48, 1  ;;  %1010 = sbr.rel (!%p1742_p3) target bundleno = 924 (0x39c), region = 174 }
 0x391   : > { %v962_v5 = vadd.f32 %v961_v47, %v960_v45 }
 0x392   : > { %v982_v49 = vadd.f32 %v981_v6, %v980_v48 }
 0x393   : > { %963 = vst [vmem:[%s945_s29] sm:$0x1] %v962_v5 }
 0x394   : > { %983 = vst [vmem:[%s965_s27] sm:$0x1] %v982_v49 }
 0x39a   : > { %v1042_v50 = vld [vmem:[%s287_s25] sm:$0xff] }
 0x39b   : > { %1043 = vst [vmem:[%s1013_s20] sm:$0xff] %v1042_v50 }
 0x39c PF: > { %1049 = sbr.rel (!%p1742_p3) target bundleno = 932 (0x3a4), region = 212  ;;  %s1050_s11 = sshrl.u32 (%p1742_p3), %s1728_s12, 3 }
 0x39d   : > { %s1553_s16 = sshll.u32 (%p1742_p3), %s1050_s11, 3 }
 0x39e   : > { %s1052_s25 = scalar_lea.vmem (%p1742_p3), %s2047_s5, %s1553_s16 }
 0x3a2   : > { %v1081_v51 = vld [vmem:[%s293_s26] sm:$0xff] }
 0x3a3   : > { %1082 = vst [vmem:[%s1052_s25] sm:$0xff] %v1081_v51 }
 0x3a4 PF: > { %s1554_s27 = sshll.u32 %s1728_s12, 3  ;;  %v1116_v52 = vld [vmem:[%s1776_s30] sm:$0xff]  ;;  %v1151_v53 = vld [vmem:[%s1781_s15] sm:$0xff] }
 0x3a5   : > { %s1087_s18 = scalar_lea.vmem %s2048_s6, %s1554_s27  ;;  %s1122_s17 = scalar_lea.vmem %s2049_s7, %s1554_s27  ;;  %v1186_v54 = vld [vmem:[%s1789_s23] sm:$0xff]  ;;  %v1221_v55 = vld [vmem:[%s1793_s24] sm:$0xff] }
 0x3a6   : > { %1117 = vst [vmem:[%s1087_s18] sm:$0xff] %v1116_v52  ;;  %s1157_s11 = scalar_lea.vmem %s2050_s8, %s1554_s27  ;;  %s1192_s12 = scalar_lea.vmem %s2051_s9, %s1554_s27 }
 0x3a7   : > { %1152 = vst [vmem:[%s1122_s17] sm:$0xff] %v1151_v53 }
 0x3a8   : > { %1187 = vst [vmem:[%s1157_s11] sm:$0xff] %v1186_v54 }
 0x3a9   : > { %1222 = vst [vmem:[%s1192_s12] sm:$0xff] %v1221_v55 }
 0x3aa PF: > { %s2055_s15 = sld [smem:[#allocation23_spill]]  ;;  %p13_p13 = scmp.ge.s32.totalorder %s1731_s13, 10  }
 0x3ab   : > { %s2056_s30 = smov %s1645_s10  ;;  %s2058_s11 = smov %s1731_s13 }
 0x3ac   :  { %15 = sbr.rel (!%p13_p13) target bundleno = 2 (0x2), region = 524 }
 0x3b0   : > { %s2057_s10 = smov %s2055_s15 }

// kernel: super_blt_graph_forward.2
= control target key start
LH: loop header
LB: loop body
LE: loop exit
PB: predicated region body
PF: predicated region fallthrough
CT: control target
= control target key end

     0   :  { %s893_s15 = smov 0   ;;  %s1133_s0 = inlined_call_operand.vmem [shape: f32[8,16,16], index: 0, kind: input, shape index: {}]   ;;  %s1134_s1 = inlined_call_operand.vmem [shape: f32[8,16,16], index: 1, kind: input, shape index: {}]   ;;  %s1135_s2 = inlined_call_operand.vmem [shape: f32[16,32], index: 2, kind: input, shape index: {}]   ;;  %s1136_s3 = inlined_call_operand.vmem [shape: f32[8,16,16], index: 3, kind: output, shape index: {0}]   ;;  %s1137_s4 = inlined_call_operand.vmem [shape: f32[2,16,128], index: 4, kind: output, shape index: {1}]  }
   0x1 LB: > { %s899_s16 = sadd.s32 4294967295, %s863_s15   ;;  %p778_p0 = scmp.ge.s32.totalorder %s863_s15, 1  ;;  %s863_s15 = sphi %s893_s15, %s15_s15  }
   0x2   : > { %p179_p1 = scmp.lt.s32.totalorder %s863_s15, 3 }
   0x4   : > { %p180_p2 = pnand %p778_p0, %p179_p1 }
   0x5   : > { %s779_s17 = sshll.u32 (!%p180_p2), %s899_s16, 2  ;;  %s865_s6 = smov (!%p180_p2), 32  }
   0x6   : > { %183 = sbr.rel (%p180_p2) target bundleno = 421 (0x1a5), region = 32  ;;  %p219_p3 = scmp.lt.s32.totalorder (!%p180_p2), %s779_s17, 7 }
   0x7   : > { %s866_s7 = smov (!%p180_p2), 64   ;;  %s867_s8 = smov (!%p180_p2), 96  }
   0x8   : > { %p239_p4 = scmp.lt.s32.totalorder (!%p180_p2), %s899_s16, 1 }
   0xb   : > { %s1149_s17 = smov (!%p219_p3, %s779_s17), 7  ;;  %vm250_vm0 = vcmask 130048   ;;  %s1151_s16 = smov (!%p239_p4, %s899_s16), 1 }
   0xc   : > { %s904_s18 = sshll.u32 %s1149_s17, 4  ;;  %s821_s9 = sshll.u32 %s1151_s16, 4 }
   0xd   : > { %s223_s21 = scalar_lea.vmem %s1133_s0, %s904_s18  ;;  %s922_s24 = scalar_lea.vmem %s1134_s1, %s904_s18 }
   0xe   : > { %v809_v0 = vld [vmem:[%s223_s21 + $0x38] sm:$0xff]  ;;  %v800_v1 = vld [vmem:[%s223_s21 + $0x20] sm:$0xff]  ;;  %v792_v2 = vld [vmem:[%s223_s21 + $0x10] sm:$0xff]  ;;  %s237_s5 = scalar_lea.vmem %s1136_s3, %s904_s18  ;;  %s243_s12 = scalar_lea.vmem %s1137_s4, %s821_s9 }
   0xf   : > { %v547_v3 = vsel %vm250_vm0, %v809_v0, 0.0  ;;  %v446_v4 = vsel %vm250_vm0, %v800_v1, 0.0  ;;  %v348_v5 = vsel %vm250_vm0, %v792_v2, 0.0  ;;  %v808_v6 = vld [vmem:[%s223_s21 + $0x30] sm:$0xff]  ;;  %v793_v7 = vld [vmem:[%s223_s21 + $0x18] sm:$0xff]  ;;  %v801_v8 = vld [vmem:[%s223_s21 + $0x28] sm:$0xff] }
  0x10   : > { %548 = vadd.xlane.f32.xlu2 %v547_v3  ;;  %447 = vadd.xlane.f32.xlu0 %v446_v4  ;;  %v544_v9 = vsel %vm250_vm0, %v808_v6, 0.0  ;;  %v351_v10 = vsel %vm250_vm0, %v793_v7, 0.0  ;;  %v449_v11 = vsel %vm250_vm0, %v801_v8, 0.0  ;;  %v246_v12 = vld [vmem:[%s223_s21] sm:$0xff]  ;;  %v247_v13 = vld [vmem:[%s223_s21 + $0x8] sm:$0xff]  ;;  %v925_v16 = vld [vmem:[%s922_s24 + $0x10] sm:$0xff] }
  0x11   : > { %349 = vadd.xlane.f32.xlu1 %v348_v5  ;;  %v251_v14 = vsel %vm250_vm0, %v246_v12, 0.0  ;;  %v254_v15 = vsel %vm250_vm0, %v247_v13, 0.0  ;;  %v928_v17 = vld [vmem:[%s922_s24 + $0x18] sm:$0xff]  ;;  %v931_v18 = vld [vmem:[%s922_s24 + $0x20] sm:$0xff]  ;;  %v380_v19 = vsel %vm250_vm0, %v925_v16, 0.0  ;;  %v938_v21 = vld [vmem:[%s922_s24 + $0x28] sm:$0xff] }
  0x12   : > { %v381_v20 = vsel %vm250_vm0, %v928_v17, 0.0  ;;  %v478_v22 = vsel %vm250_vm0, %v931_v18, 0.0  ;;  %v943_v23 = vld [vmem:[%s922_s24 + $0x30] sm:$0xff]  ;;  %v946_v24 = vld [vmem:[%s922_s24 + $0x38] sm:$0xff]  ;;  %v479_v26 = vsel %vm250_vm0, %v938_v21, 0.0  ;;  %v955_v49 = vld [vmem:[%s922_s24] sm:$0xff] }
  0x13   : > { %v382_v25 = vadd.f32 %v381_v20, %v380_v19  ;;  %v576_v27 = vsel %vm250_vm0, %v943_v23, 0.0  ;;  %v577_v28 = vsel %vm250_vm0, %v946_v24, 0.0  ;;  %v480_v29 = vadd.f32 %v479_v26, %v478_v22  ;;  %v958_v50 = vld [vmem:[%s922_s24 + $0x8] sm:$0xff]  ;;  %v244_v12 = vld [vmem:[%s1135_s2] sm:$0xff] }
  0x14   : > { %v578_v30 = vadd.f32 %v577_v28, %v576_v27  ;;  %v283_v51 = vsel %vm250_vm0, %v955_v49, 0.0  ;;  %v284_v52 = vsel %vm250_vm0, %v958_v50, 0.0 }
  0x15   : > { %v383_v31 = vrot.slane %v382_v25, 4  ;;  %v481_v32 = vrot.slane %v480_v29, 4  ;;  %v285_v53 = vadd.f32 %v284_v52, %v283_v51 }
  0x16   : > { %v579_v33 = vrot.slane %v578_v30, 4 }
  0x17   : > { %v384_v34 = vadd.f32 %v383_v31, %v382_v25  ;;  %v482_v35 = vadd.f32 %v481_v32, %v480_v29  ;;  %v286_v54 = vrot.slane %v285_v53, 4 }
  0x18   : > { %545 = vadd.xlane.f32.xlu0 %v544_v9  ;;  %352 = vadd.xlane.f32.xlu2 %v351_v10  ;;  %v580_v36 = vadd.f32 %v579_v33, %v578_v30 }
  0x19   : > { %450 = vadd.xlane.f32.xlu1 %v449_v11  ;;  %v385_v37 = vrot.slane %v384_v34, 2  ;;  %v483_v38 = vrot.slane %v482_v35, 2  ;;  %v287_v58 = vadd.f32 %v286_v54, %v285_v53  ;;  %v245_v11 = vld [vmem:[%s1135_s2 + $0x8] sm:$0xff] }
  0x1a   : > { %v581_v39 = vrot.slane %v580_v36, 2  ;;  %429 = vmatpush.msra.mxu1 %v245_v11  ;;  %527 = vmatpush.msra.mxu2 %v245_v11 }
  0x1b   : > { %v386_v40 = vadd.f32 %v385_v37, %v384_v34  ;;  %v484_v41 = vadd.f32 %v483_v38, %v482_v35  ;;  %v288_v62 = vrot.slane %v287_v58, 2  ;;  %625 = vmatpush.msra.mxu3 %v245_v11  ;;  %331 = vmatpush.msra.mxu0 %v245_v11 }
  0x1c   : > { %v582_v42 = vadd.f32 %v581_v39, %v580_v36  ;;  %430 = vmatpush.msra.mxu1 %v244_v12  ;;  %528 = vmatpush.msra.mxu2 %v244_v12 }
  0x1d   : > { %v387_v43 = vrot.slane %v386_v40, 1  ;;  %v485_v44 = vrot.slane %v484_v41, 1  ;;  %v289_v2 = vadd.f32 %v288_v62, %v287_v58  ;;  %626 = vmatpush.msra.mxu3 %v244_v12  ;;  %332 = vmatpush.msra.mxu0 %v244_v12 }
  0x1e   : > { %v583_v45 = vrot.slane %v582_v42, 1 }
  0x1f   : > { %v388_v46 = vadd.f32 %v387_v43, %v386_v40  ;;  %v486_v47 = vadd.f32 %v485_v44, %v484_v41  ;;  %v290_v3 = vrot.slane %v289_v2, 1 }
  0x20   : > { %252 = vadd.xlane.f32.xlu0 %v251_v14  ;;  %v584_v48 = vadd.f32 %v583_v45, %v582_v42 }
  0x21   : > { %255 = vadd.xlane.f32.xlu1 %v254_v15  ;;  %833 = vrsqrt.f32 %v388_v46  ;;  %v964_v7 = vadd.f32 %v290_v3, %v289_v2  ;;  %vm395_vm1 = vweird.f32 %v388_v46  ;;  %vm493_vm3 = vweird.f32 %v486_v47 }
  0x22   : > { %835 = vrsqrt.f32 %v486_v47  ;;  %vm591_vm5 = vweird.f32 %v584_v48 }
  0x23   : > { %837 = vrsqrt.f32 %v584_v48  ;;  %vm298_vm13 = vweird.f32 %v964_v7 }
  0x24   : > { %839 = vrsqrt.f32 %v964_v7 }
  0x27   : > { %v834_v55 = vpop.eup %833 }
  0x28   : > { %v836_v56 = vpop.eup %835  ;;  %v390_v57 = vmul.f32 %v834_v55, %v388_v46  ;;  %vm396_vm2 = vweird.f32 %v834_v55 }
  0x29   : > { %v838_v59 = vpop.eup %837  ;;  %v488_v60 = vmul.f32 %v836_v56, %v486_v47  ;;  %vm494_vm4 = vweird.f32 %v836_v56  ;;  %vm973_vm7 = vmor %vm395_vm1, %vm396_vm2 }
  0x2a   : > { %v586_v61 = vmul.f32 %v838_v59, %v584_v48  ;;  %v391_v63 = vmul.f32 %v834_v55, %v390_v57  ;;  %vm592_vm6 = vweird.f32 %v838_v59  ;;  %vm495_vm8 = vmor %vm493_vm3, %vm494_vm4  ;;  %v840_v20 = vpop.eup %839 }
  0x2b   : > { %v489_v0 = vmul.f32 %v836_v56, %v488_v60  ;;  %vm593_vm9 = vmor %vm591_vm5, %vm592_vm6  ;;  %v293_v29 = vmul.f32 %v840_v20, %v964_v7  ;;  %vm299_vm14 = vweird.f32 %v840_v20 }
  0x2c   : > { %v587_v1 = vmul.f32 %v838_v59, %v586_v61  ;;  %v392_v4 = vmul.f32 0.5, %v391_v63  ;;  %vm300_vm1 = vmor %vm298_vm13, %vm299_vm14 }
  0x2d   : > { %v490_v5 = vmul.f32 0.5, %v489_v0  ;;  %v294_v31 = vmul.f32 %v840_v20, %v293_v29 }
  0x2e   : > { %v588_v6 = vmul.f32 0.5, %v587_v1  ;;  %v393_v8 = vsub.f32 1.5, %v392_v4 }
  0x2f   : > { %v491_v9 = vsub.f32 1.5, %v490_v5  ;;  %v295_v35 = vmul.f32 0.5, %v294_v31 }
  0x30   : > { %v589_v10 = vsub.f32 1.5, %v588_v6  ;;  %v394_v13 = vmul.f32 %v834_v55, %v393_v8 }
  0x31   : > { %v492_v15 = vmul.f32 %v836_v56, %v491_v9  ;;  %v296_v43 = vsub.f32 1.5, %v295_v35 }
  0x32   : > { %v590_v19 = vmul.f32 %v838_v59, %v589_v10  ;;  %v398_v27 = vsel %vm973_vm7, %v834_v55, %v394_v13 }
  0x33   : > { %v496_v28 = vsel %vm495_vm8, %v836_v56, %v492_v15  ;;  %v399_v32 = vand.u32 2147483647, %v398_v27  ;;  %v297_v55 = vmul.f32 %v840_v20, %v296_v43 }
  0x34   : > { %v594_v30 = vsel %vm593_vm9, %v838_v59, %v590_v19  ;;  %v497_v33 = vand.u32 2147483647, %v496_v28 }
  0x35   : > { %v595_v34 = vand.u32 2147483647, %v594_v30  ;;  %vm997_vm10 = vcmp.eq.f32.partialorder %v399_v32, inf  ;;  %v1034_v3 = vsel %vm300_vm1, %v840_v20, %v297_v55 }
  0x36   : > { %vm1001_vm11 = vcmp.eq.f32.partialorder %v497_v33, inf  ;;  %v1016_v54 = vsel %vm997_vm10, 0.0, %v398_v27  ;;  %v302_v14 = vand.u32 2147483647, %v1034_v3 }
  0x37   : > { %vm596_vm12 = vcmp.eq.f32.partialorder %v595_v34, inf  ;;  %v1021_v57 = vsel %vm1001_vm11, 0.0, %v496_v28 }
  0x38   : > { %v1023_v58 = vsel %vm596_vm12, 0.0, %v594_v30 }
  0x83   : > { %v977_v22 = vpop.xlane.xlu2 %548  ;;  %v979_v25 = vpop.xlane.xlu0 %447 }
  0x84   : > { %841 = vrsqrt.f32 %v977_v22  ;;  %v982_v26 = vpop.xlane.xlu1 %349  ;;  %vm566_vm15 = vweird.f32 %v977_v22  ;;  %vm458_vm2 = vweird.f32 %v979_v25 }
  0x85   : > { %843 = vrsqrt.f32 %v979_v25  ;;  %vm360_vm3 = vweird.f32 %v982_v26 }
  0x86   : > { %845 = vrsqrt.f32 %v982_v26 }
  0x8a   : > { %v989_v36 = vpop.eup %841 }
  0x8b   : > { %v844_v37 = vpop.eup %843  ;;  %v561_v38 = vmul.f32 %v989_v36, %v977_v22  ;;  %v993_v39 = vpop.xlane.xlu0 %545  ;;  %vm567_vm4 = vweird.f32 %v989_v36 }
  0x8c   : > { %v995_v40 = vpop.xlane.xlu2 %352  ;;  %v846_v44 = vpop.eup %845  ;;  %v453_v45 = vmul.f32 %v844_v37, %v979_v25  ;;  %847 = vrsqrt.f32 %v993_v39  ;;  %vm459_vm5 = vweird.f32 %v844_v37  ;;  %vm556_vm6 = vweird.f32 %v993_v39  ;;  %vm568_vm13 = vmor %vm566_vm15, %vm567_vm4 }
  0x8d   : > { %v1007_v46 = vpop.xlane.xlu1 %450  ;;  %v562_v47 = vmul.f32 %v989_v36, %v561_v38  ;;  %v355_v48 = vmul.f32 %v846_v44, %v982_v26  ;;  %849 = vrsqrt.f32 %v995_v40  ;;  %vm361_vm7 = vweird.f32 %v846_v44  ;;  %vm460_vm9 = vmor %vm458_vm2, %vm459_vm5 }
  0x8e   : > { %v454_v51 = vmul.f32 %v844_v37, %v453_v45  ;;  %851 = vrsqrt.f32 %v1007_v46  ;;  %vm370_vm8 = vweird.f32 %v995_v40  ;;  %vm468_vm10 = vweird.f32 %v1007_v46  ;;  %vm362_vm11 = vmor %vm360_vm3, %vm361_vm7 }
  0x8f   : > { %v563_v52 = vmul.f32 0.5, %v562_v47  ;;  %v356_v53 = vmul.f32 %v846_v44, %v355_v48 }
  0x90   : > { %v455_v56 = vmul.f32 0.5, %v454_v51 }
  0x91   : > { %v564_v59 = vsub.f32 1.5, %v563_v52  ;;  %v357_v60 = vmul.f32 0.5, %v356_v53 }
  0x92   : > { %v848_v61 = vpop.eup %847  ;;  %v456_v62 = vsub.f32 1.5, %v455_v56 }
  0x93   : > { %v850_v63 = vpop.eup %849  ;;  %v358_v0 = vsub.f32 1.5, %v357_v60  ;;  %v551_v1 = vmul.f32 %v848_v61, %v993_v39  ;;  %v1032_v2 = vpop.xlane.xlu0 %252  ;;  %v565_v5 = vmul.f32 %v989_v36, %v564_v59  ;;  %vm557_vm12 = vweird.f32 %v848_v61 }
  0x94   : > { %v852_v4 = vpop.eup %851  ;;  %v457_v6 = vmul.f32 %v844_v37, %v456_v62  ;;  %v365_v7 = vmul.f32 %v850_v63, %v995_v40  ;;  %853 = vrsqrt.f32 %v1032_v2  ;;  %vm371_vm2 = vweird.f32 %v850_v63  ;;  %vm558_vm15 = vmor %vm556_vm6, %vm557_vm12 }
  0x95   : > { %v359_v8 = vmul.f32 %v846_v44, %v358_v0  ;;  %v552_v9 = vmul.f32 %v848_v61, %v551_v1  ;;  %v463_v10 = vmul.f32 %v852_v4, %v1007_v46  ;;  %v1044_v11 = vpop.xlane.xlu1 %255  ;;  %v1055_v27 = vsel %vm568_vm13, %v989_v36, %v565_v5  ;;  %vm372_vm7 = vmor %vm370_vm8, %vm371_vm2 }
  0x96   : > { %v461_v12 = vsel %vm460_vm9, %v844_v37, %v457_v6  ;;  %v366_v13 = vmul.f32 %v850_v63, %v365_v7  ;;  %855 = vrsqrt.f32 %v1044_v11  ;;  %vm469_vm14 = vweird.f32 %v852_v4 }
  0x97   : > { %v472_v15 = vand.u32 2147483647, %v461_v12  ;;  %v363_v19 = vsel %vm362_vm11, %v846_v44, %v359_v8  ;;  %v553_v20 = vmul.f32 0.5, %v552_v9  ;;  %v464_v25 = vmul.f32 %v852_v4, %v463_v10  ;;  %vm470_vm4 = vmor %vm468_vm10, %vm469_vm14 }
  0x98   : > { %v374_v28 = vand.u32 2147483647, %v363_v19  ;;  %v367_v29 = vmul.f32 0.5, %v366_v13  ;;  %v571_v34 = vand.u32 2147483647, %v1055_v27  ;;  %vm273_vm5 = vweird.f32 %v1044_v11 }
  0x99   : > { %v554_v26 = vsub.f32 1.5, %v553_v20  ;;  %v465_v30 = vmul.f32 0.5, %v464_v25  ;;  %vm474_vm1 = vcmp.eq.f32.partialorder %v472_v15, inf  ;;  %vm263_vm6 = vweird.f32 %v1032_v2 }
  0x9a   : > { %v854_v31 = vpop.eup %853  ;;  %v368_v32 = vsub.f32 1.5, %v367_v29  ;;  %vm1058_vm3 = vcmp.eq.f32.partialorder %v374_v28, inf  ;;  %v476_v33 = vsel %vm474_vm1, 0.0, %v461_v12  ;;  %vm1081_vm11 = vcmp.eq.f32.partialorder %v571_v34, inf }
  0x9b   : > { %v555_v35 = vmul.f32 %v848_v61, %v554_v26  ;;  %v466_v36 = vsub.f32 1.5, %v465_v30  ;;  %v258_v37 = vmul.f32 %v854_v31, %v1032_v2  ;;  %v378_v41 = vsel %vm1058_vm3, 0.0, %v363_v19 }
  0x9c   : > { %v369_v38 = vmul.f32 %v850_v63, %v368_v32  ;;  %v500_v42 = vmul.f32 %v931_v18, %v476_v33  ;;  %v402_v45 = vmul.f32 %v925_v16, %v378_v41  ;;  %v856_v47 = vpop.eup %855  ;;  %vm264_vm9 = vweird.f32 %v854_v31 }
  0x9d   : > { %v559_v43 = vsel %vm558_vm15, %v848_v61, %v555_v35  ;;  %v467_v39 = vmul.f32 %v852_v4, %v466_v36  ;;  %v259_v44 = vmul.f32 %v854_v31, %v258_v37  ;;  %v268_v55 = vmul.f32 %v856_v47, %v1044_v11  ;;  %vm265_vm14 = vmor %vm263_vm6, %vm264_vm9 }
  0x9e   : > { %v570_v48 = vand.u32 2147483647, %v559_v43  ;;  %v373_v51 = vsel %vm372_vm7, %v850_v63, %v369_v38  ;;  %v502_v46 = vmul.f32 %v500_v42, %v1021_v57  ;;  %v404_v40 = vmul.f32 %v402_v45, %v1016_v54 }
  0x9f   : > { %v375_v52 = vand.u32 2147483647, %v373_v51  ;;  %v471_v53 = vsel %vm470_vm4, %v852_v4, %v467_v39  ;;  %v260_v56 = vmul.f32 0.5, %v259_v44  ;;  %v269_v16 = vmul.f32 %v856_v47, %v268_v55 }
  0xa0   : > { %v473_v18 = vand.u32 2147483647, %v471_v53  ;;  %806 = vmatmul.msk.f32.vlgmr.msra.gmra.mxu2 %vm250_vm0, %v502_v46  ;;  %vm572_vm8 = vcmp.eq.f32.partialorder %v570_v48, inf  ;;  %798 = vmatmul.msk.f32.vlgmr.msra.gmra.mxu1 %vm250_vm0, %v404_v40  ;;  %vm274_vm13 = vweird.f32 %v856_v47  ;;  %v575_v9 = vsel %vm1081_vm11, 0.0, %v1055_v27  ;;  %796 = vst.msk [vmem:[%s237_s5 + $0x10] sm:$0xff] %vm250_vm0, %v404_v40 }
  0xa1   : > { %vm377_vm10 = vcmp.eq.f32.partialorder %v375_v52, inf  ;;  %v574_v59 = vsel %vm572_vm8, 0.0, %v559_v43  ;;  %v261_v61 = vsub.f32 1.5, %v260_v56  ;;  %v270_v0 = vmul.f32 0.5, %v269_v16  ;;  %vm275_vm1 = vmor %vm273_vm5, %vm274_vm13  ;;  %804 = vst.msk [vmem:[%s237_s5 + $0x20] sm:$0xff] %vm250_vm0, %v502_v46 }
  0xa2   : > { %v379_v62 = vsel %vm377_vm10, 0.0, %v373_v51  ;;  %vm475_vm12 = vcmp.eq.f32.partialorder %v473_v18, inf  ;;  %v598_v63 = vmul.f32 %v943_v23, %v574_v59  ;;  %vm303_vm2 = vcmp.eq.f32.partialorder %v302_v14, inf }
  0xa3   : > { %v403_v1 = vmul.f32 %v928_v17, %v379_v62  ;;  %v477_v4 = vsel %vm475_vm12, 0.0, %v471_v53  ;;  %v262_v5 = vmul.f32 %v854_v31, %v261_v61  ;;  %v271_v8 = vsub.f32 1.5, %v270_v0 }
  0xa4   : > { %v501_v6 = vmul.f32 %v938_v21, %v477_v4  ;;  %v600_v7 = vmul.f32 %v598_v63, %v1023_v58  ;;  %v599_v12 = vmul.f32 %v946_v24, %v575_v9  ;;  %vm666_vm4 = vcmask 785408  }
  0xa5   : > { %v266_v23 = vsel %vm265_vm14, %v854_v31, %v262_v5  ;;  %v405_v2 = vmul.f32 %v403_v1, %v1016_v54  ;;  %v272_v10 = vmul.f32 %v856_v47, %v271_v8  ;;  %v304_v54 = vsel %vm303_vm2, 0.0, %v1034_v3 }
  0xa6   : > { %v503_v17 = vmul.f32 %v501_v6, %v1021_v57  ;;  %814 = vmatmul.msk.f32.vlgmr.msra.gmra.mxu3 %vm250_vm0, %v600_v7  ;;  %v277_v21 = vand.u32 2147483647, %v266_v23  ;;  %v601_v14 = vmul.f32 %v599_v12, %v1023_v58  ;;  %812 = vst.msk [vmem:[%s237_s5 + $0x30] sm:$0xff] %vm250_vm0, %v600_v7  ;;  %vm663_vm5 = vcmask 523264  }
  0xa7   : > { %v276_v13 = vsel %vm275_vm1, %v856_v47, %v272_v10  ;;  %797 = vst.msk [vmem:[%s237_s5 + $0x18] sm:$0xff] %vm250_vm0, %v405_v2 }
  0xa8   : > { %807 = vmatmul.msk.f32.gmra.mxu2 %vm250_vm0, %v503_v17  ;;  %vm279_vm3 = vcmp.eq.f32.partialorder %v277_v21, inf  ;;  %v278_v11 = vand.u32 2147483647, %v276_v13  ;;  %799 = vmatmul.msk.f32.gmra.mxu1 %vm250_vm0, %v405_v2  ;;  %805 = vst.msk [vmem:[%s237_s5 + $0x28] sm:$0xff] %vm250_vm0, %v503_v17 }
  0xa9   : > { %v281_v15 = vsel %vm279_vm3, 0.0, %v266_v23  ;;  %813 = vst.msk [vmem:[%s237_s5 + $0x38] sm:$0xff] %vm250_vm0, %v601_v14 }
  0xaa   : > { %v305_v57 = vmul.f32 %v281_v15, %v955_v49  ;;  %vm280_vm15 = vcmp.eq.f32.partialorder %v278_v11, inf }
  0xab   : > { %v282_v20 = vsel %vm280_vm15, 0.0, %v276_v13 }
  0xac   : > { %v307_v19 = vmul.f32 %v305_v57, %v304_v54  ;;  %v306_v24 = vmul.f32 %v282_v20, %v958_v50 }
  0xae   : > { %815 = vmatmul.msk.f32.gmra.mxu3 %vm250_vm0, %v601_v14  ;;  %309 = vst.msk [vmem:[%s237_s5] sm:$0xff] %vm250_vm0, %v307_v19  ;;  %790 = vmatmul.msk.f32.vlgmr.msra.gmra.mxu0 %vm250_vm0, %v307_v19  ;;  %v308_v49 = vmul.f32 %v306_v24, %v304_v54 }
  0xb0   : > { %310 = vst.msk [vmem:[%s237_s5 + $0x8] sm:$0xff] %vm250_vm0, %v308_v49 }
  0xb6   : > { %791 = vmatmul.msk.f32.gmra.mxu0 %vm250_vm0, %v308_v49  ;;  %vm660_vm0 = vcmask 261120  }
 0x11d   : > { %v432_v50 = vpop.f32.mrf.mxu1 }
 0x11e   : > { %v438_v58 = vmax.f32 %v432_v50, 0.0 }
 0x120   : > { %638 = vrot.lane.b32.xlu2 %v438_v58, %s865_s6 }
 0x123   : > { %v530_v3 = vpop.f32.mrf.mxu2 }
 0x124   : > { %v536_v25 = vmax.f32 %v530_v3, 0.0 }
 0x125   : > { %v435_v27 = vpop.f32.mrf.mxu1 }
 0x126   : > { %646 = vrot.lane.b32.xlu1 %v536_v25, %s866_s7  ;;  %v439_v28 = vmax.f32 %v435_v27, 0.0 }
 0x128   : > { %640 = vrot.lane.b32.xlu0 %v439_v28, %s865_s6 }
 0x129   : > { %v628_v29 = vpop.f32.mrf.mxu3 }
 0x12a   : > { %v634_v31 = vmax.f32 %v628_v29, 0.0 }
 0x12b   : > { %v533_v26 = vpop.f32.mrf.mxu2  ;;  %v334_v34 = vpop.f32.mrf.mxu0 }
 0x12c   : > { %v537_v30 = vmax.f32 %v533_v26, 0.0  ;;  %v340_v39 = vmax.f32 %v334_v34, 0.0 }
 0x12e   : > { %648 = vrot.lane.b32.xlu2 %v537_v30, %s866_s7 }
 0x130   : > { %654 = vrot.lane.b32.xlu0 %v634_v31, %s867_s8 }
 0x131   : > { %v631_v32 = vpop.f32.mrf.mxu3 }
 0x132   : > { %v635_v22 = vmax.f32 %v631_v32, 0.0 }
 0x133   : > { %v337_v36 = vpop.f32.mrf.mxu0 }
 0x134   : > { %v341_v37 = vmax.f32 %v337_v36, 0.0 }
 0x136   : > { %656 = vrot.lane.b32.xlu2 %v635_v22, %s867_s8 }
 0x17a   : > { %v639_v33 = vpop.permute.xlu2 %638 }
 0x17b   : > { %v661_v47 = vsel %vm660_vm0, %v340_v39, %v639_v33 }
 0x188   : > { %v649_v35 = vpop.permute.xlu2 %648 }
 0x190   : > { %v657_v42 = vpop.permute.xlu2 %656 }
 0x198   : > { %v647_v45 = vpop.permute.xlu1 %646 }
 0x199   : > { %v664_v48 = vsel %vm663_vm5, %v661_v47, %v647_v45 }
 0x19a   : > { %v641_v38 = vpop.permute.xlu0 %640 }
 0x19b   : > { %v662_v41 = vsel %vm660_vm0, %v341_v37, %v641_v38 }
 0x19c   : > { %v665_v43 = vsel %vm663_vm5, %v662_v41, %v649_v35 }
 0x19d   : > { %v668_v44 = vsel %vm666_vm4, %v665_v43, %v657_v42 }
 0x19e   : > { %670 = vst [vmem:[%s243_s12 + $0x8] sm:$0xff] %v668_v44 }
 0x1a2   : > { %v655_v51 = vpop.permute.xlu0 %654 }
 0x1a3   : > { %v667_v46 = vsel %vm666_vm4, %v664_v48, %v655_v51 }
 0x1a4   : > { %669 = vst [vmem:[%s243_s12] sm:$0xff] %v667_v46 }
 0x1a5 PF: > { %s15_s15 = sadd.s32 1, %s863_s15  }
 0x1a6   : > { %p12_p5 = scmp.ge.s32.totalorder %s15_s15, 4  }
 0x1a8   :  { %14 = sbr.rel (!%p12_p5) target bundleno = 1 (0x1), region = 86 }

// kernel: super_blt_graph_forward.3
= control target key start
LH: loop header
LB: loop body
LE: loop exit
PB: predicated region body
PF: predicated region fallthrough
CT: control target
= control target key end

     0   :  { %s1982_s18 = smov 0   ;;  %s2505_s0 = inlined_call_operand.vmem [shape: f32[32,16], index: 0, kind: input, shape index: {}]   ;;  %s2506_s1 = inlined_call_operand.vmem [shape: f32[8,16,16], index: 1, kind: input, shape index: {}]   ;;  %s2507_s2 = inlined_call_operand.vmem [shape: f32[2,16,128], index: 2, kind: input, shape index: {}]   ;;  %s2508_s3 = inlined_call_operand.vmem [shape: f32[32,16], index: 3, kind: input, shape index: {}]   ;;  %s2509_s4 = inlined_call_operand.vmem [shape: f32[16,32], index: 4, kind: input, shape index: {}]   ;;  %s2510_s5 = inlined_call_operand.vmem [shape: f32[2,32,128], index: 5, kind: output, shape index: {}]  }
   0x1 LB: > { %s1727_s19 = sadd.s32 4294967295, %s1947_s18   ;;  %p1731_p0 = scmp.ge.s32.totalorder %s1947_s18, 1  ;;  %s1947_s18 = sphi %s1982_s18, %s15_s18  }
   0x2   : > { %p199_p1 = scmp.lt.s32.totalorder %s1947_s18, 3 }
   0x4   : > { %p200_p2 = pnand %p1731_p0, %p199_p1 }
   0x5   : > { %s1732_s20 = sshll.u32 (!%p200_p2), %s1727_s19, 2  ;;  %p240_p3 = scmp.lt.s32.totalorder (!%p200_p2), %s1727_s19, 1 }
   0x6   : > { %203 = sbr.rel (%p200_p2) target bundleno = 2809 (0xaf9), region = 40  ;;  %p234_p4 = scmp.lt.s32.totalorder (!%p200_p2), %s1732_s20, 7 }
   0x7   : > { %s1950_s27 = smov (!%p200_p2), 32   ;;  %s1951_s29 = smov (!%p200_p2), 64  }
   0xb   : > { %s2520_s19 = smov (!%p240_p3, %s1727_s19), 1  ;;  %s2522_s20 = smov (!%p234_p4, %s1732_s20), 7  ;;  %v2009_v3 = vld [vmem:[%s2505_s0] sm:$0xff]  ;;  %vm275_vm0 = vcmask 130048   ;;  %v2016_v4 = vld [vmem:[%s2505_s0 + $0x8] sm:$0xff]  ;;  %v2023_v5 = vld [vmem:[%s2505_s0 + $0x10] sm:$0xff]  ;;  %v262_v14 = vlaneseq }
   0xc   : > { %s1876_s21 = sshll.u32 %s2520_s19, 4  ;;  %s1875_s22 = sshll.u32 %s2522_s20, 4  ;;  %v2030_v6 = vld [vmem:[%s2505_s0 + $0x18] sm:$0xff]  ;;  %vm366_vm2 = vcmask 261120   ;;  %v2062_v28 = vld [vmem:[%s2508_s3 + $0x10] sm:$0xff]  ;;  %v2109_v36 = vld [vmem:[%s2508_s3 + $0x8] sm:$0xff] }
   0xd   : > { %s244_s25 = scalar_lea.vmem %s2507_s2, %s1876_s21  ;;  %s1999_s28 = scalar_lea.vmem %s2506_s1, %s1875_s22  ;;  %v263_v16 = vshrl.u32 %v262_v14, 7  ;;  %v268_v18 = vand.u32 127, %v262_v14  ;;  %v2049_v25 = vld [vmem:[%s2508_s3 + $0x18] sm:$0xff]  ;;  %v2115_v37 = vld [vmem:[%s2508_s3] sm:$0xff]  ;;  %vm1651_vm6 = vcmask 785408   ;;  %vm1646_vm7 = vcmask 523264  }
   0xe   : > { %v2001_v0 = vld [vmem:[%s244_s25 + $0x8] sm:$0xff]  ;;  %v273_v2 = vld [vmem:[%s1999_s28] sm:$0xff]  ;;  %440 = vmatpush.msra.mxu3 %v2049_v25  ;;  %v1772_v38 = vld [vmem:[%s1999_s28 + $0x18] sm:$0xff]  ;;  %s1949_s22 = smov 96  }
   0xf   : > { %v274_v1 = vld [vmem:[%s1999_s28 + $0x8] sm:$0xff]  ;;  %343 = vmatpush.msra.mxu1 %v2001_v0  ;;  %v260_v7 = vld [vmem:[%s244_s25] sm:$0xff]  ;;  %v266_v17 = vadd.s32 24, %v263_v16  ;;  %v265_v19 = vadd.s32 16, %v263_v16  ;;  %v264_v26 = vadd.s32 8, %v263_v16  ;;  %vm2082_vm5 = vcmp.eq.s32.totalorder %v263_v16, %v268_v18  ;;  %v1771_v39 = vld [vmem:[%s1999_s28 + $0x10] sm:$0xff] }
  0x10   : > { %302 = vmatpush.msra.mxu0 %v274_v1  ;;  %441 = vmatpush.msra.mxu3 %v2062_v28  ;;  %v2121_v40 = vpack.i.bf16 %v260_v7, %v2001_v0  ;;  %v2160_v0 = vld [vmem:[%s2509_s4 + $0x8] sm:$0xff]  ;;  %v2167_v1 = vld [vmem:[%s2509_s4] sm:$0xff] }
  0x11   : > { %344 = vmatpush.msra.mxu1 %v260_v7  ;;  %vm2038_vm1 = vcmp.eq.s32.totalorder %v266_v17, %v268_v18  ;;  %vm2051_vm3 = vcmp.eq.s32.totalorder %v265_v19, %v268_v18  ;;  %vm2070_vm4 = vcmp.eq.s32.totalorder %v264_v26, %v268_v18 }
  0x12   : > { %303 = vmatpush.msra.mxu0 %v273_v2  ;;  %442 = vmatpush.msra.mxu3 %v2109_v36 }
  0x13   : > { %1739 = vmatmul.msk.f32.vlgmr.msra.gmra.mxu0 %vm275_vm0, %v2009_v3  ;;  %1895 = vrot.lane.b32.xlu0 %v2121_v40, %s1949_s22 }
  0x14   : > { %443 = vmatpush.msra.mxu3 %v2115_v37  ;;  %516 = vmatpush.msrb.mxu1 %v2160_v0 }
  0x15   : > { %1905 = vrot.lane.b32.xlu1 %v2121_v40, %s1950_s27 }
  0x16   : > { %517 = vmatpush.msrb.mxu1 %v2167_v1 }
  0x1b   : > { %1740 = vmatmul.msk.f32.gmra.mxu0 %vm275_vm0, %v2016_v4  ;;  %1900 = vrot.lane.b32.xlu0 %v2121_v40, %s1951_s29 }
  0x23   : > { %1741 = vmatmul.msk.f32.gmra.mxu0 %vm275_vm0, %v2023_v5 }
  0x2b   : > { %1742 = vmatmul.msk.f32.gmra.mxu0 %vm275_vm0, %v2030_v6 }
  0x85   : > { %v1896_v57 = vpop.permute.xlu0 %1895 }
  0x86   : > { %v1897_v58 = vunpack.i.l.bf16 %v1896_v57  ;;  %v1898_v59 = vunpack.i.h.bf16 %v1896_v57 }
  0x90   : > { %v305_v8 = vpop.f32.mrf.mxu0 }
  0x91   : > { %1743 = vmatmul.msk.f32.vlgmr.msra.gmra.mxu1 %vm275_vm0, %v305_v8 }
  0x98   : > { %v308_v9 = vpop.f32.mrf.mxu0 }
  0x99   : > { %1744 = vmatmul.msk.f32.gmra.mxu1 %vm275_vm0, %v308_v9 }
  0xa0   : > { %v311_v10 = vpop.f32.mrf.mxu0 }
  0xa1   : > { %1745 = vmatmul.msk.f32.gmra.mxu1 %vm275_vm0, %v311_v10 }
  0xa8   : > { %v314_v11 = vpop.f32.mrf.mxu0 }
  0xa9   : > { %1746 = vmatmul.msk.f32.gmra.mxu1 %vm275_vm0, %v314_v11 }
 0x10e   : > { %v346_v12 = vpop.f32.mrf.mxu1 }
 0x10f   : > { %v358_v32 = vand.u32 2147483647, %v346_v12 }
 0x111   : > { %v2092_v35 = vsel %vm2082_vm5, 1.0, %v358_v32 }
 0x116   : > { %v349_v13 = vpop.f32.mrf.mxu1 }
 0x117   : > { %v359_v29 = vand.u32 2147483647, %v349_v13 }
 0x119   : > { %v2080_v33 = vsel %vm2070_vm4, 1.0, %v359_v29 }
 0x11e   : > { %v352_v15 = vpop.f32.mrf.mxu1 }
 0x11f   : > { %v360_v23 = vand.u32 2147483647, %v352_v15 }
 0x121   : > { %v2067_v30 = vsel %vm2051_vm3, 1.0, %v360_v23 }
 0x126   : > { %v355_v21 = vpop.f32.mrf.mxu1 }
 0x127   : > { %v361_v22 = vand.u32 2147483647, %v355_v21 }
 0x129   : > { %v2044_v24 = vsel %vm2038_vm1, 1.0, %v361_v22 }
 0x12a   : > { %1747 = vmatpush.xpose.msk.msrb.mxu0 %vm366_vm2, %v2044_v24  ;;  %1878 = vmatpush.xpose.msk.msra.mxu2 %vm366_vm2, %v2044_v24 }
 0x12e   : > { %1748 = vmatpush.xpose.msk.msrb.mxu0 %vm366_vm2, %v2067_v30  ;;  %1879 = vmatpush.xpose.msk.msra.mxu2 %vm366_vm2, %v2067_v30 }
 0x132   : > { %1749 = vmatpush.xpose.msk.msrb.mxu0 %vm366_vm2, %v2080_v33  ;;  %1880 = vmatpush.xpose.msk.msra.mxu2 %vm366_vm2, %v2080_v33 }
 0x136   : > { %1750 = vmatpush.xpose.msk.msrb.mxu0 %vm366_vm2, %v2092_v35  ;;  %1881 = vmatpush.xpose.msk.msra.mxu2 %vm366_vm2, %v2092_v35 }
 0x139   : > { %1751 = vmatmul.msk.f32.vlgmr.msrb.gmra.mxu0 %vm366_vm2, %v2092_v35  ;;  %1752 = vmatmul.msk.f32.vlgmr.msra.gmra.mxu2 %vm366_vm2, %v2080_v33 }
 0x13a   : > { %625 = vmatpush.msrb.mxu2 %v1772_v38 }
 0x13c   : > { %626 = vmatpush.msrb.mxu2 %v1771_v39 }
 0x141   : > { %1753 = vmatmul.msk.f32.gmra.mxu2 %vm366_vm2, %v2067_v30 }
 0x149   : > { %1754 = vmatmul.msk.f32.gmra.mxu2 %vm366_vm2, %v2044_v24 }
 0x151   : > { %1773 = vmatmul.msk.f32.vlgmr.msrb.gmra.mxu2 %vm275_vm0, %v2009_v3 }
 0x159   : > { %1774 = vmatmul.msk.f32.gmra.mxu2 %vm275_vm0, %v2016_v4 }
 0x161   : > { %1775 = vmatmul.msk.f32.gmra.mxu2 %vm275_vm0, %v2023_v5 }
 0x169   : > { %1776 = vmatmul.msk.f32.gmra.mxu2 %vm275_vm0, %v2030_v6 }
 0x1b6   : > { %v396_v41 = vpop.f32.mrf.mxu0 }
 0x1b7   : > { %v408_v42 = vsel %vm2082_vm5, 1.0, %v396_v41 }
 0x1b8   : > { %v412_v43 = vand.u32 2147483647, %v408_v42 }
 0x1ba   : > { %1755 = vmatmul.msk.f32.vlgmr.msra.gmra.mxu3 %vm366_vm2, %v412_v43  ;;  %v1806_v43 = vld [vmem:[%s1999_s28 + $0x28] sm:$0xff] }
 0x1bc   : > { %v399_v44 = vpop.f32.mrf.mxu2 }
 0x1bd   : > { %v409_v45 = vsel %vm2070_vm4, 1.0, %v399_v44  ;;  %v1805_v44 = vld [vmem:[%s1999_s28 + $0x20] sm:$0xff] }
 0x1be   : > { %v413_v46 = vand.u32 2147483647, %v409_v45 }
 0x1c2   : > { %1756 = vmatmul.msk.f32.gmra.mxu3 %vm366_vm2, %v413_v46 }
 0x1c4   : > { %v402_v47 = vpop.f32.mrf.mxu2 }
 0x1c5   : > { %v410_v48 = vsel %vm2051_vm3, 1.0, %v402_v47 }
 0x1c6   : > { %v414_v49 = vand.u32 2147483647, %v410_v48 }
 0x1ca   : > { %1757 = vmatmul.msk.f32.gmra.mxu3 %vm366_vm2, %v414_v49 }
 0x1cc   : > { %v405_v50 = vpop.f32.mrf.mxu2 }
 0x1cd   : > { %v411_v51 = vsel %vm2038_vm1, 1.0, %v405_v50 }
 0x1ce   : > { %v415_v52 = vand.u32 2147483647, %v411_v51 }
 0x1d2   : > { %1758 = vmatmul.msk.f32.gmra.mxu3 %vm366_vm2, %v415_v52 }
 0x1d4   : > { %v628_v60 = vpop.f32.mrf.mxu2 }
 0x1dc   : > { %v631_v61 = vpop.f32.mrf.mxu2 }
 0x1e4   : > { %v634_v62 = vpop.f32.mrf.mxu2 }
 0x1ec   : > { %v637_v63 = vpop.f32.mrf.mxu2 }
 0x23d   : > { %v445_v53 = vpop.f32.mrf.mxu3 }
 0x245   : > { %v448_v54 = vpop.f32.mrf.mxu3 }
 0x24d   : > { %v451_v55 = vpop.f32.mrf.mxu3 }
 0x255   : > { %v454_v56 = vpop.f32.mrf.mxu3 }
 0x256   : > { %469 = vmatpush.msra.mxu0 %v454_v56 }
 0x258   : > { %470 = vmatpush.msra.mxu0 %v451_v55 }
 0x25a   : > { %471 = vmatpush.msra.mxu0 %v448_v54 }
 0x25c   : > { %472 = vmatpush.msra.mxu0 %v445_v53 }
 0x25d   : > { %1759 = vmatmul.msk.f32.vlgmr.msra.gmra.mxu0 %vm366_vm2, %v2092_v35 }
 0x25e   : > { %674 = vmatpush.msrb.mxu0 %v1897_v58 }
 0x260   : > { %675 = vmatpush.msrb.mxu0 %v1898_v59 }
 0x262   : > { %846 = vmatpush.msra.mxu0 %v2160_v0 }
 0x264   : > { %847 = vmatpush.msra.mxu0 %v2167_v1 }
 0x265   : > { %1760 = vmatmul.msk.f32.gmra.mxu0 %vm366_vm2, %v2080_v33 }
 0x26d   : > { %1761 = vmatmul.msk.f32.gmra.mxu0 %vm366_vm2, %v2067_v30 }
 0x275   : > { %1762 = vmatmul.msk.f32.gmra.mxu0 %vm366_vm2, %v2044_v24 }
 0x27d   : > { %1777 = vmatmul.msk.f32.vlgmr.msrb.gmra.mxu0 %vm275_vm0, %v628_v60 }
 0x285   : > { %1778 = vmatmul.msk.f32.gmra.mxu0 %vm275_vm0, %v631_v61 }
 0x28d   : > { %1779 = vmatmul.msk.f32.gmra.mxu0 %vm275_vm0, %v634_v62 }
 0x295   : > { %1780 = vmatmul.msk.f32.gmra.mxu0 %vm275_vm0, %v637_v63 }
 0x2da   : > { %v474_v2 = vpop.f32.mrf.mxu0 }
 0x2db   : > { %v486_v7 = vmax.f32 %v474_v2, 0.0  ;;  %v1901_v2 = vpop.permute.xlu0 %1900 }
 0x2dd   : > { %1763 = vmatmul.msk.f32.vlgmr.msrb.gmra.mxu1 %vm275_vm0, %v486_v7  ;;  %v1902_v7 = vunpack.i.l.bf16 %v1901_v2 }
 0x2e2   : > { %v477_v8 = vpop.f32.mrf.mxu0 }
 0x2e3   : > { %v487_v9 = vmax.f32 %v477_v8, 0.0  ;;  %v1903_v8 = vunpack.i.h.bf16 %v1901_v2 }
 0x2e5   : > { %1764 = vmatmul.msk.f32.gmra.mxu1 %vm275_vm0, %v487_v9 }
 0x2ea   : > { %v480_v10 = vpop.f32.mrf.mxu0 }
 0x2eb   : > { %v488_v11 = vmax.f32 %v480_v10, 0.0 }
 0x2ed   : > { %1765 = vmatmul.msk.f32.gmra.mxu1 %vm275_vm0, %v488_v11 }
 0x2f2   : > { %v483_v12 = vpop.f32.mrf.mxu0 }
 0x2f3   : > { %v489_v13 = vmax.f32 %v483_v12, 0.0 }
 0x2f5   : > { %1766 = vmatmul.msk.f32.gmra.mxu1 %vm275_vm0, %v489_v13 }
 0x2fa   : > { %v677_v14 = vpop.f32.mrf.mxu0 }
 0x2fb   : > { %v689_v26 = vand.u32 2147483647, %v677_v14 }
 0x2fd   : > { %v2195_v32 = vsel %vm2082_vm5, 1.0, %v689_v26 }
 0x302   : > { %v680_v15 = vpop.f32.mrf.mxu0 }
 0x303   : > { %v690_v22 = vand.u32 2147483647, %v680_v15 }
 0x305   : > { %v2189_v29 = vsel %vm2070_vm4, 1.0, %v690_v22 }
 0x30a   : > { %v683_v16 = vpop.f32.mrf.mxu0 }
 0x30b   : > { %v691_v19 = vand.u32 2147483647, %v683_v16 }
 0x30d   : > { %v2183_v23 = vsel %vm2051_vm3, 1.0, %v691_v19 }
 0x312   : > { %v686_v17 = vpop.f32.mrf.mxu0 }
 0x313   : > { %v692_v18 = vand.u32 2147483647, %v686_v17 }
 0x315   : > { %v2177_v21 = vsel %vm2038_vm1, 1.0, %v692_v18 }
 0x316   : > { %1781 = vmatpush.xpose.msk.msra.mxu1 %vm366_vm2, %v2177_v21 }
 0x31a   : > { %1782 = vmatpush.xpose.msk.msra.mxu1 %vm366_vm2, %v2183_v23 }
 0x31e   : > { %1783 = vmatpush.xpose.msk.msra.mxu1 %vm366_vm2, %v2189_v29 }
 0x322   : > { %1784 = vmatpush.xpose.msk.msra.mxu1 %vm366_vm2, %v2195_v32 }
 0x325   : > { %1785 = vmatmul.msk.f32.vlgmr.msra.gmra.mxu1 %vm366_vm2, %v2195_v32 }
 0x32d   : > { %1786 = vmatmul.msk.f32.gmra.mxu1 %vm366_vm2, %v2189_v29 }
 0x335   : > { %1787 = vmatmul.msk.f32.gmra.mxu1 %vm366_vm2, %v2183_v23 }
 0x33d   : > { %1788 = vmatmul.msk.f32.gmra.mxu1 %vm366_vm2, %v2177_v21 }
 0x35a   : > { %v519_v38 = vpop.f32.mrf.mxu1 }
 0x362   : > { %v522_v39 = vpop.f32.mrf.mxu1 }
 0x36a   : > { %v525_v41 = vpop.f32.mrf.mxu1 }
 0x372   : > { %v528_v42 = vpop.f32.mrf.mxu1 }
 0x373   : > { %543 = vmatpush.msrb.mxu3 %v528_v42 }
 0x375   : > { %544 = vmatpush.msrb.mxu3 %v525_v41 }
 0x377   : > { %545 = vmatpush.msrb.mxu3 %v522_v39 }
 0x379   : > { %546 = vmatpush.msrb.mxu3 %v519_v38 }
 0x37a   : > { %1767 = vmatmul.msk.f32.vlgmr.msrb.gmra.mxu3 %vm366_vm2, %v2092_v35 }
 0x37b   : > { %770 = vmatpush.msra.mxu3 %v2049_v25 }
 0x37d   : > { %771 = vmatpush.msra.mxu3 %v2062_v28 }
 0x37f   : > { %772 = vmatpush.msra.mxu3 %v2109_v36 }
 0x381   : > { %773 = vmatpush.msra.mxu3 %v2115_v37 }
 0x382   : > { %1768 = vmatmul.msk.f32.gmra.mxu3 %vm366_vm2, %v2080_v33 }
 0x383   : > { %955 = vmatpush.msrb.mxu3 %v1806_v43 }
 0x385   : > { %956 = vmatpush.msrb.mxu3 %v1805_v44 }
 0x38a   : > { %1769 = vmatmul.msk.f32.gmra.mxu3 %vm366_vm2, %v2067_v30 }
 0x392   : > { %1770 = vmatmul.msk.f32.gmra.mxu3 %vm366_vm2, %v2044_v24 }
 0x3a2   : > { %v726_v35 = vpop.f32.mrf.mxu1 }
 0x3a3   : > { %v738_v45 = vsel %vm2082_vm5, 1.0, %v726_v35 }
 0x3a4   : > { %v742_v46 = vand.u32 2147483647, %v738_v45 }
 0x3a6   : > { %1789 = vmatmul.msk.f32.vlgmr.msra.gmra.mxu3 %vm366_vm2, %v742_v46 }
 0x3aa   : > { %v729_v24 = vpop.f32.mrf.mxu1 }
 0x3ab   : > { %v739_v30 = vsel %vm2070_vm4, 1.0, %v729_v24 }
 0x3ac   : > { %v743_v33 = vand.u32 2147483647, %v739_v30 }
 0x3ae   : > { %1790 = vmatmul.msk.f32.gmra.mxu3 %vm366_vm2, %v743_v33 }
 0x3b2   : > { %v732_v47 = vpop.f32.mrf.mxu1 }
 0x3b3   : > { %v740_v48 = vsel %vm2051_vm3, 1.0, %v732_v47 }
 0x3b4   : > { %v744_v49 = vand.u32 2147483647, %v740_v48 }
 0x3b6   : > { %1791 = vmatmul.msk.f32.gmra.mxu3 %vm366_vm2, %v744_v49 }
 0x3ba   : > { %v735_v50 = vpop.f32.mrf.mxu1 }
 0x3bb   : > { %v741_v51 = vsel %vm2038_vm1, 1.0, %v735_v50  ;;  %v1840_v50 = vld [vmem:[%s1999_s28 + $0x38] sm:$0xff] }
 0x3bc   : > { %v745_v52 = vand.u32 2147483647, %v741_v51  ;;  %v1839_v51 = vld [vmem:[%s1999_s28 + $0x30] sm:$0xff]  ;;  %s1877_s28 = sshll.u32 %s2520_s19, 5 }
 0x3bd   : > { %s249_s7 = scalar_lea.vmem %s2510_s5, %s1877_s28 }
 0x3be   : > { %1792 = vmatmul.msk.f32.gmra.mxu3 %vm366_vm2, %v745_v52 }
 0x3c6   : > { %1807 = vmatmul.msk.f32.vlgmr.msrb.gmra.mxu3 %vm275_vm0, %v2009_v3 }
 0x3ce   : > { %1808 = vmatmul.msk.f32.gmra.mxu3 %vm275_vm0, %v2016_v4 }
 0x3d6   : > { %1809 = vmatmul.msk.f32.gmra.mxu3 %vm275_vm0, %v2023_v5 }
 0x3de   : > { %1810 = vmatmul.msk.f32.gmra.mxu3 %vm275_vm0, %v2030_v6 }
 0x3fd   : > { %v548_v40 = vpop.f32.mrf.mxu3 }
 0x3fe   : > { %1909 = vtanh.f32 %v548_v40 }
 0x404   : > { %v2245_v53 = vpop.eup %1909 }
 0x405   : > { %564 = vxpose.xlu1.b32.start [1/4] (short) (narrow) %v2245_v53, 32  ;;  %v551_v54 = vpop.f32.mrf.mxu3 }
 0x406   : > { %1911 = vtanh.f32 %v551_v54 }
 0x40c   : > { %v2248_v55 = vpop.eup %1911 }
 0x40d   : > { %565 = vxpose.xlu1.b32.cont [2/4] (short) (narrow) %v2248_v55, 32  ;;  %v554_v56 = vpop.f32.mrf.mxu3 }
 0x40e   : > { %1913 = vtanh.f32 %v554_v56 }
 0x414   : > { %v2251_v57 = vpop.eup %1913 }
 0x415   : > { %566 = vxpose.xlu1.b32.cont [3/4] (short) (narrow) %v2251_v57, 32  ;;  %v557_v58 = vpop.f32.mrf.mxu3 }
 0x416   : > { %1915 = vtanh.f32 %v557_v58 }
 0x41c   : > { %v2254_v59 = vpop.eup %1915 }
 0x41d   : > { %567 = vxpose.xlu1.b32.end [4/4] (short) (narrow) %v2254_v59, 32 }
 0x429   : > { %v775_v60 = vpop.f32.mrf.mxu3 }
 0x431   : > { %v778_v61 = vpop.f32.mrf.mxu3 }
 0x439   : > { %v781_v62 = vpop.f32.mrf.mxu3 }
 0x441   : > { %v784_v63 = vpop.f32.mrf.mxu3 }
 0x442   : > { %799 = vmatpush.msra.mxu2 %v784_v63 }
 0x444   : > { %800 = vmatpush.msra.mxu2 %v781_v62 }
 0x446   : > { %801 = vmatpush.msra.mxu2 %v778_v61 }
 0x448   : > { %802 = vmatpush.msra.mxu2 %v775_v60 }
 0x449   : > { %1793 = vmatmul.msk.f32.vlgmr.msra.gmra.mxu2 %vm366_vm2, %v2195_v32  ;;  %v958_v9 = vpop.f32.mrf.mxu3 }
 0x44a   : > { %1002 = vmatpush.msrb.mxu2 %v1902_v7 }
 0x44c   : > { %1003 = vmatpush.msrb.mxu2 %v1903_v8 }
 0x44e   : > { %1174 = vmatpush.msra.mxu2 %v2160_v0 }
 0x450   : > { %1175 = vmatpush.msra.mxu2 %v2167_v1 }
 0x451   : > { %1794 = vmatmul.msk.f32.gmra.mxu2 %vm366_vm2, %v2189_v29  ;;  %v961_v10 = vpop.f32.mrf.mxu3 }
 0x459   : > { %1795 = vmatmul.msk.f32.gmra.mxu2 %vm366_vm2, %v2183_v23  ;;  %v964_v11 = vpop.f32.mrf.mxu3 }
 0x461   : > { %1796 = vmatmul.msk.f32.gmra.mxu2 %vm366_vm2, %v2177_v21  ;;  %v967_v12 = vpop.f32.mrf.mxu3 }
 0x469   : > { %1811 = vmatmul.msk.f32.vlgmr.msrb.gmra.mxu2 %vm275_vm0, %v958_v9 }
 0x471   : > { %1812 = vmatmul.msk.f32.gmra.mxu2 %vm275_vm0, %v961_v10 }
 0x479   : > { %1813 = vmatmul.msk.f32.gmra.mxu2 %vm275_vm0, %v964_v11 }
 0x481   : > { %1814 = vmatmul.msk.f32.gmra.mxu2 %vm275_vm0, %v967_v12 }
 0x4cc   : > { %v804_v13 = vpop.f32.mrf.mxu2 }
 0x4cd   : > { %v816_v14 = vmax.f32 %v804_v13, 0.0  ;;  %v1906_v13 = vpop.permute.xlu1 %1905 }
 0x4cf   : > { %1797 = vmatmul.msk.f32.vlgmr.msra.gmra.mxu0 %vm275_vm0, %v816_v14  ;;  %v1907_v14 = vunpack.i.l.bf16 %v1906_v13 }
 0x4d4   : > { %v807_v15 = vpop.f32.mrf.mxu2 }
 0x4d5   : > { %v817_v16 = vmax.f32 %v807_v15, 0.0  ;;  %v1908_v15 = vunpack.i.h.bf16 %v1906_v13 }
 0x4d7   : > { %1798 = vmatmul.msk.f32.gmra.mxu0 %vm275_vm0, %v817_v16 }
 0x4dc   : > { %v810_v17 = vpop.f32.mrf.mxu2 }
 0x4dd   : > { %v818_v18 = vmax.f32 %v810_v17, 0.0 }
 0x4df   : > { %1799 = vmatmul.msk.f32.gmra.mxu0 %vm275_vm0, %v818_v18 }
 0x4e4   : > { %v813_v19 = vpop.f32.mrf.mxu2 }
 0x4e5   : > { %v819_v22 = vmax.f32 %v813_v19, 0.0 }
 0x4e7   : > { %1800 = vmatmul.msk.f32.gmra.mxu0 %vm275_vm0, %v819_v22 }
 0x4ec   : > { %v1005_v26 = vpop.f32.mrf.mxu2 }
 0x4ed   : > { %v1017_v46 = vand.u32 2147483647, %v1005_v26 }
 0x4ef   : > { %v2295_v30 = vsel %vm2082_vm5, 1.0, %v1017_v46 }
 0x4f4   : > { %v1008_v38 = vpop.f32.mrf.mxu2 }
 0x4f5   : > { %v1018_v35 = vand.u32 2147483647, %v1008_v38 }
 0x4f7   : > { %v2289_v24 = vsel %vm2070_vm4, 1.0, %v1018_v35 }
 0x4fc   : > { %v1011_v39 = vpop.f32.mrf.mxu2 }
 0x4fd   : > { %v1019_v43 = vand.u32 2147483647, %v1011_v39 }
 0x4ff   : > { %v2283_v45 = vsel %vm2051_vm3, 1.0, %v1019_v43 }
 0x504   : > { %v1014_v41 = vpop.f32.mrf.mxu2 }
 0x505   : > { %v1020_v42 = vand.u32 2147483647, %v1014_v41 }
 0x507   : > { %v2277_v44 = vsel %vm2038_vm1, 1.0, %v1020_v42 }
 0x508   : > { %1815 = vmatpush.xpose.msk.msrb.mxu0 %vm366_vm2, %v2277_v44 }
 0x50c   : > { %1816 = vmatpush.xpose.msk.msrb.mxu0 %vm366_vm2, %v2283_v45 }
 0x510   : > { %1817 = vmatpush.xpose.msk.msrb.mxu0 %vm366_vm2, %v2289_v24 }
 0x514   : > { %1818 = vmatpush.xpose.msk.msrb.mxu0 %vm366_vm2, %v2295_v30 }
 0x517   : > { %1819 = vmatmul.msk.f32.vlgmr.msrb.gmra.mxu0 %vm366_vm2, %v2295_v30 }
 0x51f   : > { %1820 = vmatmul.msk.f32.gmra.mxu0 %vm366_vm2, %v2289_v24 }
 0x527   : > { %1821 = vmatmul.msk.f32.gmra.mxu0 %vm366_vm2, %v2283_v45 }
 0x52f   : > { %1822 = vmatmul.msk.f32.gmra.mxu0 %vm366_vm2, %v2277_v44 }
 0x54c   : > { %v849_v33 = vpop.f32.mrf.mxu0 }
 0x554   : > { %v852_v47 = vpop.f32.mrf.mxu0 }
 0x55c   : > { %v855_v48 = vpop.f32.mrf.mxu0 }
 0x564   : > { %v858_v49 = vpop.f32.mrf.mxu0 }
 0x565   : > { %873 = vmatpush.msrb.mxu1 %v858_v49 }
 0x567   : > { %874 = vmatpush.msrb.mxu1 %v855_v48 }
 0x569   : > { %875 = vmatpush.msrb.mxu1 %v852_v47 }
 0x56b   : > { %876 = vmatpush.msrb.mxu1 %v849_v33 }
 0x56c   : > { %1801 = vmatmul.msk.f32.vlgmr.msrb.gmra.mxu1 %vm366_vm2, %v2195_v32 }
 0x56d   : > { %1098 = vmatpush.msra.mxu1 %v2049_v25 }
 0x56f   : > { %1099 = vmatpush.msra.mxu1 %v2062_v28 }
 0x571   : > { %1100 = vmatpush.msra.mxu1 %v2109_v36 }
 0x573   : > { %1101 = vmatpush.msra.mxu1 %v2115_v37 }
 0x574   : > { %1802 = vmatmul.msk.f32.gmra.mxu1 %vm366_vm2, %v2189_v29 }
 0x575   : > { %1283 = vmatpush.msrb.mxu1 %v1840_v50 }
 0x577   : > { %1284 = vmatpush.msrb.mxu1 %v1839_v51 }
 0x57c   : > { %1803 = vmatmul.msk.f32.gmra.mxu1 %vm366_vm2, %v2183_v23 }
 0x584   : > { %1804 = vmatmul.msk.f32.gmra.mxu1 %vm366_vm2, %v2177_v21 }
 0x594   : > { %v1054_v32 = vpop.f32.mrf.mxu0 }
 0x595   : > { %v1066_v52 = vsel %vm2082_vm5, 1.0, %v1054_v32 }
 0x596   : > { %v1070_v40 = vand.u32 2147483647, %v1066_v52 }
 0x598   : > { %1823 = vmatmul.msk.f32.vlgmr.msra.gmra.mxu1 %vm366_vm2, %v1070_v40 }
 0x59c   : > { %v1057_v54 = vpop.f32.mrf.mxu0 }
 0x59d   : > { %v1067_v29 = vsel %vm2070_vm4, 1.0, %v1057_v54 }
 0x59e   : > { %v1071_v56 = vand.u32 2147483647, %v1067_v29 }
 0x5a0   : > { %1824 = vmatmul.msk.f32.gmra.mxu1 %vm366_vm2, %v1071_v56 }
 0x5a4   : > { %v1060_v23 = vpop.f32.mrf.mxu0 }
 0x5a5   : > { %v1068_v21 = vsel %vm2051_vm3, 1.0, %v1060_v23 }
 0x5a6   : > { %v1072_v58 = vand.u32 2147483647, %v1068_v21 }
 0x5a8   : > { %1825 = vmatmul.msk.f32.gmra.mxu1 %vm366_vm2, %v1072_v58 }
 0x5ac   : > { %v1063_v60 = vpop.f32.mrf.mxu0 }
 0x5ad   : > { %v1069_v61 = vsel %vm2038_vm1, 1.0, %v1063_v60 }
 0x5ae   : > { %v1073_v62 = vand.u32 2147483647, %v1069_v61 }
 0x5b0   : > { %1826 = vmatmul.msk.f32.gmra.mxu1 %vm366_vm2, %v1073_v62 }
 0x5b8   : > { %1841 = vmatmul.msk.f32.vlgmr.msrb.gmra.mxu1 %vm275_vm0, %v2009_v3 }
 0x5c0   : > { %1842 = vmatmul.msk.f32.gmra.mxu1 %vm275_vm0, %v2016_v4 }
 0x5c8   : > { %1843 = vmatmul.msk.f32.gmra.mxu1 %vm275_vm0, %v2023_v5 }
 0x5d0   : > { %1844 = vmatmul.msk.f32.gmra.mxu1 %vm275_vm0, %v2030_v6 }
 0x5e9   : > { %v878_v63 = vpop.f32.mrf.mxu1 }
 0x5ea   : > { %1917 = vtanh.f32 %v878_v63 }
 0x5f0   : > { %v1918_v2 = vpop.eup %1917 }
 0x5f1   : > { %894 = vxpose.xlu2.b32.start [1/4] (short) (narrow) %v1918_v2, 32  ;;  %v881_v7 = vpop.f32.mrf.mxu1 }
 0x5f2   : > { %1919 = vtanh.f32 %v881_v7 }
 0x5f8   : > { %v1920_v8 = vpop.eup %1919 }
 0x5f9   : > { %895 = vxpose.xlu2.b32.cont [2/4] (short) (narrow) %v1920_v8, 32  ;;  %v884_v9 = vpop.f32.mrf.mxu1 }
 0x5fa   : > { %1921 = vtanh.f32 %v884_v9 }
 0x600   : > { %v1922_v3 = vpop.eup %1921 }
 0x601   : > { %896 = vxpose.xlu2.b32.cont [3/4] (short) (narrow) %v1922_v3, 32  ;;  %v887_v10 = vpop.f32.mrf.mxu1 }
 0x602   : > { %1923 = vtanh.f32 %v887_v10 }
 0x608   : > { %v1924_v4 = vpop.eup %1923 }
 0x609   : > { %897 = vxpose.xlu2.b32.end [4/4] (short) (narrow) %v1924_v4, 32 }
 0x615   : > { %v1103_v5 = vpop.f32.mrf.mxu1 }
 0x61d   : > { %v1106_v11 = vpop.f32.mrf.mxu1 }
 0x625   : > { %v1109_v12 = vpop.f32.mrf.mxu1 }
 0x62d   : > { %v1112_v6 = vpop.f32.mrf.mxu1 }
 0x62e   : > { %1127 = vmatpush.msra.mxu3 %v1112_v6 }
 0x630   : > { %1128 = vmatpush.msra.mxu3 %v1109_v12 }
 0x632   : > { %1129 = vmatpush.msra.mxu3 %v1106_v11 }
 0x634   : > { %1130 = vmatpush.msra.mxu3 %v1103_v5 }
 0x635   : > { %1827 = vmatmul.msk.f32.vlgmr.msra.gmra.mxu3 %vm366_vm2, %v2295_v30  ;;  %v1286_v16 = vpop.f32.mrf.mxu1 }
 0x636   : > { %1330 = vmatpush.msrb.mxu3 %v1907_v14 }
 0x638   : > { %1331 = vmatpush.msrb.mxu3 %v1908_v15 }
 0x63a   : > { %1502 = vmatpush.msra.mxu3 %v2160_v0 }
 0x63c   : > { %1503 = vmatpush.msra.mxu3 %v2167_v1 }
 0x63d   : > { %1828 = vmatmul.msk.f32.gmra.mxu3 %vm366_vm2, %v2289_v24  ;;  %v1289_v17 = vpop.f32.mrf.mxu1 }
 0x645   : > { %1829 = vmatmul.msk.f32.gmra.mxu3 %vm366_vm2, %v2283_v45  ;;  %v1292_v18 = vpop.f32.mrf.mxu1 }
 0x64d   : > { %1830 = vmatmul.msk.f32.gmra.mxu3 %vm366_vm2, %v2277_v44  ;;  %v1295_v0 = vpop.f32.mrf.mxu1 }
 0x655   : > { %1845 = vmatmul.msk.f32.vlgmr.msrb.gmra.mxu3 %vm275_vm0, %v1286_v16 }
 0x65d   : > { %1846 = vmatmul.msk.f32.gmra.mxu3 %vm275_vm0, %v1289_v17 }
 0x665   : > { %1847 = vmatmul.msk.f32.gmra.mxu3 %vm275_vm0, %v1292_v18 }
 0x66d   : > { %1848 = vmatmul.msk.f32.gmra.mxu3 %vm275_vm0, %v1295_v0 }
 0x68a   : > { %v910_v1 = vpop.trf.xlu2 }
 0x68b   : > { %v926_v19 = vadd.f32 %v1918_v2, %v910_v1 }
 0x68d   : > { %v930_v22 = vmul.f32 0.5, %v926_v19 }
 0x68f   : > { %v934_v26 = vsel %vm2082_vm5, 0.0, %v930_v22 }
 0x690   : > { %1598 = vrot.lane.b32.xlu2 %v934_v26, %s1950_s27 }
 0x692   : > { %v911_v38 = vpop.trf.xlu2 }
 0x693   : > { %v927_v39 = vadd.f32 %v1920_v8, %v911_v38 }
 0x695   : > { %v931_v41 = vmul.f32 0.5, %v927_v39 }
 0x697   : > { %v935_v42 = vsel %vm2070_vm4, 0.0, %v931_v41 }
 0x698   : > { %1600 = vrot.lane.b32.xlu0 %v935_v42, %s1950_s27 }
 0x69a   : > { %v912_v43 = vpop.trf.xlu2 }
 0x69b   : > { %v928_v35 = vadd.f32 %v1922_v3, %v912_v43 }
 0x69d   : > { %v932_v46 = vmul.f32 0.5, %v928_v35 }
 0x69f   : > { %v936_v33 = vsel %vm2051_vm3, 0.0, %v932_v46 }
 0x6a0   : > { %1602 = vrot.lane.b32.xlu1 %v936_v33, %s1950_s27 }
 0x6a2   : > { %v913_v47 = vpop.trf.xlu2 }
 0x6a3   : > { %v929_v48 = vadd.f32 %v1924_v4, %v913_v47 }
 0x6a5   : > { %v933_v49 = vmul.f32 0.5, %v929_v48 }
 0x6a7   : > { %v937_v50 = vsel %vm2038_vm1, 0.0, %v933_v49 }
 0x6a8   : > { %1604 = vrot.lane.b32.xlu2 %v937_v50, %s1950_s27 }
 0x6b8   : > { %v1132_v51 = vpop.f32.mrf.mxu3 }
 0x6b9   : > { %v1144_v32 = vmax.f32 %v1132_v51, 0.0 }
 0x6bb   : > { %1831 = vmatmul.msk.f32.vlgmr.msra.gmra.mxu2 %vm275_vm0, %v1144_v32 }
 0x6c0   : > { %v1135_v52 = vpop.f32.mrf.mxu3 }
 0x6c1   : > { %v1145_v40 = vmax.f32 %v1135_v52, 0.0 }
 0x6c3   : > { %1832 = vmatmul.msk.f32.gmra.mxu2 %vm275_vm0, %v1145_v40 }
 0x6c8   : > { %v1138_v54 = vpop.f32.mrf.mxu3 }
 0x6c9   : > { %v1146_v29 = vmax.f32 %v1138_v54, 0.0 }
 0x6cb   : > { %1833 = vmatmul.msk.f32.gmra.mxu2 %vm275_vm0, %v1146_v29 }
 0x6d0   : > { %v1141_v56 = vpop.f32.mrf.mxu3 }
 0x6d1   : > { %v1147_v23 = vmax.f32 %v1141_v56, 0.0 }
 0x6d3   : > { %1834 = vmatmul.msk.f32.gmra.mxu2 %vm275_vm0, %v1147_v23 }
 0x6d8   : > { %v1333_v21 = vpop.f32.mrf.mxu3 }
 0x6d9   : > { %v1345_v9 = vand.u32 2147483647, %v1333_v21 }
 0x6db   : > { %v2391_v10 = vsel %vm2082_vm5, 1.0, %v1345_v9 }
 0x6e0   : > { %v1336_v58 = vpop.f32.mrf.mxu3 }
 0x6e1   : > { %v1346_v7 = vand.u32 2147483647, %v1336_v58 }
 0x6e3   : > { %v2385_v3 = vsel %vm2070_vm4, 1.0, %v1346_v7 }
 0x6e8   : > { %v1339_v60 = vpop.f32.mrf.mxu3 }
 0x6e9   : > { %v1347_v63 = vand.u32 2147483647, %v1339_v60 }
 0x6eb   : > { %v2379_v8 = vsel %vm2051_vm3, 1.0, %v1347_v63 }
 0x6f0   : > { %v1342_v61 = vpop.f32.mrf.mxu3 }
 0x6f1   : > { %v1348_v62 = vand.u32 2147483647, %v1342_v61 }
 0x6f3   : > { %v2373_v2 = vsel %vm2038_vm1, 1.0, %v1348_v62 }
 0x6f4   : > { %1849 = vmatpush.xpose.msk.msrb.mxu2 %vm366_vm2, %v2373_v2 }
 0x6f8   : > { %1850 = vmatpush.xpose.msk.msrb.mxu2 %vm366_vm2, %v2379_v8 }
 0x6fc   : > { %1851 = vmatpush.xpose.msk.msrb.mxu2 %vm366_vm2, %v2385_v3 }
 0x700   : > { %1852 = vmatpush.xpose.msk.msrb.mxu2 %vm366_vm2, %v2391_v10 }
 0x703   : > { %1853 = vmatmul.msk.f32.vlgmr.msrb.gmra.mxu2 %vm366_vm2, %v2391_v10 }
 0x70a   : > { %v2435_v43 = vpop.permute.xlu0 %1600 }
 0x70b   : > { %1854 = vmatmul.msk.f32.gmra.mxu2 %vm366_vm2, %v2385_v3 }
 0x713   : > { %1855 = vmatmul.msk.f32.gmra.mxu2 %vm366_vm2, %v2379_v8 }
 0x71b   : > { %1856 = vmatmul.msk.f32.gmra.mxu2 %vm366_vm2, %v2373_v2 }
 0x73e   : > { %v1177_v4 = vpop.f32.mrf.mxu2 }
 0x746   : > { %v1180_v5 = vpop.f32.mrf.mxu2 }
 0x74e   : > { %v1183_v11 = vpop.f32.mrf.mxu2 }
 0x756   : > { %v1186_v12 = vpop.f32.mrf.mxu2 }
 0x757   : > { %1201 = vmatpush.msra.mxu0 %v1186_v12 }
 0x759   : > { %1202 = vmatpush.msra.mxu0 %v1183_v11 }
 0x75b   : > { %1203 = vmatpush.msra.mxu0 %v1180_v5 }
 0x75d   : > { %1204 = vmatpush.msra.mxu0 %v1177_v4 }
 0x75e   : > { %1835 = vmatmul.msk.f32.vlgmr.msra.gmra.mxu0 %vm366_vm2, %v2295_v30 }
 0x75f   : > { %1426 = vmatpush.msrb.mxu0 %v2049_v25 }
 0x761   : > { %1427 = vmatpush.msrb.mxu0 %v2062_v28 }
 0x763   : > { %1428 = vmatpush.msrb.mxu0 %v2109_v36 }
 0x765   : > { %1429 = vmatpush.msrb.mxu0 %v2115_v37 }
 0x766   : > { %1836 = vmatmul.msk.f32.gmra.mxu0 %vm366_vm2, %v2289_v24 }
 0x76e   : > { %1837 = vmatmul.msk.f32.gmra.mxu0 %vm366_vm2, %v2283_v45 }
 0x776   : > { %1838 = vmatmul.msk.f32.gmra.mxu0 %vm366_vm2, %v2277_v44 }
 0x786   : > { %v1382_v6 = vpop.f32.mrf.mxu2 }
 0x787   : > { %v1394_v30 = vsel %vm2082_vm5, 1.0, %v1382_v6 }
 0x788   : > { %v1398_v25 = vand.u32 2147483647, %v1394_v30 }
 0x78a   : > { %1857 = vmatmul.msk.f32.vlgmr.msrb.gmra.mxu0 %vm366_vm2, %v1398_v25 }
 0x78e   : > { %v1385_v28 = vpop.f32.mrf.mxu2 }
 0x78f   : > { %v1395_v36 = vsel %vm2070_vm4, 1.0, %v1385_v28 }
 0x790   : > { %v1399_v37 = vand.u32 2147483647, %v1395_v36 }
 0x792   : > { %1858 = vmatmul.msk.f32.gmra.mxu0 %vm366_vm2, %v1399_v37 }
 0x796   : > { %v1388_v24 = vpop.f32.mrf.mxu2 }
 0x797   : > { %v1396_v45 = vsel %vm2051_vm3, 1.0, %v1388_v24 }
 0x798   : > { %v1400_v13 = vand.u32 2147483647, %v1396_v45 }
 0x79a   : > { %1859 = vmatmul.msk.f32.gmra.mxu0 %vm366_vm2, %v1400_v13 }
 0x79e   : > { %v1391_v44 = vpop.f32.mrf.mxu2 }
 0x79f   : > { %v1397_v14 = vsel %vm2038_vm1, 1.0, %v1391_v44 }
 0x7a0   : > { %v1401_v15 = vand.u32 2147483647, %v1397_v14 }
 0x7a2   : > { %1860 = vmatmul.msk.f32.gmra.mxu0 %vm366_vm2, %v1401_v15 }
 0x7db   : > { %v1206_v16 = vpop.f32.mrf.mxu0 }
 0x7dc   : > { %1925 = vtanh.f32 %v1206_v16 }
 0x7e2   : > { %v1926_v17 = vpop.eup %1925 }
 0x7e3   : > { %v1209_v18 = vpop.f32.mrf.mxu0  ;;  %1222 = vxpose.xlu0.b32.start [1/4] (short) (narrow) %v1926_v17, 32 }
 0x7e4   : > { %1927 = vtanh.f32 %v1209_v18 }
 0x7ea   : > { %v1928_v0 = vpop.eup %1927 }
 0x7eb   : > { %v1212_v1 = vpop.f32.mrf.mxu0  ;;  %1223 = vxpose.xlu0.b32.cont [2/4] (short) (narrow) %v1928_v0, 32 }
 0x7ec   : > { %1929 = vtanh.f32 %v1212_v1 }
 0x7f2   : > { %v1930_v19 = vpop.eup %1929 }
 0x7f3   : > { %v1215_v22 = vpop.f32.mrf.mxu0  ;;  %1224 = vxpose.xlu0.b32.cont [3/4] (short) (narrow) %v1930_v19, 32 }
 0x7f4   : > { %1931 = vtanh.f32 %v1215_v22 }
 0x7fa   : > { %v1932_v26 = vpop.eup %1931 }
 0x7fb   : > { %1225 = vxpose.xlu0.b32.end [4/4] (short) (narrow) %v1932_v26, 32 }
 0x807   : > { %v1431_v38 = vpop.f32.mrf.mxu0 }
 0x80f   : > { %v1434_v39 = vpop.f32.mrf.mxu0 }
 0x817   : > { %v1437_v41 = vpop.f32.mrf.mxu0 }
 0x81f   : > { %v1440_v42 = vpop.f32.mrf.mxu0 }
 0x820   : > { %1455 = vmatpush.msra.mxu1 %v1440_v42 }
 0x822   : > { %1456 = vmatpush.msra.mxu1 %v1437_v41 }
 0x824   : > { %1457 = vmatpush.msra.mxu1 %v1434_v39 }
 0x826   : > { %1458 = vmatpush.msra.mxu1 %v1431_v38 }
 0x827   : > { %1861 = vmatmul.msk.f32.vlgmr.msra.gmra.mxu1 %vm366_vm2, %v2391_v10 }
 0x82f   : > { %1862 = vmatmul.msk.f32.gmra.mxu1 %vm366_vm2, %v2385_v3 }
 0x837   : > { %1863 = vmatmul.msk.f32.gmra.mxu1 %vm366_vm2, %v2379_v8 }
 0x83f   : > { %1864 = vmatmul.msk.f32.gmra.mxu1 %vm366_vm2, %v2373_v2 }
 0x887   : > { %v1238_v35 = vpop.trf.xlu0 }
 0x888   : > { %v1254_v46 = vadd.f32 %v1926_v17, %v1238_v35  ;;  %v580_v35 = vpop.trf.xlu1 }
 0x88a   : > { %v1258_v33 = vmul.f32 0.5, %v1254_v46 }
 0x88c   : > { %v1262_v47 = vsel %vm2082_vm5, 0.0, %v1258_v33 }
 0x88d   : > { %1614 = vrot.lane.b32.xlu1 %v1262_v47, %s1951_s29 }
 0x88f   : > { %v1239_v48 = vpop.trf.xlu0 }
 0x890   : > { %v1255_v49 = vadd.f32 %v1928_v0, %v1239_v48  ;;  %v581_v46 = vpop.trf.xlu1 }
 0x891   : > { %v597_v34 = vadd.f32 %v2248_v55, %v581_v46 }
 0x892   : > { %v1259_v50 = vmul.f32 0.5, %v1255_v49  ;;  %v596_v49 = vadd.f32 %v2245_v53, %v580_v35 }
 0x894   : > { %v1263_v51 = vsel %vm2070_vm4, 0.0, %v1259_v50  ;;  %v600_v50 = vmul.f32 0.5, %v596_v49 }
 0x895   : > { %1616 = vrot.lane.b32.xlu2 %v1263_v51, %s1951_s29 }
 0x897   : > { %v1240_v32 = vpop.trf.xlu0 }
 0x898   : > { %v1256_v52 = vadd.f32 %v1930_v19, %v1240_v32  ;;  %v582_v33 = vpop.trf.xlu1  ;;  %v604_v32 = vsel %vm2082_vm5, 0.0, %v600_v50 }
 0x89a   : > { %v1260_v40 = vmul.f32 0.5, %v1256_v52 }
 0x89c   : > { %v1264_v54 = vsel %vm2051_vm3, 0.0, %v1260_v40 }
 0x89d   : > { %1618 = vrot.lane.b32.xlu1 %v1264_v54, %s1951_s29 }
 0x89f   : > { %v1241_v29 = vpop.trf.xlu0 }
 0x8a0   : > { %v1257_v56 = vadd.f32 %v1932_v26, %v1241_v29  ;;  %v583_v47 = vpop.trf.xlu1 }
 0x8a1   : > { %v599_v53 = vadd.f32 %v2254_v59, %v583_v47 }
 0x8a2   : > { %v1261_v23 = vmul.f32 0.5, %v1257_v56 }
 0x8a3   : > { %v603_v56 = vmul.f32 0.5, %v599_v53 }
 0x8a4   : > { %v1460_v21 = vpop.f32.mrf.mxu1  ;;  %v1265_v58 = vsel %vm2038_vm1, 0.0, %v1261_v23 }
 0x8a5   : > { %v1472_v60 = vmax.f32 %v1460_v21, 0.0  ;;  %1620 = vrot.lane.b32.xlu0 %v1265_v58, %s1951_s29  ;;  %v607_v21 = vsel %vm2038_vm1, 0.0, %v603_v56 }
 0x8a7   : > { %1865 = vmatmul.msk.f32.vlgmr.msra.gmra.mxu3 %vm275_vm0, %v1472_v60 }
 0x8a8   : > { %v1603_v48 = vpop.permute.xlu1 %1602 }
 0x8ac   : > { %v1463_v61 = vpop.f32.mrf.mxu1 }
 0x8ad   : > { %v1473_v62 = vmax.f32 %v1463_v61, 0.0 }
 0x8af   : > { %1866 = vmatmul.msk.f32.gmra.mxu3 %vm275_vm0, %v1473_v62 }
 0x8b4   : > { %v1466_v63 = vpop.f32.mrf.mxu1 }
 0x8b5   : > { %v1474_v7 = vmax.f32 %v1466_v63, 0.0 }
 0x8b7   : > { %1867 = vmatmul.msk.f32.gmra.mxu3 %vm275_vm0, %v1474_v7  ;;  %v601_v7 = vmul.f32 0.5, %v597_v34 }
 0x8b9   : > { %v605_v59 = vsel %vm2070_vm4, 0.0, %v601_v7 }
 0x8ba   : > { %v1643_v55 = vsel %vm366_vm2, %v605_v59, %v2435_v43 }
 0x8bc   : > { %v1469_v9 = vpop.f32.mrf.mxu1 }
 0x8bd   : > { %v1475_v4 = vmax.f32 %v1469_v9, 0.0  ;;  %v598_v9 = vadd.f32 %v2251_v57, %v582_v33 }
 0x8bf   : > { %1868 = vmatmul.msk.f32.gmra.mxu3 %vm275_vm0, %v1475_v4 }
 0x8ff   : > { %v1615_v51 = vpop.permute.xlu1 %1614 }
 0x90f   : > { %v1619_v60 = vpop.permute.xlu1 %1618 }
 0x917   : > { %v1621_v23 = vpop.permute.xlu0 %1620 }
 0x92a   : > { %v1505_v5 = vpop.f32.mrf.mxu3 }
 0x932   : > { %v1508_v11 = vpop.f32.mrf.mxu3 }
 0x93a   : > { %v1511_v12 = vpop.f32.mrf.mxu3 }
 0x942   : > { %v1514_v6 = vpop.f32.mrf.mxu3 }
 0x943   : > { %1529 = vmatpush.msra.mxu2 %v1514_v6 }
 0x945   : > { %1530 = vmatpush.msra.mxu2 %v1511_v12 }
 0x947   : > { %1531 = vmatpush.msra.mxu2 %v1508_v11  ;;  %v602_v11 = vmul.f32 0.5, %v598_v9 }
 0x949   : > { %1532 = vmatpush.msra.mxu2 %v1505_v5  ;;  %v606_v12 = vsel %vm2051_vm3, 0.0, %v602_v11 }
 0x94a   : > { %1869 = vmatmul.msk.f32.vlgmr.msra.gmra.mxu2 %vm366_vm2, %v2391_v10  ;;  %v1644_v6 = vsel %vm366_vm2, %v606_v12, %v1603_v48 }
 0x94b   : > { %v1649_v31 = vsel %vm1646_vm7, %v1644_v6, %v1619_v60 }
 0x952   : > { %1870 = vmatmul.msk.f32.gmra.mxu2 %vm366_vm2, %v2385_v3 }
 0x95a   : > { %1871 = vmatmul.msk.f32.gmra.mxu2 %vm366_vm2, %v2379_v8  ;;  %v1599_v8 = vpop.permute.xlu2 %1598 }
 0x95b   : > { %v1642_v52 = vsel %vm366_vm2, %v604_v32, %v1599_v8 }
 0x95c   : > { %v1647_v40 = vsel %vm1646_vm7, %v1642_v52, %v1615_v51 }
 0x962   : > { %1872 = vmatmul.msk.f32.gmra.mxu2 %vm366_vm2, %v2373_v2  ;;  %v1605_v45 = vpop.permute.xlu2 %1604 }
 0x963   : > { %v1645_v58 = vsel %vm366_vm2, %v607_v21, %v1605_v45 }
 0x964   : > { %v1650_v61 = vsel %vm1646_vm7, %v1645_v58, %v1621_v23 }
 0x96a   : > { %v1617_v13 = vpop.permute.xlu2 %1616 }
 0x96b   : > { %v1648_v20 = vsel %vm1646_vm7, %v1643_v55, %v1617_v13 }
 0x9cd   : > { %v1534_v30 = vpop.f32.mrf.mxu2 }
 0x9ce   : > { %1933 = vtanh.f32 %v1534_v30 }
 0x9d4   : > { %v1934_v25 = vpop.eup %1933 }
 0x9d5   : > { %v1537_v28 = vpop.f32.mrf.mxu2  ;;  %1550 = vxpose.xlu2.b32.start [1/4] (short) (narrow) %v1934_v25, 32 }
 0x9d6   : > { %1935 = vtanh.f32 %v1537_v28 }
 0x9dc   : > { %v1936_v36 = vpop.eup %1935 }
 0x9dd   : > { %v1540_v37 = vpop.f32.mrf.mxu2  ;;  %1551 = vxpose.xlu2.b32.cont [2/4] (short) (narrow) %v1936_v36, 32 }
 0x9de   : > { %1937 = vtanh.f32 %v1540_v37 }
 0x9e4   : > { %v1938_v10 = vpop.eup %1937 }
 0x9e5   : > { %v1543_v24 = vpop.f32.mrf.mxu2  ;;  %1552 = vxpose.xlu2.b32.cont [3/4] (short) (narrow) %v1938_v10, 32 }
 0x9e6   : > { %1939 = vtanh.f32 %v1543_v24 }
 0x9ec   : > { %v1940_v3 = vpop.eup %1939 }
 0x9ed   : > { %1553 = vxpose.xlu2.b32.end [4/4] (short) (narrow) %v1940_v3, 32 }
 0xa6e   : > { %v1566_v2 = vpop.trf.xlu2 }
 0xa6f   : > { %v1582_v44 = vadd.f32 %v1934_v25, %v1566_v2 }
 0xa71   : > { %v1586_v14 = vmul.f32 0.5, %v1582_v44 }
 0xa73   : > { %v1590_v15 = vsel %vm2082_vm5, 0.0, %v1586_v14 }
 0xa74   : > { %1630 = vrot.lane.b32.xlu2 %v1590_v15, %s1949_s22 }
 0xa76   : > { %v1567_v16 = vpop.trf.xlu2 }
 0xa77   : > { %v1583_v17 = vadd.f32 %v1936_v36, %v1567_v16 }
 0xa79   : > { %v1587_v18 = vmul.f32 0.5, %v1583_v17 }
 0xa7b   : > { %v1591_v0 = vsel %vm2070_vm4, 0.0, %v1587_v18 }
 0xa7c   : > { %1632 = vrot.lane.b32.xlu1 %v1591_v0, %s1949_s22 }
 0xa7e   : > { %v1568_v1 = vpop.trf.xlu2 }
 0xa7f   : > { %v1584_v19 = vadd.f32 %v1938_v10, %v1568_v1 }
 0xa81   : > { %v1588_v22 = vmul.f32 0.5, %v1584_v19 }
 0xa83   : > { %v1592_v26 = vsel %vm2051_vm3, 0.0, %v1588_v22 }
 0xa84   : > { %1634 = vrot.lane.b32.xlu0 %v1592_v26, %s1949_s22 }
 0xa86   : > { %v1569_v38 = vpop.trf.xlu2 }
 0xa87   : > { %v1585_v39 = vadd.f32 %v1940_v3, %v1569_v38 }
 0xa89   : > { %v1589_v41 = vmul.f32 0.5, %v1585_v39 }
 0xa8b   : > { %v1593_v42 = vsel %vm2038_vm1, 0.0, %v1589_v41 }
 0xa8c   : > { %1636 = vrot.lane.b32.xlu2 %v1593_v42, %s1949_s22 }
 0xace   : > { %v1631_v54 = vpop.permute.xlu2 %1630 }
 0xacf   : > { %v1652_v29 = vsel %vm1651_vm6, %v1647_v40, %v1631_v54 }
 0xad0   : > { %1656 = vst [vmem:[%s249_s7] sm:$0xff] %v1652_v29 }
 0xae6   : > { %v1637_v62 = vpop.permute.xlu2 %1636 }
 0xae7   : > { %v1655_v63 = vsel %vm1651_vm6, %v1650_v61, %v1637_v62 }
 0xae8   : > { %1659 = vst [vmem:[%s249_s7 + $0x18] sm:$0xff] %v1655_v63 }
 0xaee   : > { %v1633_v4 = vpop.permute.xlu1 %1632 }
 0xaef   : > { %v1653_v5 = vsel %vm1651_vm6, %v1648_v20, %v1633_v4 }
 0xaf0   : > { %1657 = vst [vmem:[%s249_s7 + $0x8] sm:$0xff] %v1653_v5 }
 0xaf6   : > { %v1635_v30 = vpop.permute.xlu0 %1634 }
 0xaf7   : > { %v1654_v57 = vsel %vm1651_vm6, %v1649_v31, %v1635_v30 }
 0xaf8   : > { %1658 = vst [vmem:[%s249_s7 + $0x10] sm:$0xff] %v1654_v57 }
 0xaf9 PF: > { %s15_s18 = sadd.s32 1, %s1947_s18  }
 0xafa   : > { %p12_p5 = scmp.ge.s32.totalorder %s15_s18, 4  }
 0xafc   :  { %14 = sbr.rel (!%p12_p5) target bundleno = 1 (0x1), region = 76 }

</bundles_post_ra>
